<compile_context>
chip_gen: v7x
topology: tpu7x:2x2x1
jax: 0.10.0
libtpu: 0.0.40
codegen_flags: <defaults>
</compile_context>

<pallas_src>
import functools

import jax
import jax.numpy as jnp
from jax.experimental import pallas as pl
from jax.experimental.pallas import tpu as pltpu


_LANE = 128


def _round_up(n, m):
    return ((n + m - 1) // m) * m


# ----------------------------------------------------------------------------
# Kernel: one encoder per grid point; both directions interleaved in-body.
# PyTorch GRU gate equations (gate order along fused axis: [r | z | n]):
#   r = sig(Wir x + bir + Whr h + bhr)
#   z = sig(Wiz x + biz + Whz h + bhz)
#   n = tanh(Win x + bin + r * (Whn h + bhn))
#   h' = (1 - z) * n + z * h        (computed as n + z*(h - n))
# Biases bir/biz/bin/bhr/bhz are folded into the hoisted projection (b_proj);
# bhn is applied per-step inside the r*(.) term.
# ----------------------------------------------------------------------------
def _bigru_kernel(x_ref, h0_ref, wi_ref, wh_ref, bp_ref, bhn_ref,
                  out_ref, hT_ref, xp_sc, *, seq_len, batch, hp):
    T, B, Hp = seq_len, batch, hp
    G = 3 * Hp

    # ---- hoisted input projection (off the serial path) --------------------
    # xp[d, t] = x[t] @ Wi[d] + (b_i[d] + b_h[d] for the r/z gates)
    for d in range(2):
        wi = wi_ref[d]                                  # (I, 3Hp)
        bp = jnp.broadcast_to(bp_ref[d], (B, G))        # hoisted broadcast
        for t in range(T):                              # static t
            xp_sc[d, t] = (jnp.dot(x_ref[t], wi,
                                   preferred_element_type=jnp.float32) + bp)

    # ---- interleaved fwd/bwd recurrence, static time indices ---------------
    wh_f = wh_ref[0]                                    # (Hp, 3Hp)
    wh_b = wh_ref[1]
    bhn_f = jnp.broadcast_to(bhn_ref[0], (B, Hp))       # hoisted broadcasts
    bhn_b = jnp.broadcast_to(bhn_ref[1], (B, Hp))
    h_f = h0_ref[0]                                     # (B, Hp)
    h_b = h0_ref[1]

    for s in range(T):
        tf = s
        tb = T - 1 - s
        # Issue both direction matmuls back-to-back: one chain's MXU latency
        # hides under the other chain's VPU/EUP gate math.
        hw_f = jnp.dot(h_f, wh_f, preferred_element_type=jnp.float32)
        hw_b = jnp.dot(h_b, wh_b, preferred_element_type=jnp.float32)
        xp_f = xp_sc[0, tf]                             # (B, 3Hp), lane-dense
        xp_b = xp_sc[1, tb]

        # forward direction (128-aligned lane slices)
        r_f = jax.nn.sigmoid(xp_f[:, 0:Hp] + hw_f[:, 0:Hp])
        z_f = jax.nn.sigmoid(xp_f[:, Hp:2 * Hp] + hw_f[:, Hp:2 * Hp])
        n_f = jnp.tanh(xp_f[:, 2 * Hp:G] + r_f * (hw_f[:, 2 * Hp:G] + bhn_f))
        h_f = n_f + z_f * (h_f - n_f)

        # backward direction
        r_b = jax.nn.sigmoid(xp_b[:, 0:Hp] + hw_b[:, 0:Hp])
        z_b = jax.nn.sigmoid(xp_b[:, Hp:2 * Hp] + hw_b[:, Hp:2 * Hp])
        n_b = jnp.tanh(xp_b[:, 2 * Hp:G] + r_b * (hw_b[:, 2 * Hp:G] + bhn_b))
        h_b = n_b + z_b * (h_b - n_b)

        out_ref[0, tf] = h_f                            # whole-tile stores
        out_ref[1, tb] = h_b

    hT_ref[0] = h_f
    hT_ref[1] = h_b


def _vmem_limit_bytes(T, B, I, Hp):
    """Explicit scoped-VMEM budget from the block footprint (with headroom)."""
    pad8 = lambda n: _round_up(n, 8)
    G = 3 * Hp
    blk = (T * pad8(B) * _round_up(I, _LANE)      # x
           + 2 * pad8(B) * Hp                     # h0
           + 2 * pad8(I) * G                      # Wi
           + 2 * Hp * G                           # Wh
           + 2 * pad8(1) * G                      # b_proj
           + 2 * pad8(1) * Hp                     # b_hn
           + 2 * T * pad8(B) * Hp                 # out sequence
           + 2 * pad8(B) * Hp)                    # h_T
    scratch = 2 * T * pad8(B) * G                 # xp_sc
    total = (2 * blk + scratch) * 4               # double-buffered blocks, f32
    return int(min(max(2 * total, 4 << 20), 64 << 20))


def _run_bigrus(x, h0_all, wi_all, wh_all, bp_all, bhn_all):
    """Run all bidirectional GRU encoders in one pallas_call.
    x: (T, B, I);  *_all have leading dim E (encoders) then direction dim 2.
    Returns out_all (E, 2, T, B, Hp), hT_all (E, 2, B, Hp)."""
    T, B, I = x.shape
    E = wh_all.shape[0]
    Hp = wh_all.shape[2]
    G = 3 * Hp

    kernel = functools.partial(_bigru_kernel, seq_len=T, batch=B, hp=Hp)

    out_all, hT_all = pl.pallas_call(
        kernel,
        grid=(E,),                                 # encoder axis (gen / ctrl)
        in_specs=[
            pl.BlockSpec((T, B, I), lambda e: (0, 0, 0)),             # x
            pl.BlockSpec((None, 2, B, Hp), lambda e: (e, 0, 0, 0)),   # h0
            pl.BlockSpec((None, 2, I, G), lambda e: (e, 0, 0, 0)),    # Wi
            pl.BlockSpec((None, 2, Hp, G), lambda e: (e, 0, 0, 0)),   # Wh
            pl.BlockSpec((None, 2, 1, G), lambda e: (e, 0, 0, 0)),    # b_proj
            pl.BlockSpec((None, 2, 1, Hp), lambda e: (e, 0, 0, 0)),   # b_hn
        ],
        out_specs=(
            pl.BlockSpec((None, 2, T, B, Hp), lambda e: (e, 0, 0, 0, 0)),
            pl.BlockSpec((None, 2, B, Hp), lambda e: (e, 0, 0, 0)),
        ),
        out_shape=(
            jax.ShapeDtypeStruct((E, 2, T, B, Hp), jnp.float32),
            jax.ShapeDtypeStruct((E, 2, B, Hp), jnp.float32),
        ),
        scratch_shapes=[pltpu.VMEM((2, T, B, G), jnp.float32)],       # x @ Wi
        compiler_params=pltpu.CompilerParams(
            dimension_semantics=("parallel",),     # v7x: one encoder per TC
            vmem_limit_bytes=_vmem_limit_bytes(T, B, I, Hp)),
    )(x, h0_all, wi_all, wh_all, bp_all, bhn_all)
    return out_all, hT_all


# ----------------------------------------------------------------------------
# Parameter construction (PyTorch-style U(-1/sqrt(H), 1/sqrt(H)) init).
# Unpadded fused layout per direction: Wi (I, 3H), Wh (H, 3H), gates [r|z|n].
# ----------------------------------------------------------------------------
def _bigru_params(key, input_size, hidden_size):
    ks = jax.random.split(key, 8)
    s = 1.0 / float(hidden_size) ** 0.5
    u = lambda k, shape: jax.random.uniform(k, shape, jnp.float32, -s, s)
    G = 3 * hidden_size
    wi = jnp.stack([u(ks[0], (input_size, G)), u(ks[1], (input_size, G))])
    wh = jnp.stack([u(ks[2], (hidden_size, G)), u(ks[3], (hidden_size, G))])
    bi = jnp.stack([u(ks[4], (1, G)), u(ks[5], (1, G))])
    bh = jnp.stack([u(ks[6], (1, G)), u(ks[7], (1, G))])
    return wi, wh, bi, bh


def init_lfads_encoder_params(key, input_size, g_encoder_size,
                              g_latent_size, c_encoder_size=0):
    kg, kc, kw, kb = jax.random.split(key, 4)
    g_wi, g_wh, g_bi, g_bh = _bigru_params(kg, input_size, g_encoder_size)
    sf = 1.0 / float(2 * g_encoder_size) ** 0.5
    params = {
        "g_wi": g_wi, "g_wh": g_wh, "g_bi": g_bi, "g_bh": g_bh,
        "fc_w": jax.random.uniform(kw, (2 * g_encoder_size, 2 * g_latent_size),
                                   jnp.float32, -sf, sf),
        "fc_b": jax.random.uniform(kb, (1, 2 * g_latent_size),
                                   jnp.float32, -sf, sf),
        "c_wi": None, "c_wh": None, "c_bi": None, "c_bh": None,
    }
    if c_encoder_size > 0:
        c_wi, c_wh, c_bi, c_bh = _bigru_params(kc, input_size, c_encoder_size)
        params.update({"c_wi": c_wi, "c_wh": c_wh, "c_bi": c_bi, "c_bh": c_bh})
    return params


# ----------------------------------------------------------------------------
# Lane-dense packing: pad each gate slice H -> Hp, fold biases.
# Padded hidden columns stay exactly 0 through the GRU recurrence, so the
# padding is sliced off exactly after the kernel.
# ----------------------------------------------------------------------------
def _pack_encoder(wi, wh, bi, bh, H, Hp):
    def pad_gates(a):                     # (..., 3H) -> (..., 3Hp), per gate
        lead = a.shape[:-1]
        a3 = a.reshape(lead + (3, H))
        a3 = jnp.pad(a3, [(0, 0)] * len(lead) + [(0, 0), (0, Hp - H)])
        return a3.reshape(lead + (3 * Hp,))

    wi_p = pad_gates(wi)                                          # (2, I, 3Hp)
    wh_p = jnp.pad(pad_gates(wh), ((0, 0), (0, Hp - H), (0, 0)))  # (2, Hp, 3Hp)
    # fold b_i fully + b_h's r/z slices into the hoisted projection bias
    bh_rz = jnp.concatenate(
        [bh[..., :2 * H], jnp.zeros_like(bh[..., 2 * H:])], axis=-1)
    bp = pad_gates(bi + bh_rz)                                    # (2, 1, 3Hp)
    bhn = jnp.pad(bh[..., 2 * H:], ((0, 0), (0, 0), (0, Hp - H)))  # (2, 1, Hp)
    return wi_p, wh_p, bp, bhn


# ----------------------------------------------------------------------------
# Forward pass (mirrors LFADS_Encoder.forward; dropout p=0.0 -> identity)
# ----------------------------------------------------------------------------
def lfads_encoder_forward(params, x, hidden, *, clip_val=5.0):
    g_init, c_init = hidden                    # (2, B, Hg), (2, B, Hc) or None
    Hg = params["g_wh"].shape[-2]
    has_c = params["c_wi"] is not None
    Hc = params["c_wh"].shape[-2] if has_c else 0
    Hp = _round_up(max(Hg, max(Hc, 1)), _LANE)   # lane-dense hidden width

    packs = [_pack_encoder(params["g_wi"], params["g_wh"],
                           params["g_bi"], params["g_bh"], Hg, Hp)]
    h0_list = [jnp.pad(g_init, ((0, 0), (0, 0), (0, Hp - Hg)))]
    if has_c:
        packs.append(_pack_encoder(params["c_wi"], params["c_wh"],
                                   params["c_bi"], params["c_bh"], Hc, Hp))
        h0_list.append(jnp.pad(c_init, ((0, 0), (0, 0), (0, Hp - Hc))))

    wi_all = jnp.stack([p[0] for p in packs])
    wh_all = jnp.stack([p[1] for p in packs])
    bp_all = jnp.stack([p[2] for p in packs])
    bhn_all = jnp.stack([p[3] for p in packs])
    h0_all = jnp.stack(h0_list)

    out_all, hT_all = _run_bigrus(x, h0_all, wi_all, wh_all, bp_all, bhn_all)

    # --- generator encoder outputs + g0 head (tiny; plain jnp) --------------
    out_gru_g_enc = jnp.concatenate(
        [out_all[0, 0, :, :, :Hg], out_all[0, 1, :, :, :Hg]], axis=-1)
    hT_g = hT_all[0, :, :, :Hg]
    h_cat = jnp.clip(jnp.concatenate([hT_g[0], hT_g[1]], axis=1),
                     -clip_val, clip_val)
    theta = jnp.dot(h_cat, params["fc_w"],
                    preferred_element_type=jnp.float32) + params["fc_b"]
    gl = params["fc_w"].shape[1] // 2
    g0_mean, g0_logvar = theta[:, :gl], theta[:, gl:]

    # --- controller encoder (optional); output clamp as in PyTorch ----------
    if has_c:
        out_gru_c_enc = jnp.concatenate(
            [out_all[1, 0, :, :, :Hc], out_all[1, 1, :, :, :Hc]], axis=-1)
        out_gru_c_enc = jnp.clip(out_gru_c_enc, -clip_val, clip_val)
        return g0_mean, g0_logvar, out_gru_g_enc, out_gru_c_enc
    return g0_mean, g0_logvar, out_gru_g_enc, None


# ----------------------------------------------------------------------------
# Pure-JAX reference (for in-script correctness check only)
# ----------------------------------------------------------------------------
def _ref_gru_direction(x, h0, wi, wh, bi, bh, reverse):
    T = x.shape[0]
    H = wh.shape[0]
    h = h0
    out = [None] * T
    order = range(T - 1, -1, -1) if reverse else range(T)
    for t in order:
        xp = x[t] @ wi + bi
        hw = h @ wh + bh
        r = jax.nn.sigmoid(xp[:, :H] + hw[:, :H])
        z = jax.nn.sigmoid(xp[:, H:2 * H] + hw[:, H:2 * H])
        n = jnp.tanh(xp[:, 2 * H:] + r * hw[:, 2 * H:])
        h = (1.0 - z) * n + z * h
        out[t] = h
    return jnp.stack(out, axis=0), h


def _ref_bigru(x, h0, wi, wh, bi, bh):
    of, hf = _ref_gru_direction(x, h0[0], wi[0], wh[0], bi[0], bh[0], False)
    ob, hb = _ref_gru_direction(x, h0[1], wi[1], wh[1], bi[1], bh[1], True)
    return jnp.concatenate([of, ob], axis=-1), jnp.stack([hf, hb])


def _ref_forward(params, x, hidden, clip_val=5.0):
    g_init, c_init = hidden
    out_g, hT = _ref_bigru(x, g_init, params["g_wi"], params["g_wh"],
                           params["g_bi"], params["g_bh"])
    h_cat = jnp.clip(jnp.concatenate([hT[0], hT[1]], axis=1),
                     -clip_val, clip_val)
    theta = h_cat @ params["fc_w"] + params["fc_b"]
    gl = params["fc_w"].shape[1] // 2
    g0_mean, g0_logvar = theta[:, :gl], theta[:, gl:]
    if params["c_wi"] is not None:
        out_c, _ = _ref_bigru(x, c_init, params["c_wi"], params["c_wh"],
                              params["c_bi"], params["c_bh"])
        out_c = jnp.clip(out_c, -clip_val, clip_val)
        return g0_mean, g0_logvar, out_g, out_c
    return g0_mean, g0_logvar, out_g, None


# ----------------------------------------------------------------------------
if __name__ == "__main__":
    T, B = 8, 2
    input_size, g_enc, g_lat, c_enc = 16, 32, 8, 16

    key = jax.random.PRNGKey(0)
    k_x, k_hg, k_hc, k_p = jax.random.split(key, 4)

    x = jax.random.normal(k_x, (T, B, input_size), jnp.float32)
    h_g0 = jax.random.normal(k_hg, (2, B, g_enc), jnp.float32)
    h_c0 = jax.random.normal(k_hc, (2, B, c_enc), jnp.float32)

    params = init_lfads_encoder_params(k_p, input_size, g_enc, g_lat, c_enc)

    fwd = jax.jit(functools.partial(lfads_encoder_forward, clip_val=5.0))
    g0_mean, g0_logvar, out_g, out_c = fwd(params, x, (h_g0, h_c0))
    jax.block_until_ready((g0_mean, g0_logvar, out_g, out_c))

    # shape / range checks
    assert g0_mean.shape == (B, g_lat)
    assert g0_logvar.shape == (B, g_lat)
    assert out_g.shape == (T, B, 2 * g_enc)
    assert out_c.shape == (T, B, 2 * c_enc)
    assert bool(jnp.all(jnp.isfinite(g0_mean)))
    assert bool(jnp.all(jnp.isfinite(out_g)))
    assert bool(jnp.all(jnp.abs(out_c) <= 5.0))

    # numeric check vs pure-JAX reference (loose tol: both paths use
    # default-precision MXU matmuls with different summation order)
    r_mean, r_logvar, r_out_g, r_out_c = _ref_forward(
        params, x, (h_g0, h_c0), 5.0)
    tol = 5e-2
    assert float(jnp.max(jnp.abs(out_g - r_out_g))) < tol
    assert float(jnp.max(jnp.abs(out_c - r_out_c))) < tol
    assert float(jnp.max(jnp.abs(g0_mean - r_mean))) < tol
    assert float(jnp.max(jnp.abs(g0_logvar - r_logvar))) < tol

    print("KERNEL_OK")
</pallas_src>

<mosaic_0001>
module attributes {stable_mosaic.version = 11 : i64} {
  func.func @_bigru_kernel(%arg0: i32, %arg1: memref<8x2x16xf32, #tpu.memory_space<vmem>>, %arg2: memref<1x2x2x128xf32, #tpu.memory_space<vmem>>, %arg3: memref<1x2x16x384xf32, #tpu.memory_space<vmem>>, %arg4: memref<1x2x128x384xf32, #tpu.memory_space<vmem>>, %arg5: memref<1x2x1x384xf32, #tpu.memory_space<vmem>>, %arg6: memref<1x2x1x128xf32, #tpu.memory_space<vmem>>, %arg7: memref<1x2x8x2x128xf32, #tpu.memory_space<vmem>>, %arg8: memref<1x2x2x128xf32, #tpu.memory_space<vmem>>, %arg9: memref<2x8x2x384xf32, #tpu.memory_space<vmem>>) attributes {dimension_semantics = [#tpu.dimension_semantics<parallel>], iteration_bounds = array<i64: 2>, scalar_prefetch = 0 : i64, scratch_operands = 1 : i64, tpu.core_type = #tpu.core_type<tc>, window_params = [{pipeline_mode = #tpu.pipeline_mode<synchronous>, transform_indices = @transform_0, window_bounds = array<i64: 8, 2, 16>}, {transform_indices = @transform_1, window_bounds = array<i64: 1, 2, 2, 128>}, {transform_indices = @transform_2, window_bounds = array<i64: 1, 2, 16, 384>}, {transform_indices = @transform_3, window_bounds = array<i64: 1, 2, 128, 384>}, {transform_indices = @transform_4, window_bounds = array<i64: 1, 2, 1, 384>}, {transform_indices = @transform_5, window_bounds = array<i64: 1, 2, 1, 128>}, {transform_indices = @transform_6, window_bounds = array<i64: 1, 2, 8, 2, 128>}, {transform_indices = @transform_7, window_bounds = array<i64: 1, 2, 2, 128>}]} {
    %c0 = arith.constant 0 : index
    %c0_0 = arith.constant 0 : index
    %c0_1 = arith.constant 0 : index
    %c0_2 = arith.constant 0 : index
    %0 = vector.load %arg3[%c0, %c0_0, %c0_1, %c0_2] : memref<1x2x16x384xf32, #tpu.memory_space<vmem>>, vector<1x1x16x384xf32>
    %1 = vector.shape_cast %0 : vector<1x1x16x384xf32> to vector<16x384xf32>
    %c0_3 = arith.constant 0 : index
    %c0_4 = arith.constant 0 : index
    %c0_5 = arith.constant 0 : index
    %c0_6 = arith.constant 0 : index
    %2 = vector.load %arg5[%c0_3, %c0_4, %c0_5, %c0_6] : memref<1x2x1x384xf32, #tpu.memory_space<vmem>>, vector<1x1x1x384xf32>
    %3 = vector.shape_cast %2 : vector<1x1x1x384xf32> to vector<1x384xf32>
    %4 = vector.shape_cast %3 : vector<1x384xf32> to vector<1x384xf32>
    %5 = vector.broadcast %4 : vector<1x384xf32> to vector<2x384xf32>
    %c0_7 = arith.constant 0 : index
    %c0_8 = arith.constant 0 : index
    %c0_9 = arith.constant 0 : index
    %6 = vector.load %arg1[%c0_7, %c0_8, %c0_9] : memref<8x2x16xf32, #tpu.memory_space<vmem>>, vector<1x2x16xf32>
    %7 = vector.shape_cast %6 : vector<1x2x16xf32> to vector<2x16xf32>
    %cst = arith.constant dense<0.000000e+00> : vector<2x384xf32>
    %8 = tpu.matmul %7, %1, %cst {dimension_numbers = #tpu.dot_dimension_numbers<[1], [0], [0], [1], [0, 0, 1, 1], [], []>} : vector<2x16xf32>, vector<16x384xf32>, vector<2x384xf32> -> vector<2x384xf32>
    %9 = arith.addf %8, %5 : vector<2x384xf32>
    %c0_10 = arith.constant 0 : index
    %c0_11 = arith.constant 0 : index
    %c0_12 = arith.constant 0 : index
    %c0_13 = arith.constant 0 : index
    %10 = vector.load %arg9[%c0_10, %c0_11, %c0_12, %c0_13] : memref<2x8x2x384xf32, #tpu.memory_space<vmem>>, vector<1x1x2x384xf32>
    %11 = vector.shape_cast %10 : vector<1x1x2x384xf32> to vector<2x384xf32>
    %12 = vector.shape_cast %9 : vector<2x384xf32> to vector<1x1x2x384xf32>
    tpu.vector_store %arg9[%c0_10, %c0_11, %c0_12, %c0_13], %12 {strides = array<i32>} : memref<2x8x2x384xf32, #tpu.memory_space<vmem>>, vector<1x1x2x384xf32>,
    %c1 = arith.constant 1 : index
    %c0_14 = arith.constant 0 : index
    %c0_15 = arith.constant 0 : index
    %13 = vector.load %arg1[%c1, %c0_14, %c0_15] : memref<8x2x16xf32, #tpu.memory_space<vmem>>, vector<1x2x16xf32>
    %14 = vector.shape_cast %13 : vector<1x2x16xf32> to vector<2x16xf32>
    %cst_16 = arith.constant dense<0.000000e+00> : vector<2x384xf32>
    %15 = tpu.matmul %14, %1, %cst_16 {dimension_numbers = #tpu.dot_dimension_numbers<[1], [0], [0], [1], [0, 0, 1, 1], [], []>} : vector<2x16xf32>, vector<16x384xf32>, vector<2x384xf32> -> vector<2x384xf32>
    %16 = arith.addf %15, %5 : vector<2x384xf32>
    %c0_17 = arith.constant 0 : index
    %c1_18 = arith.constant 1 : index
    %c0_19 = arith.constant 0 : index
    %c0_20 = arith.constant 0 : index
    %17 = vector.load %arg9[%c0_17, %c1_18, %c0_19, %c0_20] : memref<2x8x2x384xf32, #tpu.memory_space<vmem>>, vector<1x1x2x384xf32>
    %18 = vector.shape_cast %17 : vector<1x1x2x384xf32> to vector<2x384xf32>
    %19 = vector.shape_cast %16 : vector<2x384xf32> to vector<1x1x2x384xf32>
    tpu.vector_store %arg9[%c0_17, %c1_18, %c0_19, %c0_20], %19 {strides = array<i32>} : memref<2x8x2x384xf32, #tpu.memory_space<vmem>>, vector<1x1x2x384xf32>,
    %c2 = arith.constant 2 : index
    %c0_21 = arith.constant 0 : index
    %c0_22 = arith.constant 0 : index
    %20 = vector.load %arg1[%c2, %c0_21, %c0_22] : memref<8x2x16xf32, #tpu.memory_space<vmem>>, vector<1x2x16xf32>
    %21 = vector.shape_cast %20 : vector<1x2x16xf32> to vector<2x16xf32>
    %cst_23 = arith.constant dense<0.000000e+00> : vector<2x384xf32>
    %22 = tpu.matmul %21, %1, %cst_23 {dimension_numbers = #tpu.dot_dimension_numbers<[1], [0], [0], [1], [0, 0, 1, 1], [], []>} : vector<2x16xf32>, vector<16x384xf32>, vector<2x384xf32> -> vector<2x384xf32>
    %23 = arith.addf %22, %5 : vector<2x384xf32>
    %c0_24 = arith.constant 0 : index
    %c2_25 = arith.constant 2 : index
    %c0_26 = arith.constant 0 : index
    %c0_27 = arith.constant 0 : index
    %24 = vector.load %arg9[%c0_24, %c2_25, %c0_26, %c0_27] : memref<2x8x2x384xf32, #tpu.memory_space<vmem>>, vector<1x1x2x384xf32>
    %25 = vector.shape_cast %24 : vector<1x1x2x384xf32> to vector<2x384xf32>
    %26 = vector.shape_cast %23 : vector<2x384xf32> to vector<1x1x2x384xf32>
    tpu.vector_store %arg9[%c0_24, %c2_25, %c0_26, %c0_27], %26 {strides = array<i32>} : memref<2x8x2x384xf32, #tpu.memory_space<vmem>>, vector<1x1x2x384xf32>,
    %c3 = arith.constant 3 : index
    %c0_28 = arith.constant 0 : index
    %c0_29 = arith.constant 0 : index
    %27 = vector.load %arg1[%c3, %c0_28, %c0_29] : memref<8x2x16xf32, #tpu.memory_space<vmem>>, vector<1x2x16xf32>
    %28 = vector.shape_cast %27 : vector<1x2x16xf32> to vector<2x16xf32>
    %cst_30 = arith.constant dense<0.000000e+00> : vector<2x384xf32>
    %29 = tpu.matmul %28, %1, %cst_30 {dimension_numbers = #tpu.dot_dimension_numbers<[1], [0], [0], [1], [0, 0, 1, 1], [], []>} : vector<2x16xf32>, vector<16x384xf32>, vector<2x384xf32> -> vector<2x384xf32>
    %30 = arith.addf %29, %5 : vector<2x384xf32>
    %c0_31 = arith.constant 0 : index
    %c3_32 = arith.constant 3 : index
    %c0_33 = arith.constant 0 : index
    %c0_34 = arith.constant 0 : index
    %31 = vector.load %arg9[%c0_31, %c3_32, %c0_33, %c0_34] : memref<2x8x2x384xf32, #tpu.memory_space<vmem>>, vector<1x1x2x384xf32>
    %32 = vector.shape_cast %31 : vector<1x1x2x384xf32> to vector<2x384xf32>
    %33 = vector.shape_cast %30 : vector<2x384xf32> to vector<1x1x2x384xf32>
    tpu.vector_store %arg9[%c0_31, %c3_32, %c0_33, %c0_34], %33 {strides = array<i32>} : memref<2x8x2x384xf32, #tpu.memory_space<vmem>>, vector<1x1x2x384xf32>,
    %c4 = arith.constant 4 : index
    %c0_35 = arith.constant 0 : index
    %c0_36 = arith.constant 0 : index
    %34 = vector.load %arg1[%c4, %c0_35, %c0_36] : memref<8x2x16xf32, #tpu.memory_space<vmem>>, vector<1x2x16xf32>
    %35 = vector.shape_cast %34 : vector<1x2x16xf32> to vector<2x16xf32>
    %cst_37 = arith.constant dense<0.000000e+00> : vector<2x384xf32>
    %36 = tpu.matmul %35, %1, %cst_37 {dimension_numbers = #tpu.dot_dimension_numbers<[1], [0], [0], [1], [0, 0, 1, 1], [], []>} : vector<2x16xf32>, vector<16x384xf32>, vector<2x384xf32> -> vector<2x384xf32>
    %37 = arith.addf %36, %5 : vector<2x384xf32>
    %c0_38 = arith.constant 0 : index
    %c4_39 = arith.constant 4 : index
    %c0_40 = arith.constant 0 : index
    %c0_41 = arith.constant 0 : index
    %38 = vector.load %arg9[%c0_38, %c4_39, %c0_40, %c0_41] : memref<2x8x2x384xf32, #tpu.memory_space<vmem>>, vector<1x1x2x384xf32>
    %39 = vector.shape_cast %38 : vector<1x1x2x384xf32> to vector<2x384xf32>
    %40 = vector.shape_cast %37 : vector<2x384xf32> to vector<1x1x2x384xf32>
    tpu.vector_store %arg9[%c0_38, %c4_39, %c0_40, %c0_41], %40 {strides = array<i32>} : memref<2x8x2x384xf32, #tpu.memory_space<vmem>>, vector<1x1x2x384xf32>,
    %c5 = arith.constant 5 : index
    %c0_42 = arith.constant 0 : index
    %c0_43 = arith.constant 0 : index
    %41 = vector.load %arg1[%c5, %c0_42, %c0_43] : memref<8x2x16xf32, #tpu.memory_space<vmem>>, vector<1x2x16xf32>
    %42 = vector.shape_cast %41 : vector<1x2x16xf32> to vector<2x16xf32>
    %cst_44 = arith.constant dense<0.000000e+00> : vector<2x384xf32>
    %43 = tpu.matmul %42, %1, %cst_44 {dimension_numbers = #tpu.dot_dimension_numbers<[1], [0], [0], [1], [0, 0, 1, 1], [], []>} : vector<2x16xf32>, vector<16x384xf32>, vector<2x384xf32> -> vector<2x384xf32>
    %44 = arith.addf %43, %5 : vector<2x384xf32>
    %c0_45 = arith.constant 0 : index
    %c5_46 = arith.constant 5 : index
    %c0_47 = arith.constant 0 : index
    %c0_48 = arith.constant 0 : index
    %45 = vector.load %arg9[%c0_45, %c5_46, %c0_47, %c0_48] : memref<2x8x2x384xf32, #tpu.memory_space<vmem>>, vector<1x1x2x384xf32>
    %46 = vector.shape_cast %45 : vector<1x1x2x384xf32> to vector<2x384xf32>
    %47 = vector.shape_cast %44 : vector<2x384xf32> to vector<1x1x2x384xf32>
    tpu.vector_store %arg9[%c0_45, %c5_46, %c0_47, %c0_48], %47 {strides = array<i32>} : memref<2x8x2x384xf32, #tpu.memory_space<vmem>>, vector<1x1x2x384xf32>,
    %c6 = arith.constant 6 : index
    %c0_49 = arith.constant 0 : index
    %c0_50 = arith.constant 0 : index
    %48 = vector.load %arg1[%c6, %c0_49, %c0_50] : memref<8x2x16xf32, #tpu.memory_space<vmem>>, vector<1x2x16xf32>
    %49 = vector.shape_cast %48 : vector<1x2x16xf32> to vector<2x16xf32>
    %cst_51 = arith.constant dense<0.000000e+00> : vector<2x384xf32>
    %50 = tpu.matmul %49, %1, %cst_51 {dimension_numbers = #tpu.dot_dimension_numbers<[1], [0], [0], [1], [0, 0, 1, 1], [], []>} : vector<2x16xf32>, vector<16x384xf32>, vector<2x384xf32> -> vector<2x384xf32>
    %51 = arith.addf %50, %5 : vector<2x384xf32>
    %c0_52 = arith.constant 0 : index
    %c6_53 = arith.constant 6 : index
    %c0_54 = arith.constant 0 : index
    %c0_55 = arith.constant 0 : index
    %52 = vector.load %arg9[%c0_52, %c6_53, %c0_54, %c0_55] : memref<2x8x2x384xf32, #tpu.memory_space<vmem>>, vector<1x1x2x384xf32>
    %53 = vector.shape_cast %52 : vector<1x1x2x384xf32> to vector<2x384xf32>
    %54 = vector.shape_cast %51 : vector<2x384xf32> to vector<1x1x2x384xf32>
    tpu.vector_store %arg9[%c0_52, %c6_53, %c0_54, %c0_55], %54 {strides = array<i32>} : memref<2x8x2x384xf32, #tpu.memory_space<vmem>>, vector<1x1x2x384xf32>,
    %c7 = arith.constant 7 : index
    %c0_56 = arith.constant 0 : index
    %c0_57 = arith.constant 0 : index
    %55 = vector.load %arg1[%c7, %c0_56, %c0_57] : memref<8x2x16xf32, #tpu.memory_space<vmem>>, vector<1x2x16xf32>
    %56 = vector.shape_cast %55 : vector<1x2x16xf32> to vector<2x16xf32>
    %cst_58 = arith.constant dense<0.000000e+00> : vector<2x384xf32>
    %57 = tpu.matmul %56, %1, %cst_58 {dimension_numbers = #tpu.dot_dimension_numbers<[1], [0], [0], [1], [0, 0, 1, 1], [], []>} : vector<2x16xf32>, vector<16x384xf32>, vector<2x384xf32> -> vector<2x384xf32>
    %58 = arith.addf %57, %5 : vector<2x384xf32>
    %c0_59 = arith.constant 0 : index
    %c7_60 = arith.constant 7 : index
    %c0_61 = arith.constant 0 : index
    %c0_62 = arith.constant 0 : index
    %59 = vector.load %arg9[%c0_59, %c7_60, %c0_61, %c0_62] : memref<2x8x2x384xf32, #tpu.memory_space<vmem>>, vector<1x1x2x384xf32>
    %60 = vector.shape_cast %59 : vector<1x1x2x384xf32> to vector<2x384xf32>
    %61 = vector.shape_cast %58 : vector<2x384xf32> to vector<1x1x2x384xf32>
    tpu.vector_store %arg9[%c0_59, %c7_60, %c0_61, %c0_62], %61 {strides = array<i32>} : memref<2x8x2x384xf32, #tpu.memory_space<vmem>>, vector<1x1x2x384xf32>,
    %c0_63 = arith.constant 0 : index
    %c1_64 = arith.constant 1 : index
    %c0_65 = arith.constant 0 : index
    %c0_66 = arith.constant 0 : index
    %62 = vector.load %arg3[%c0_63, %c1_64, %c0_65, %c0_66] : memref<1x2x16x384xf32, #tpu.memory_space<vmem>>, vector<1x1x16x384xf32>
    %63 = vector.shape_cast %62 : vector<1x1x16x384xf32> to vector<16x384xf32>
    %c0_67 = arith.constant 0 : index
    %c1_68 = arith.constant 1 : index
    %c0_69 = arith.constant 0 : index
    %c0_70 = arith.constant 0 : index
    %64 = vector.load %arg5[%c0_67, %c1_68, %c0_69, %c0_70] : memref<1x2x1x384xf32, #tpu.memory_space<vmem>>, vector<1x1x1x384xf32>
    %65 = vector.shape_cast %64 : vector<1x1x1x384xf32> to vector<1x384xf32>
    %66 = vector.shape_cast %65 : vector<1x384xf32> to vector<1x384xf32>
    %67 = vector.broadcast %66 : vector<1x384xf32> to vector<2x384xf32>
    %c0_71 = arith.constant 0 : index
    %c0_72 = arith.constant 0 : index
    %c0_73 = arith.constant 0 : index
    %68 = vector.load %arg1[%c0_71, %c0_72, %c0_73] : memref<8x2x16xf32, #tpu.memory_space<vmem>>, vector<1x2x16xf32>
    %69 = vector.shape_cast %68 : vector<1x2x16xf32> to vector<2x16xf32>
    %cst_74 = arith.constant dense<0.000000e+00> : vector<2x384xf32>
    %70 = tpu.matmul %69, %63, %cst_74 {dimension_numbers = #tpu.dot_dimension_numbers<[1], [0], [0], [1], [0, 0, 1, 1], [], []>} : vector<2x16xf32>, vector<16x384xf32>, vector<2x384xf32> -> vector<2x384xf32>
    %71 = arith.addf %70, %67 : vector<2x384xf32>
    %c1_75 = arith.constant 1 : index
    %c0_76 = arith.constant 0 : index
    %c0_77 = arith.constant 0 : index
    %c0_78 = arith.constant 0 : index
    %72 = vector.load %arg9[%c1_75, %c0_76, %c0_77, %c0_78] : memref<2x8x2x384xf32, #tpu.memory_space<vmem>>, vector<1x1x2x384xf32>
    %73 = vector.shape_cast %72 : vector<1x1x2x384xf32> to vector<2x384xf32>
    %74 = vector.shape_cast %71 : vector<2x384xf32> to vector<1x1x2x384xf32>
    tpu.vector_store %arg9[%c1_75, %c0_76, %c0_77, %c0_78], %74 {strides = array<i32>} : memref<2x8x2x384xf32, #tpu.memory_space<vmem>>, vector<1x1x2x384xf32>,
    %c1_79 = arith.constant 1 : index
    %c0_80 = arith.constant 0 : index
    %c0_81 = arith.constant 0 : index
    %75 = vector.load %arg1[%c1_79, %c0_80, %c0_81] : memref<8x2x16xf32, #tpu.memory_space<vmem>>, vector<1x2x16xf32>
    %76 = vector.shape_cast %75 : vector<1x2x16xf32> to vector<2x16xf32>
    %cst_82 = arith.constant dense<0.000000e+00> : vector<2x384xf32>
    %77 = tpu.matmul %76, %63, %cst_82 {dimension_numbers = #tpu.dot_dimension_numbers<[1], [0], [0], [1], [0, 0, 1, 1], [], []>} : vector<2x16xf32>, vector<16x384xf32>, vector<2x384xf32> -> vector<2x384xf32>
    %78 = arith.addf %77, %67 : vector<2x384xf32>
    %c1_83 = arith.constant 1 : index
    %c1_84 = arith.constant 1 : index
    %c0_85 = arith.constant 0 : index
    %c0_86 = arith.constant 0 : index
    %79 = vector.load %arg9[%c1_83, %c1_84, %c0_85, %c0_86] : memref<2x8x2x384xf32, #tpu.memory_space<vmem>>, vector<1x1x2x384xf32>
    %80 = vector.shape_cast %79 : vector<1x1x2x384xf32> to vector<2x384xf32>
    %81 = vector.shape_cast %78 : vector<2x384xf32> to vector<1x1x2x384xf32>
    tpu.vector_store %arg9[%c1_83, %c1_84, %c0_85, %c0_86], %81 {strides = array<i32>} : memref<2x8x2x384xf32, #tpu.memory_space<vmem>>, vector<1x1x2x384xf32>,
    %c2_87 = arith.constant 2 : index
    %c0_88 = arith.constant 0 : index
    %c0_89 = arith.constant 0 : index
    %82 = vector.load %arg1[%c2_87, %c0_88, %c0_89] : memref<8x2x16xf32, #tpu.memory_space<vmem>>, vector<1x2x16xf32>
    %83 = vector.shape_cast %82 : vector<1x2x16xf32> to vector<2x16xf32>
    %cst_90 = arith.constant dense<0.000000e+00> : vector<2x384xf32>
    %84 = tpu.matmul %83, %63, %cst_90 {dimension_numbers = #tpu.dot_dimension_numbers<[1], [0], [0], [1], [0, 0, 1, 1], [], []>} : vector<2x16xf32>, vector<16x384xf32>, vector<2x384xf32> -> vector<2x384xf32>
    %85 = arith.addf %84, %67 : vector<2x384xf32>
    %c1_91 = arith.constant 1 : index
    %c2_92 = arith.constant 2 : index
    %c0_93 = arith.constant 0 : index
    %c0_94 = arith.constant 0 : index
    %86 = vector.load %arg9[%c1_91, %c2_92, %c0_93, %c0_94] : memref<2x8x2x384xf32, #tpu.memory_space<vmem>>, vector<1x1x2x384xf32>
    %87 = vector.shape_cast %86 : vector<1x1x2x384xf32> to vector<2x384xf32>
    %88 = vector.shape_cast %85 : vector<2x384xf32> to vector<1x1x2x384xf32>
    tpu.vector_store %arg9[%c1_91, %c2_92, %c0_93, %c0_94], %88 {strides = array<i32>} : memref<2x8x2x384xf32, #tpu.memory_space<vmem>>, vector<1x1x2x384xf32>,
    %c3_95 = arith.constant 3 : index
    %c0_96 = arith.constant 0 : index
    %c0_97 = arith.constant 0 : index
    %89 = vector.load %arg1[%c3_95, %c0_96, %c0_97] : memref<8x2x16xf32, #tpu.memory_space<vmem>>, vector<1x2x16xf32>
    %90 = vector.shape_cast %89 : vector<1x2x16xf32> to vector<2x16xf32>
    %cst_98 = arith.constant dense<0.000000e+00> : vector<2x384xf32>
    %91 = tpu.matmul %90, %63, %cst_98 {dimension_numbers = #tpu.dot_dimension_numbers<[1], [0], [0], [1], [0, 0, 1, 1], [], []>} : vector<2x16xf32>, vector<16x384xf32>, vector<2x384xf32> -> vector<2x384xf32>
    %92 = arith.addf %91, %67 : vector<2x384xf32>
    %c1_99 = arith.constant 1 : index
    %c3_100 = arith.constant 3 : index
    %c0_101 = arith.constant 0 : index
    %c0_102 = arith.constant 0 : index
    %93 = vector.load %arg9[%c1_99, %c3_100, %c0_101, %c0_102] : memref<2x8x2x384xf32, #tpu.memory_space<vmem>>, vector<1x1x2x384xf32>
    %94 = vector.shape_cast %93 : vector<1x1x2x384xf32> to vector<2x384xf32>
    %95 = vector.shape_cast %92 : vector<2x384xf32> to vector<1x1x2x384xf32>
    tpu.vector_store %arg9[%c1_99, %c3_100, %c0_101, %c0_102], %95 {strides = array<i32>} : memref<2x8x2x384xf32, #tpu.memory_space<vmem>>, vector<1x1x2x384xf32>,
    %c4_103 = arith.constant 4 : index
    %c0_104 = arith.constant 0 : index
    %c0_105 = arith.constant 0 : index
    %96 = vector.load %arg1[%c4_103, %c0_104, %c0_105] : memref<8x2x16xf32, #tpu.memory_space<vmem>>, vector<1x2x16xf32>
    %97 = vector.shape_cast %96 : vector<1x2x16xf32> to vector<2x16xf32>
    %cst_106 = arith.constant dense<0.000000e+00> : vector<2x384xf32>
    %98 = tpu.matmul %97, %63, %cst_106 {dimension_numbers = #tpu.dot_dimension_numbers<[1], [0], [0], [1], [0, 0, 1, 1], [], []>} : vector<2x16xf32>, vector<16x384xf32>, vector<2x384xf32> -> vector<2x384xf32>
    %99 = arith.addf %98, %67 : vector<2x384xf32>
    %c1_107 = arith.constant 1 : index
    %c4_108 = arith.constant 4 : index
    %c0_109 = arith.constant 0 : index
    %c0_110 = arith.constant 0 : index
    %100 = vector.load %arg9[%c1_107, %c4_108, %c0_109, %c0_110] : memref<2x8x2x384xf32, #tpu.memory_space<vmem>>, vector<1x1x2x384xf32>
    %101 = vector.shape_cast %100 : vector<1x1x2x384xf32> to vector<2x384xf32>
    %102 = vector.shape_cast %99 : vector<2x384xf32> to vector<1x1x2x384xf32>
    tpu.vector_store %arg9[%c1_107, %c4_108, %c0_109, %c0_110], %102 {strides = array<i32>} : memref<2x8x2x384xf32, #tpu.memory_space<vmem>>, vector<1x1x2x384xf32>,
    %c5_111 = arith.constant 5 : index
    %c0_112 = arith.constant 0 : index
    %c0_113 = arith.constant 0 : index
    %103 = vector.load %arg1[%c5_111, %c0_112, %c0_113] : memref<8x2x16xf32, #tpu.memory_space<vmem>>, vector<1x2x16xf32>
    %104 = vector.shape_cast %103 : vector<1x2x16xf32> to vector<2x16xf32>
    %cst_114 = arith.constant dense<0.000000e+00> : vector<2x384xf32>
    %105 = tpu.matmul %104, %63, %cst_114 {dimension_numbers = #tpu.dot_dimension_numbers<[1], [0], [0], [1], [0, 0, 1, 1], [], []>} : vector<2x16xf32>, vector<16x384xf32>, vector<2x384xf32> -> vector<2x384xf32>
    %106 = arith.addf %105, %67 : vector<2x384xf32>
    %c1_115 = arith.constant 1 : index
    %c5_116 = arith.constant 5 : index
    %c0_117 = arith.constant 0 : index
    %c0_118 = arith.constant 0 : index
    %107 = vector.load %arg9[%c1_115, %c5_116, %c0_117, %c0_118] : memref<2x8x2x384xf32, #tpu.memory_space<vmem>>, vector<1x1x2x384xf32>
    %108 = vector.shape_cast %107 : vector<1x1x2x384xf32> to vector<2x384xf32>
    %109 = vector.shape_cast %106 : vector<2x384xf32> to vector<1x1x2x384xf32>
    tpu.vector_store %arg9[%c1_115, %c5_116, %c0_117, %c0_118], %109 {strides = array<i32>} : memref<2x8x2x384xf32, #tpu.memory_space<vmem>>, vector<1x1x2x384xf32>,
    %c6_119 = arith.constant 6 : index
    %c0_120 = arith.constant 0 : index
    %c0_121 = arith.constant 0 : index
    %110 = vector.load %arg1[%c6_119, %c0_120, %c0_121] : memref<8x2x16xf32, #tpu.memory_space<vmem>>, vector<1x2x16xf32>
    %111 = vector.shape_cast %110 : vector<1x2x16xf32> to vector<2x16xf32>
    %cst_122 = arith.constant dense<0.000000e+00> : vector<2x384xf32>
    %112 = tpu.matmul %111, %63, %cst_122 {dimension_numbers = #tpu.dot_dimension_numbers<[1], [0], [0], [1], [0, 0, 1, 1], [], []>} : vector<2x16xf32>, vector<16x384xf32>, vector<2x384xf32> -> vector<2x384xf32>
    %113 = arith.addf %112, %67 : vector<2x384xf32>
    %c1_123 = arith.constant 1 : index
    %c6_124 = arith.constant 6 : index
    %c0_125 = arith.constant 0 : index
    %c0_126 = arith.constant 0 : index
    %114 = vector.load %arg9[%c1_123, %c6_124, %c0_125, %c0_126] : memref<2x8x2x384xf32, #tpu.memory_space<vmem>>, vector<1x1x2x384xf32>
    %115 = vector.shape_cast %114 : vector<1x1x2x384xf32> to vector<2x384xf32>
    %116 = vector.shape_cast %113 : vector<2x384xf32> to vector<1x1x2x384xf32>
    tpu.vector_store %arg9[%c1_123, %c6_124, %c0_125, %c0_126], %116 {strides = array<i32>} : memref<2x8x2x384xf32, #tpu.memory_space<vmem>>, vector<1x1x2x384xf32>,
    %c7_127 = arith.constant 7 : index
    %c0_128 = arith.constant 0 : index
    %c0_129 = arith.constant 0 : index
    %117 = vector.load %arg1[%c7_127, %c0_128, %c0_129] : memref<8x2x16xf32, #tpu.memory_space<vmem>>, vector<1x2x16xf32>
    %118 = vector.shape_cast %117 : vector<1x2x16xf32> to vector<2x16xf32>
    %cst_130 = arith.constant dense<0.000000e+00> : vector<2x384xf32>
    %119 = tpu.matmul %118, %63, %cst_130 {dimension_numbers = #tpu.dot_dimension_numbers<[1], [0], [0], [1], [0, 0, 1, 1], [], []>} : vector<2x16xf32>, vector<16x384xf32>, vector<2x384xf32> -> vector<2x384xf32>
    %120 = arith.addf %119, %67 : vector<2x384xf32>
    %c1_131 = arith.constant 1 : index
    %c7_132 = arith.constant 7 : index
    %c0_133 = arith.constant 0 : index
    %c0_134 = arith.constant 0 : index
    %121 = vector.load %arg9[%c1_131, %c7_132, %c0_133, %c0_134] : memref<2x8x2x384xf32, #tpu.memory_space<vmem>>, vector<1x1x2x384xf32>
    %122 = vector.shape_cast %121 : vector<1x1x2x384xf32> to vector<2x384xf32>
    %123 = vector.shape_cast %120 : vector<2x384xf32> to vector<1x1x2x384xf32>
    tpu.vector_store %arg9[%c1_131, %c7_132, %c0_133, %c0_134], %123 {strides = array<i32>} : memref<2x8x2x384xf32, #tpu.memory_space<vmem>>, vector<1x1x2x384xf32>,
    %c0_135 = arith.constant 0 : index
    %c0_136 = arith.constant 0 : index
    %c0_137 = arith.constant 0 : index
    %c0_138 = arith.constant 0 : index
    %124 = vector.load %arg4[%c0_135, %c0_136, %c0_137, %c0_138] : memref<1x2x128x384xf32, #tpu.memory_space<vmem>>, vector<1x1x128x384xf32>
    %125 = vector.shape_cast %124 : vector<1x1x128x384xf32> to vector<128x384xf32>
    %c0_139 = arith.constant 0 : index
    %c1_140 = arith.constant 1 : index
    %c0_141 = arith.constant 0 : index
    %c0_142 = arith.constant 0 : index
    %126 = vector.load %arg4[%c0_139, %c1_140, %c0_141, %c0_142] : memref<1x2x128x384xf32, #tpu.memory_space<vmem>>, vector<1x1x128x384xf32>
    %127 = vector.shape_cast %126 : vector<1x1x128x384xf32> to vector<128x384xf32>
    %c0_143 = arith.constant 0 : index
    %c0_144 = arith.constant 0 : index
    %c0_145 = arith.constant 0 : index
    %c0_146 = arith.constant 0 : index
    %128 = vector.load %arg6[%c0_143, %c0_144, %c0_145, %c0_146] : memref<1x2x1x128xf32, #tpu.memory_space<vmem>>, vector<1x1x1x128xf32>
    %129 = vector.shape_cast %128 : vector<1x1x1x128xf32> to vector<1x128xf32>
    %130 = vector.shape_cast %129 : vector<1x128xf32> to vector<1x128xf32>
    %131 = vector.broadcast %130 : vector<1x128xf32> to vector<2x128xf32>
    %c0_147 = arith.constant 0 : index
    %c1_148 = arith.constant 1 : index
    %c0_149 = arith.constant 0 : index
    %c0_150 = arith.constant 0 : index
    %132 = vector.load %arg6[%c0_147, %c1_148, %c0_149, %c0_150] : memref<1x2x1x128xf32, #tpu.memory_space<vmem>>, vector<1x1x1x128xf32>
    %133 = vector.shape_cast %132 : vector<1x1x1x128xf32> to vector<1x128xf32>
    %134 = vector.shape_cast %133 : vector<1x128xf32> to vector<1x128xf32>
    %135 = vector.broadcast %134 : vector<1x128xf32> to vector<2x128xf32>
    %c0_151 = arith.constant 0 : index
    %c0_152 = arith.constant 0 : index
    %c0_153 = arith.constant 0 : index
    %c0_154 = arith.constant 0 : index
    %136 = vector.load %arg2[%c0_151, %c0_152, %c0_153, %c0_154] : memref<1x2x2x128xf32, #tpu.memory_space<vmem>>, vector<1x1x2x128xf32>
    %137 = vector.shape_cast %136 : vector<1x1x2x128xf32> to vector<2x128xf32>
    %c0_155 = arith.constant 0 : index
    %c1_156 = arith.constant 1 : index
    %c0_157 = arith.constant 0 : index
    %c0_158 = arith.constant 0 : index
    %138 = vector.load %arg2[%c0_155, %c1_156, %c0_157, %c0_158] : memref<1x2x2x128xf32, #tpu.memory_space<vmem>>, vector<1x1x2x128xf32>
    %139 = vector.shape_cast %138 : vector<1x1x2x128xf32> to vector<2x128xf32>
    %cst_159 = arith.constant dense<0.000000e+00> : vector<2x384xf32>
    %140 = tpu.matmul %137, %125, %cst_159 {dimension_numbers = #tpu.dot_dimension_numbers<[1], [0], [0], [1], [0, 0, 1, 1], [], []>} : vector<2x128xf32>, vector<128x384xf32>, vector<2x384xf32> -> vector<2x384xf32>
    %cst_160 = arith.constant dense<0.000000e+00> : vector<2x384xf32>
    %141 = tpu.matmul %139, %127, %cst_160 {dimension_numbers = #tpu.dot_dimension_numbers<[1], [0], [0], [1], [0, 0, 1, 1], [], []>} : vector<2x128xf32>, vector<128x384xf32>, vector<2x384xf32> -> vector<2x384xf32>
    %c0_161 = arith.constant 0 : index
    %c0_162 = arith.constant 0 : index
    %c0_163 = arith.constant 0 : index
    %c0_164 = arith.constant 0 : index
    %142 = vector.load %arg9[%c0_161, %c0_162, %c0_163, %c0_164] : memref<2x8x2x384xf32, #tpu.memory_space<vmem>>, vector<1x1x2x384xf32>
    %143 = vector.shape_cast %142 : vector<1x1x2x384xf32> to vector<2x384xf32>
    %c1_165 = arith.constant 1 : index
    %c7_166 = arith.constant 7 : index
    %c0_167 = arith.constant 0 : index
    %c0_168 = arith.constant 0 : index
    %144 = vector.load %arg9[%c1_165, %c7_166, %c0_167, %c0_168] : memref<2x8x2x384xf32, #tpu.memory_space<vmem>>, vector<1x1x2x384xf32>
    %145 = vector.shape_cast %144 : vector<1x1x2x384xf32> to vector<2x384xf32>
    %146 = vector.extract_strided_slice %143 {offsets = [0, 0], sizes = [2, 128], strides = [1, 1]} : vector<2x384xf32> to vector<2x128xf32>
    %147 = vector.extract_strided_slice %140 {offsets = [0, 0], sizes = [2, 128], strides = [1, 1]} : vector<2x384xf32> to vector<2x128xf32>
    %148 = arith.addf %146, %147 : vector<2x128xf32>
    %149 = arith.negf %148 : vector<2x128xf32>
    %150 = math.exp %149 : vector<2x128xf32>
    %cst_169 = arith.constant 1.000000e+00 : f32
    %151 = vector.broadcast %cst_169 : f32 to vector<2x128xf32>
    %152 = arith.addf %151, %150 : vector<2x128xf32>
    %153 = arith.divf %151, %152 : vector<2x128xf32>
    %154 = vector.extract_strided_slice %143 {offsets = [0, 128], sizes = [2, 128], strides = [1, 1]} : vector<2x384xf32> to vector<2x128xf32>
    %155 = vector.extract_strided_slice %140 {offsets = [0, 128], sizes = [2, 128], strides = [1, 1]} : vector<2x384xf32> to vector<2x128xf32>
    %156 = arith.addf %154, %155 : vector<2x128xf32>
    %157 = arith.negf %156 : vector<2x128xf32>
    %158 = math.exp %157 : vector<2x128xf32>
    %cst_170 = arith.constant 1.000000e+00 : f32
    %159 = vector.broadcast %cst_170 : f32 to vector<2x128xf32>
    %160 = arith.addf %159, %158 : vector<2x128xf32>
    %161 = arith.divf %159, %160 : vector<2x128xf32>
    %162 = vector.extract_strided_slice %143 {offsets = [0, 256], sizes = [2, 128], strides = [1, 1]} : vector<2x384xf32> to vector<2x128xf32>
    %163 = vector.extract_strided_slice %140 {offsets = [0, 256], sizes = [2, 128], strides = [1, 1]} : vector<2x384xf32> to vector<2x128xf32>
    %164 = arith.addf %163, %131 : vector<2x128xf32>
    %165 = arith.mulf %153, %164 : vector<2x128xf32>
    %166 = arith.addf %162, %165 : vector<2x128xf32>
    %167 = math.tanh %166 : vector<2x128xf32>
    %168 = arith.subf %137, %167 : vector<2x128xf32>
    %169 = arith.mulf %161, %168 : vector<2x128xf32>
    %170 = arith.addf %167, %169 : vector<2x128xf32>
    %171 = vector.extract_strided_slice %145 {offsets = [0, 0], sizes = [2, 128], strides = [1, 1]} : vector<2x384xf32> to vector<2x128xf32>
    %172 = vector.extract_strided_slice %141 {offsets = [0, 0], sizes = [2, 128], strides = [1, 1]} : vector<2x384xf32> to vector<2x128xf32>
    %173 = arith.addf %171, %172 : vector<2x128xf32>
    %174 = arith.negf %173 : vector<2x128xf32>
    %175 = math.exp %174 : vector<2x128xf32>
    %cst_171 = arith.constant 1.000000e+00 : f32
    %176 = vector.broadcast %cst_171 : f32 to vector<2x128xf32>
    %177 = arith.addf %176, %175 : vector<2x128xf32>
    %178 = arith.divf %176, %177 : vector<2x128xf32>
    %179 = vector.extract_strided_slice %145 {offsets = [0, 128], sizes = [2, 128], strides = [1, 1]} : vector<2x384xf32> to vector<2x128xf32>
    %180 = vector.extract_strided_slice %141 {offsets = [0, 128], sizes = [2, 128], strides = [1, 1]} : vector<2x384xf32> to vector<2x128xf32>
    %181 = arith.addf %179, %180 : vector<2x128xf32>
    %182 = arith.negf %181 : vector<2x128xf32>
    %183 = math.exp %182 : vector<2x128xf32>
    %cst_172 = arith.constant 1.000000e+00 : f32
    %184 = vector.broadcast %cst_172 : f32 to vector<2x128xf32>
    %185 = arith.addf %184, %183 : vector<2x128xf32>
    %186 = arith.divf %184, %185 : vector<2x128xf32>
    %187 = vector.extract_strided_slice %145 {offsets = [0, 256], sizes = [2, 128], strides = [1, 1]} : vector<2x384xf32> to vector<2x128xf32>
    %188 = vector.extract_strided_slice %141 {offsets = [0, 256], sizes = [2, 128], strides = [1, 1]} : vector<2x384xf32> to vector<2x128xf32>
    %189 = arith.addf %188, %135 : vector<2x128xf32>
    %190 = arith.mulf %178, %189 : vector<2x128xf32>
    %191 = arith.addf %187, %190 : vector<2x128xf32>
    %192 = math.tanh %191 : vector<2x128xf32>
    %193 = arith.subf %139, %192 : vector<2x128xf32>
    %194 = arith.mulf %186, %193 : vector<2x128xf32>
    %195 = arith.addf %192, %194 : vector<2x128xf32>
    %c0_173 = arith.constant 0 : index
    %c0_174 = arith.constant 0 : index
    %c0_175 = arith.constant 0 : index
    %c0_176 = arith.constant 0 : index
    %c0_177 = arith.constant 0 : index
    %196 = vector.load %arg7[%c0_173, %c0_174, %c0_175, %c0_176, %c0_177] : memref<1x2x8x2x128xf32, #tpu.memory_space<vmem>>, vector<1x1x1x2x128xf32>
    %197 = vector.shape_cast %196 : vector<1x1x1x2x128xf32> to vector<2x128xf32>
    %198 = vector.shape_cast %170 : vector<2x128xf32> to vector<1x1x1x2x128xf32>
    tpu.vector_store %arg7[%c0_173, %c0_174, %c0_175, %c0_176, %c0_177], %198 {strides = array<i32>} : memref<1x2x8x2x128xf32, #tpu.memory_space<vmem>>, vector<1x1x1x2x128xf32>,
    %c0_178 = arith.constant 0 : index
    %c1_179 = arith.constant 1 : index
    %c7_180 = arith.constant 7 : index
    %c0_181 = arith.constant 0 : index
    %c0_182 = arith.constant 0 : index
    %199 = vector.load %arg7[%c0_178, %c1_179, %c7_180, %c0_181, %c0_182] : memref<1x2x8x2x128xf32, #tpu.memory_space<vmem>>, vector<1x1x1x2x128xf32>
    %200 = vector.shape_cast %199 : vector<1x1x1x2x128xf32> to vector<2x128xf32>
    %201 = vector.shape_cast %195 : vector<2x128xf32> to vector<1x1x1x2x128xf32>
    tpu.vector_store %arg7[%c0_178, %c1_179, %c7_180, %c0_181, %c0_182], %201 {strides = array<i32>} : memref<1x2x8x2x128xf32, #tpu.memory_space<vmem>>, vector<1x1x1x2x128xf32>,
    %cst_183 = arith.constant dense<0.000000e+00> : vector<2x384xf32>
    %202 = tpu.matmul %170, %125, %cst_183 {dimension_numbers = #tpu.dot_dimension_numbers<[1], [0], [0], [1], [0, 0, 1, 1], [], []>} : vector<2x128xf32>, vector<128x384xf32>, vector<2x384xf32> -> vector<2x384xf32>
    %cst_184 = arith.constant dense<0.000000e+00> : vector<2x384xf32>
    %203 = tpu.matmul %195, %127, %cst_184 {dimension_numbers = #tpu.dot_dimension_numbers<[1], [0], [0], [1], [0, 0, 1, 1], [], []>} : vector<2x128xf32>, vector<128x384xf32>, vector<2x384xf32> -> vector<2x384xf32>
    %c0_185 = arith.constant 0 : index
    %c1_186 = arith.constant 1 : index
    %c0_187 = arith.constant 0 : index
    %c0_188 = arith.constant 0 : index
    %204 = vector.load %arg9[%c0_185, %c1_186, %c0_187, %c0_188] : memref<2x8x2x384xf32, #tpu.memory_space<vmem>>, vector<1x1x2x384xf32>
    %205 = vector.shape_cast %204 : vector<1x1x2x384xf32> to vector<2x384xf32>
    %c1_189 = arith.constant 1 : index
    %c6_190 = arith.constant 6 : index
    %c0_191 = arith.constant 0 : index
    %c0_192 = arith.constant 0 : index
    %206 = vector.load %arg9[%c1_189, %c6_190, %c0_191, %c0_192] : memref<2x8x2x384xf32, #tpu.memory_space<vmem>>, vector<1x1x2x384xf32>
    %207 = vector.shape_cast %206 : vector<1x1x2x384xf32> to vector<2x384xf32>
    %208 = vector.extract_strided_slice %205 {offsets = [0, 0], sizes = [2, 128], strides = [1, 1]} : vector<2x384xf32> to vector<2x128xf32>
    %209 = vector.extract_strided_slice %202 {offsets = [0, 0], sizes = [2, 128], strides = [1, 1]} : vector<2x384xf32> to vector<2x128xf32>
    %210 = arith.addf %208, %209 : vector<2x128xf32>
    %211 = arith.negf %210 : vector<2x128xf32>
    %212 = math.exp %211 : vector<2x128xf32>
    %cst_193 = arith.constant 1.000000e+00 : f32
    %213 = vector.broadcast %cst_193 : f32 to vector<2x128xf32>
    %214 = arith.addf %213, %212 : vector<2x128xf32>
    %215 = arith.divf %213, %214 : vector<2x128xf32>
    %216 = vector.extract_strided_slice %205 {offsets = [0, 128], sizes = [2, 128], strides = [1, 1]} : vector<2x384xf32> to vector<2x128xf32>
    %217 = vector.extract_strided_slice %202 {offsets = [0, 128], sizes = [2, 128], strides = [1, 1]} : vector<2x384xf32> to vector<2x128xf32>
    %218 = arith.addf %216, %217 : vector<2x128xf32>
    %219 = arith.negf %218 : vector<2x128xf32>
    %220 = math.exp %219 : vector<2x128xf32>
    %cst_194 = arith.constant 1.000000e+00 : f32
    %221 = vector.broadcast %cst_194 : f32 to vector<2x128xf32>
    %222 = arith.addf %221, %220 : vector<2x128xf32>
    %223 = arith.divf %221, %222 : vector<2x128xf32>
    %224 = vector.extract_strided_slice %205 {offsets = [0, 256], sizes = [2, 128], strides = [1, 1]} : vector<2x384xf32> to vector<2x128xf32>
    %225 = vector.extract_strided_slice %202 {offsets = [0, 256], sizes = [2, 128], strides = [1, 1]} : vector<2x384xf32> to vector<2x128xf32>
    %226 = arith.addf %225, %131 : vector<2x128xf32>
    %227 = arith.mulf %215, %226 : vector<2x128xf32>
    %228 = arith.addf %224, %227 : vector<2x128xf32>
    %229 = math.tanh %228 : vector<2x128xf32>
    %230 = arith.subf %170, %229 : vector<2x128xf32>
    %231 = arith.mulf %223, %230 : vector<2x128xf32>
    %232 = arith.addf %229, %231 : vector<2x128xf32>
    %233 = vector.extract_strided_slice %207 {offsets = [0, 0], sizes = [2, 128], strides = [1, 1]} : vector<2x384xf32> to vector<2x128xf32>
    %234 = vector.extract_strided_slice %203 {offsets = [0, 0], sizes = [2, 128], strides = [1, 1]} : vector<2x384xf32> to vector<2x128xf32>
    %235 = arith.addf %233, %234 : vector<2x128xf32>
    %236 = arith.negf %235 : vector<2x128xf32>
    %237 = math.exp %236 : vector<2x128xf32>
    %cst_195 = arith.constant 1.000000e+00 : f32
    %238 = vector.broadcast %cst_195 : f32 to vector<2x128xf32>
    %239 = arith.addf %238, %237 : vector<2x128xf32>
    %240 = arith.divf %238, %239 : vector<2x128xf32>
    %241 = vector.extract_strided_slice %207 {offsets = [0, 128], sizes = [2, 128], strides = [1, 1]} : vector<2x384xf32> to vector<2x128xf32>
    %242 = vector.extract_strided_slice %203 {offsets = [0, 128], sizes = [2, 128], strides = [1, 1]} : vector<2x384xf32> to vector<2x128xf32>
    %243 = arith.addf %241, %242 : vector<2x128xf32>
    %244 = arith.negf %243 : vector<2x128xf32>
    %245 = math.exp %244 : vector<2x128xf32>
    %cst_196 = arith.constant 1.000000e+00 : f32
    %246 = vector.broadcast %cst_196 : f32 to vector<2x128xf32>
    %247 = arith.addf %246, %245 : vector<2x128xf32>
    %248 = arith.divf %246, %247 : vector<2x128xf32>
    %249 = vector.extract_strided_slice %207 {offsets = [0, 256], sizes = [2, 128], strides = [1, 1]} : vector<2x384xf32> to vector<2x128xf32>
    %250 = vector.extract_strided_slice %203 {offsets = [0, 256], sizes = [2, 128], strides = [1, 1]} : vector<2x384xf32> to vector<2x128xf32>
    %251 = arith.addf %250, %135 : vector<2x128xf32>
    %252 = arith.mulf %240, %251 : vector<2x128xf32>
    %253 = arith.addf %249, %252 : vector<2x128xf32>
    %254 = math.tanh %253 : vector<2x128xf32>
    %255 = arith.subf %195, %254 : vector<2x128xf32>
    %256 = arith.mulf %248, %255 : vector<2x128xf32>
    %257 = arith.addf %254, %256 : vector<2x128xf32>
    %c0_197 = arith.constant 0 : index
    %c0_198 = arith.constant 0 : index
    %c1_199 = arith.constant 1 : index
    %c0_200 = arith.constant 0 : index
    %c0_201 = arith.constant 0 : index
    %258 = vector.load %arg7[%c0_197, %c0_198, %c1_199, %c0_200, %c0_201] : memref<1x2x8x2x128xf32, #tpu.memory_space<vmem>>, vector<1x1x1x2x128xf32>
    %259 = vector.shape_cast %258 : vector<1x1x1x2x128xf32> to vector<2x128xf32>
    %260 = vector.shape_cast %232 : vector<2x128xf32> to vector<1x1x1x2x128xf32>
    tpu.vector_store %arg7[%c0_197, %c0_198, %c1_199, %c0_200, %c0_201], %260 {strides = array<i32>} : memref<1x2x8x2x128xf32, #tpu.memory_space<vmem>>, vector<1x1x1x2x128xf32>,
    %c0_202 = arith.constant 0 : index
    %c1_203 = arith.constant 1 : index
    %c6_204 = arith.constant 6 : index
    %c0_205 = arith.constant 0 : index
    %c0_206 = arith.constant 0 : index
    %261 = vector.load %arg7[%c0_202, %c1_203, %c6_204, %c0_205, %c0_206] : memref<1x2x8x2x128xf32, #tpu.memory_space<vmem>>, vector<1x1x1x2x128xf32>
    %262 = vector.shape_cast %261 : vector<1x1x1x2x128xf32> to vector<2x128xf32>
    %263 = vector.shape_cast %257 : vector<2x128xf32> to vector<1x1x1x2x128xf32>
    tpu.vector_store %arg7[%c0_202, %c1_203, %c6_204, %c0_205, %c0_206], %263 {strides = array<i32>} : memref<1x2x8x2x128xf32, #tpu.memory_space<vmem>>, vector<1x1x1x2x128xf32>,
    %cst_207 = arith.constant dense<0.000000e+00> : vector<2x384xf32>
    %264 = tpu.matmul %232, %125, %cst_207 {dimension_numbers = #tpu.dot_dimension_numbers<[1], [0], [0], [1], [0, 0, 1, 1], [], []>} : vector<2x128xf32>, vector<128x384xf32>, vector<2x384xf32> -> vector<2x384xf32>
    %cst_208 = arith.constant dense<0.000000e+00> : vector<2x384xf32>
    %265 = tpu.matmul %257, %127, %cst_208 {dimension_numbers = #tpu.dot_dimension_numbers<[1], [0], [0], [1], [0, 0, 1, 1], [], []>} : vector<2x128xf32>, vector<128x384xf32>, vector<2x384xf32> -> vector<2x384xf32>
    %c0_209 = arith.constant 0 : index
    %c2_210 = arith.constant 2 : index
    %c0_211 = arith.constant 0 : index
    %c0_212 = arith.constant 0 : index
    %266 = vector.load %arg9[%c0_209, %c2_210, %c0_211, %c0_212] : memref<2x8x2x384xf32, #tpu.memory_space<vmem>>, vector<1x1x2x384xf32>
    %267 = vector.shape_cast %266 : vector<1x1x2x384xf32> to vector<2x384xf32>
    %c1_213 = arith.constant 1 : index
    %c5_214 = arith.constant 5 : index
    %c0_215 = arith.constant 0 : index
    %c0_216 = arith.constant 0 : index
    %268 = vector.load %arg9[%c1_213, %c5_214, %c0_215, %c0_216] : memref<2x8x2x384xf32, #tpu.memory_space<vmem>>, vector<1x1x2x384xf32>
    %269 = vector.shape_cast %268 : vector<1x1x2x384xf32> to vector<2x384xf32>
    %270 = vector.extract_strided_slice %267 {offsets = [0, 0], sizes = [2, 128], strides = [1, 1]} : vector<2x384xf32> to vector<2x128xf32>
    %271 = vector.extract_strided_slice %264 {offsets = [0, 0], sizes = [2, 128], strides = [1, 1]} : vector<2x384xf32> to vector<2x128xf32>
    %272 = arith.addf %270, %271 : vector<2x128xf32>
    %273 = arith.negf %272 : vector<2x128xf32>
    %274 = math.exp %273 : vector<2x128xf32>
    %cst_217 = arith.constant 1.000000e+00 : f32
    %275 = vector.broadcast %cst_217 : f32 to vector<2x128xf32>
    %276 = arith.addf %275, %274 : vector<2x128xf32>
    %277 = arith.divf %275, %276 : vector<2x128xf32>
    %278 = vector.extract_strided_slice %267 {offsets = [0, 128], sizes = [2, 128], strides = [1, 1]} : vector<2x384xf32> to vector<2x128xf32>
    %279 = vector.extract_strided_slice %264 {offsets = [0, 128], sizes = [2, 128], strides = [1, 1]} : vector<2x384xf32> to vector<2x128xf32>
    %280 = arith.addf %278, %279 : vector<2x128xf32>
    %281 = arith.negf %280 : vector<2x128xf32>
    %282 = math.exp %281 : vector<2x128xf32>
    %cst_218 = arith.constant 1.000000e+00 : f32
    %283 = vector.broadcast %cst_218 : f32 to vector<2x128xf32>
    %284 = arith.addf %283, %282 : vector<2x128xf32>
    %285 = arith.divf %283, %284 : vector<2x128xf32>
    %286 = vector.extract_strided_slice %267 {offsets = [0, 256], sizes = [2, 128], strides = [1, 1]} : vector<2x384xf32> to vector<2x128xf32>
    %287 = vector.extract_strided_slice %264 {offsets = [0, 256], sizes = [2, 128], strides = [1, 1]} : vector<2x384xf32> to vector<2x128xf32>
    %288 = arith.addf %287, %131 : vector<2x128xf32>
    %289 = arith.mulf %277, %288 : vector<2x128xf32>
    %290 = arith.addf %286, %289 : vector<2x128xf32>
    %291 = math.tanh %290 : vector<2x128xf32>
    %292 = arith.subf %232, %291 : vector<2x128xf32>
    %293 = arith.mulf %285, %292 : vector<2x128xf32>
    %294 = arith.addf %291, %293 : vector<2x128xf32>
    %295 = vector.extract_strided_slice %269 {offsets = [0, 0], sizes = [2, 128], strides = [1, 1]} : vector<2x384xf32> to vector<2x128xf32>
    %296 = vector.extract_strided_slice %265 {offsets = [0, 0], sizes = [2, 128], strides = [1, 1]} : vector<2x384xf32> to vector<2x128xf32>
    %297 = arith.addf %295, %296 : vector<2x128xf32>
    %298 = arith.negf %297 : vector<2x128xf32>
    %299 = math.exp %298 : vector<2x128xf32>
    %cst_219 = arith.constant 1.000000e+00 : f32
    %300 = vector.broadcast %cst_219 : f32 to vector<2x128xf32>
    %301 = arith.addf %300, %299 : vector<2x128xf32>
    %302 = arith.divf %300, %301 : vector<2x128xf32>
    %303 = vector.extract_strided_slice %269 {offsets = [0, 128], sizes = [2, 128], strides = [1, 1]} : vector<2x384xf32> to vector<2x128xf32>
    %304 = vector.extract_strided_slice %265 {offsets = [0, 128], sizes = [2, 128], strides = [1, 1]} : vector<2x384xf32> to vector<2x128xf32>
    %305 = arith.addf %303, %304 : vector<2x128xf32>
    %306 = arith.negf %305 : vector<2x128xf32>
    %307 = math.exp %306 : vector<2x128xf32>
    %cst_220 = arith.constant 1.000000e+00 : f32
    %308 = vector.broadcast %cst_220 : f32 to vector<2x128xf32>
    %309 = arith.addf %308, %307 : vector<2x128xf32>
    %310 = arith.divf %308, %309 : vector<2x128xf32>
    %311 = vector.extract_strided_slice %269 {offsets = [0, 256], sizes = [2, 128], strides = [1, 1]} : vector<2x384xf32> to vector<2x128xf32>
    %312 = vector.extract_strided_slice %265 {offsets = [0, 256], sizes = [2, 128], strides = [1, 1]} : vector<2x384xf32> to vector<2x128xf32>
    %313 = arith.addf %312, %135 : vector<2x128xf32>
    %314 = arith.mulf %302, %313 : vector<2x128xf32>
    %315 = arith.addf %311, %314 : vector<2x128xf32>
    %316 = math.tanh %315 : vector<2x128xf32>
    %317 = arith.subf %257, %316 : vector<2x128xf32>
    %318 = arith.mulf %310, %317 : vector<2x128xf32>
    %319 = arith.addf %316, %318 : vector<2x128xf32>
    %c0_221 = arith.constant 0 : index
    %c0_222 = arith.constant 0 : index
    %c2_223 = arith.constant 2 : index
    %c0_224 = arith.constant 0 : index
    %c0_225 = arith.constant 0 : index
    %320 = vector.load %arg7[%c0_221, %c0_222, %c2_223, %c0_224, %c0_225] : memref<1x2x8x2x128xf32, #tpu.memory_space<vmem>>, vector<1x1x1x2x128xf32>
    %321 = vector.shape_cast %320 : vector<1x1x1x2x128xf32> to vector<2x128xf32>
    %322 = vector.shape_cast %294 : vector<2x128xf32> to vector<1x1x1x2x128xf32>
    tpu.vector_store %arg7[%c0_221, %c0_222, %c2_223, %c0_224, %c0_225], %322 {strides = array<i32>} : memref<1x2x8x2x128xf32, #tpu.memory_space<vmem>>, vector<1x1x1x2x128xf32>,
    %c0_226 = arith.constant 0 : index
    %c1_227 = arith.constant 1 : index
    %c5_228 = arith.constant 5 : index
    %c0_229 = arith.constant 0 : index
    %c0_230 = arith.constant 0 : index
    %323 = vector.load %arg7[%c0_226, %c1_227, %c5_228, %c0_229, %c0_230] : memref<1x2x8x2x128xf32, #tpu.memory_space<vmem>>, vector<1x1x1x2x128xf32>
    %324 = vector.shape_cast %323 : vector<1x1x1x2x128xf32> to vector<2x128xf32>
    %325 = vector.shape_cast %319 : vector<2x128xf32> to vector<1x1x1x2x128xf32>
    tpu.vector_store %arg7[%c0_226, %c1_227, %c5_228, %c0_229, %c0_230], %325 {strides = array<i32>} : memref<1x2x8x2x128xf32, #tpu.memory_space<vmem>>, vector<1x1x1x2x128xf32>,
    %cst_231 = arith.constant dense<0.000000e+00> : vector<2x384xf32>
    %326 = tpu.matmul %294, %125, %cst_231 {dimension_numbers = #tpu.dot_dimension_numbers<[1], [0], [0], [1], [0, 0, 1, 1], [], []>} : vector<2x128xf32>, vector<128x384xf32>, vector<2x384xf32> -> vector<2x384xf32>
    %cst_232 = arith.constant dense<0.000000e+00> : vector<2x384xf32>
    %327 = tpu.matmul %319, %127, %cst_232 {dimension_numbers = #tpu.dot_dimension_numbers<[1], [0], [0], [1], [0, 0, 1, 1], [], []>} : vector<2x128xf32>, vector<128x384xf32>, vector<2x384xf32> -> vector<2x384xf32>
    %c0_233 = arith.constant 0 : index
    %c3_234 = arith.constant 3 : index
    %c0_235 = arith.constant 0 : index
    %c0_236 = arith.constant 0 : index
    %328 = vector.load %arg9[%c0_233, %c3_234, %c0_235, %c0_236] : memref<2x8x2x384xf32, #tpu.memory_space<vmem>>, vector<1x1x2x384xf32>
    %329 = vector.shape_cast %328 : vector<1x1x2x384xf32> to vector<2x384xf32>
    %c1_237 = arith.constant 1 : index
    %c4_238 = arith.constant 4 : index
    %c0_239 = arith.constant 0 : index
    %c0_240 = arith.constant 0 : index
    %330 = vector.load %arg9[%c1_237, %c4_238, %c0_239, %c0_240] : memref<2x8x2x384xf32, #tpu.memory_space<vmem>>, vector<1x1x2x384xf32>
    %331 = vector.shape_cast %330 : vector<1x1x2x384xf32> to vector<2x384xf32>
    %332 = vector.extract_strided_slice %329 {offsets = [0, 0], sizes = [2, 128], strides = [1, 1]} : vector<2x384xf32> to vector<2x128xf32>
    %333 = vector.extract_strided_slice %326 {offsets = [0, 0], sizes = [2, 128], strides = [1, 1]} : vector<2x384xf32> to vector<2x128xf32>
    %334 = arith.addf %332, %333 : vector<2x128xf32>
    %335 = arith.negf %334 : vector<2x128xf32>
    %336 = math.exp %335 : vector<2x128xf32>
    %cst_241 = arith.constant 1.000000e+00 : f32
    %337 = vector.broadcast %cst_241 : f32 to vector<2x128xf32>
    %338 = arith.addf %337, %336 : vector<2x128xf32>
    %339 = arith.divf %337, %338 : vector<2x128xf32>
    %340 = vector.extract_strided_slice %329 {offsets = [0, 128], sizes = [2, 128], strides = [1, 1]} : vector<2x384xf32> to vector<2x128xf32>
    %341 = vector.extract_strided_slice %326 {offsets = [0, 128], sizes = [2, 128], strides = [1, 1]} : vector<2x384xf32> to vector<2x128xf32>
    %342 = arith.addf %340, %341 : vector<2x128xf32>
    %343 = arith.negf %342 : vector<2x128xf32>
    %344 = math.exp %343 : vector<2x128xf32>
    %cst_242 = arith.constant 1.000000e+00 : f32
    %345 = vector.broadcast %cst_242 : f32 to vector<2x128xf32>
    %346 = arith.addf %345, %344 : vector<2x128xf32>
    %347 = arith.divf %345, %346 : vector<2x128xf32>
    %348 = vector.extract_strided_slice %329 {offsets = [0, 256], sizes = [2, 128], strides = [1, 1]} : vector<2x384xf32> to vector<2x128xf32>
    %349 = vector.extract_strided_slice %326 {offsets = [0, 256], sizes = [2, 128], strides = [1, 1]} : vector<2x384xf32> to vector<2x128xf32>
    %350 = arith.addf %349, %131 : vector<2x128xf32>
    %351 = arith.mulf %339, %350 : vector<2x128xf32>
    %352 = arith.addf %348, %351 : vector<2x128xf32>
    %353 = math.tanh %352 : vector<2x128xf32>
    %354 = arith.subf %294, %353 : vector<2x128xf32>
    %355 = arith.mulf %347, %354 : vector<2x128xf32>
    %356 = arith.addf %353, %355 : vector<2x128xf32>
    %357 = vector.extract_strided_slice %331 {offsets = [0, 0], sizes = [2, 128], strides = [1, 1]} : vector<2x384xf32> to vector<2x128xf32>
    %358 = vector.extract_strided_slice %327 {offsets = [0, 0], sizes = [2, 128], strides = [1, 1]} : vector<2x384xf32> to vector<2x128xf32>
    %359 = arith.addf %357, %358 : vector<2x128xf32>
    %360 = arith.negf %359 : vector<2x128xf32>
    %361 = math.exp %360 : vector<2x128xf32>
    %cst_243 = arith.constant 1.000000e+00 : f32
    %362 = vector.broadcast %cst_243 : f32 to vector<2x128xf32>
    %363 = arith.addf %362, %361 : vector<2x128xf32>
    %364 = arith.divf %362, %363 : vector<2x128xf32>
    %365 = vector.extract_strided_slice %331 {offsets = [0, 128], sizes = [2, 128], strides = [1, 1]} : vector<2x384xf32> to vector<2x128xf32>
    %366 = vector.extract_strided_slice %327 {offsets = [0, 128], sizes = [2, 128], strides = [1, 1]} : vector<2x384xf32> to vector<2x128xf32>
    %367 = arith.addf %365, %366 : vector<2x128xf32>
    %368 = arith.negf %367 : vector<2x128xf32>
    %369 = math.exp %368 : vector<2x128xf32>
    %cst_244 = arith.constant 1.000000e+00 : f32
    %370 = vector.broadcast %cst_244 : f32 to vector<2x128xf32>
    %371 = arith.addf %370, %369 : vector<2x128xf32>
    %372 = arith.divf %370, %371 : vector<2x128xf32>
    %373 = vector.extract_strided_slice %331 {offsets = [0, 256], sizes = [2, 128], strides = [1, 1]} : vector<2x384xf32> to vector<2x128xf32>
    %374 = vector.extract_strided_slice %327 {offsets = [0, 256], sizes = [2, 128], strides = [1, 1]} : vector<2x384xf32> to vector<2x128xf32>
    %375 = arith.addf %374, %135 : vector<2x128xf32>
    %376 = arith.mulf %364, %375 : vector<2x128xf32>
    %377 = arith.addf %373, %376 : vector<2x128xf32>
    %378 = math.tanh %377 : vector<2x128xf32>
    %379 = arith.subf %319, %378 : vector<2x128xf32>
    %380 = arith.mulf %372, %379 : vector<2x128xf32>
    %381 = arith.addf %378, %380 : vector<2x128xf32>
    %c0_245 = arith.constant 0 : index
    %c0_246 = arith.constant 0 : index
    %c3_247 = arith.constant 3 : index
    %c0_248 = arith.constant 0 : index
    %c0_249 = arith.constant 0 : index
    %382 = vector.load %arg7[%c0_245, %c0_246, %c3_247, %c0_248, %c0_249] : memref<1x2x8x2x128xf32, #tpu.memory_space<vmem>>, vector<1x1x1x2x128xf32>
    %383 = vector.shape_cast %382 : vector<1x1x1x2x128xf32> to vector<2x128xf32>
    %384 = vector.shape_cast %356 : vector<2x128xf32> to vector<1x1x1x2x128xf32>
    tpu.vector_store %arg7[%c0_245, %c0_246, %c3_247, %c0_248, %c0_249], %384 {strides = array<i32>} : memref<1x2x8x2x128xf32, #tpu.memory_space<vmem>>, vector<1x1x1x2x128xf32>,
    %c0_250 = arith.constant 0 : index
    %c1_251 = arith.constant 1 : index
    %c4_252 = arith.constant 4 : index
    %c0_253 = arith.constant 0 : index
    %c0_254 = arith.constant 0 : index
    %385 = vector.load %arg7[%c0_250, %c1_251, %c4_252, %c0_253, %c0_254] : memref<1x2x8x2x128xf32, #tpu.memory_space<vmem>>, vector<1x1x1x2x128xf32>
    %386 = vector.shape_cast %385 : vector<1x1x1x2x128xf32> to vector<2x128xf32>
    %387 = vector.shape_cast %381 : vector<2x128xf32> to vector<1x1x1x2x128xf32>
    tpu.vector_store %arg7[%c0_250, %c1_251, %c4_252, %c0_253, %c0_254], %387 {strides = array<i32>} : memref<1x2x8x2x128xf32, #tpu.memory_space<vmem>>, vector<1x1x1x2x128xf32>,
    %cst_255 = arith.constant dense<0.000000e+00> : vector<2x384xf32>
    %388 = tpu.matmul %356, %125, %cst_255 {dimension_numbers = #tpu.dot_dimension_numbers<[1], [0], [0], [1], [0, 0, 1, 1], [], []>} : vector<2x128xf32>, vector<128x384xf32>, vector<2x384xf32> -> vector<2x384xf32>
    %cst_256 = arith.constant dense<0.000000e+00> : vector<2x384xf32>
    %389 = tpu.matmul %381, %127, %cst_256 {dimension_numbers = #tpu.dot_dimension_numbers<[1], [0], [0], [1], [0, 0, 1, 1], [], []>} : vector<2x128xf32>, vector<128x384xf32>, vector<2x384xf32> -> vector<2x384xf32>
    %c0_257 = arith.constant 0 : index
    %c4_258 = arith.constant 4 : index
    %c0_259 = arith.constant 0 : index
    %c0_260 = arith.constant 0 : index
    %390 = vector.load %arg9[%c0_257, %c4_258, %c0_259, %c0_260] : memref<2x8x2x384xf32, #tpu.memory_space<vmem>>, vector<1x1x2x384xf32>
    %391 = vector.shape_cast %390 : vector<1x1x2x384xf32> to vector<2x384xf32>
    %c1_261 = arith.constant 1 : index
    %c3_262 = arith.constant 3 : index
    %c0_263 = arith.constant 0 : index
    %c0_264 = arith.constant 0 : index
    %392 = vector.load %arg9[%c1_261, %c3_262, %c0_263, %c0_264] : memref<2x8x2x384xf32, #tpu.memory_space<vmem>>, vector<1x1x2x384xf32>
    %393 = vector.shape_cast %392 : vector<1x1x2x384xf32> to vector<2x384xf32>
    %394 = vector.extract_strided_slice %391 {offsets = [0, 0], sizes = [2, 128], strides = [1, 1]} : vector<2x384xf32> to vector<2x128xf32>
    %395 = vector.extract_strided_slice %388 {offsets = [0, 0], sizes = [2, 128], strides = [1, 1]} : vector<2x384xf32> to vector<2x128xf32>
    %396 = arith.addf %394, %395 : vector<2x128xf32>
    %397 = arith.negf %396 : vector<2x128xf32>
    %398 = math.exp %397 : vector<2x128xf32>
    %cst_265 = arith.constant 1.000000e+00 : f32
    %399 = vector.broadcast %cst_265 : f32 to vector<2x128xf32>
    %400 = arith.addf %399, %398 : vector<2x128xf32>
    %401 = arith.divf %399, %400 : vector<2x128xf32>
    %402 = vector.extract_strided_slice %391 {offsets = [0, 128], sizes = [2, 128], strides = [1, 1]} : vector<2x384xf32> to vector<2x128xf32>
    %403 = vector.extract_strided_slice %388 {offsets = [0, 128], sizes = [2, 128], strides = [1, 1]} : vector<2x384xf32> to vector<2x128xf32>
    %404 = arith.addf %402, %403 : vector<2x128xf32>
    %405 = arith.negf %404 : vector<2x128xf32>
    %406 = math.exp %405 : vector<2x128xf32>
    %cst_266 = arith.constant 1.000000e+00 : f32
    %407 = vector.broadcast %cst_266 : f32 to vector<2x128xf32>
    %408 = arith.addf %407, %406 : vector<2x128xf32>
    %409 = arith.divf %407, %408 : vector<2x128xf32>
    %410 = vector.extract_strided_slice %391 {offsets = [0, 256], sizes = [2, 128], strides = [1, 1]} : vector<2x384xf32> to vector<2x128xf32>
    %411 = vector.extract_strided_slice %388 {offsets = [0, 256], sizes = [2, 128], strides = [1, 1]} : vector<2x384xf32> to vector<2x128xf32>
    %412 = arith.addf %411, %131 : vector<2x128xf32>
    %413 = arith.mulf %401, %412 : vector<2x128xf32>
    %414 = arith.addf %410, %413 : vector<2x128xf32>
    %415 = math.tanh %414 : vector<2x128xf32>
    %416 = arith.subf %356, %415 : vector<2x128xf32>
    %417 = arith.mulf %409, %416 : vector<2x128xf32>
    %418 = arith.addf %415, %417 : vector<2x128xf32>
    %419 = vector.extract_strided_slice %393 {offsets = [0, 0], sizes = [2, 128], strides = [1, 1]} : vector<2x384xf32> to vector<2x128xf32>
    %420 = vector.extract_strided_slice %389 {offsets = [0, 0], sizes = [2, 128], strides = [1, 1]} : vector<2x384xf32> to vector<2x128xf32>
    %421 = arith.addf %419, %420 : vector<2x128xf32>
    %422 = arith.negf %421 : vector<2x128xf32>
    %423 = math.exp %422 : vector<2x128xf32>
    %cst_267 = arith.constant 1.000000e+00 : f32
    %424 = vector.broadcast %cst_267 : f32 to vector<2x128xf32>
    %425 = arith.addf %424, %423 : vector<2x128xf32>
    %426 = arith.divf %424, %425 : vector<2x128xf32>
    %427 = vector.extract_strided_slice %393 {offsets = [0, 128], sizes = [2, 128], strides = [1, 1]} : vector<2x384xf32> to vector<2x128xf32>
    %428 = vector.extract_strided_slice %389 {offsets = [0, 128], sizes = [2, 128], strides = [1, 1]} : vector<2x384xf32> to vector<2x128xf32>
    %429 = arith.addf %427, %428 : vector<2x128xf32>
    %430 = arith.negf %429 : vector<2x128xf32>
    %431 = math.exp %430 : vector<2x128xf32>
    %cst_268 = arith.constant 1.000000e+00 : f32
    %432 = vector.broadcast %cst_268 : f32 to vector<2x128xf32>
    %433 = arith.addf %432, %431 : vector<2x128xf32>
    %434 = arith.divf %432, %433 : vector<2x128xf32>
    %435 = vector.extract_strided_slice %393 {offsets = [0, 256], sizes = [2, 128], strides = [1, 1]} : vector<2x384xf32> to vector<2x128xf32>
    %436 = vector.extract_strided_slice %389 {offsets = [0, 256], sizes = [2, 128], strides = [1, 1]} : vector<2x384xf32> to vector<2x128xf32>
    %437 = arith.addf %436, %135 : vector<2x128xf32>
    %438 = arith.mulf %426, %437 : vector<2x128xf32>
    %439 = arith.addf %435, %438 : vector<2x128xf32>
    %440 = math.tanh %439 : vector<2x128xf32>
    %441 = arith.subf %381, %440 : vector<2x128xf32>
    %442 = arith.mulf %434, %441 : vector<2x128xf32>
    %443 = arith.addf %440, %442 : vector<2x128xf32>
    %c0_269 = arith.constant 0 : index
    %c0_270 = arith.constant 0 : index
    %c4_271 = arith.constant 4 : index
    %c0_272 = arith.constant 0 : index
    %c0_273 = arith.constant 0 : index
    %444 = vector.load %arg7[%c0_269, %c0_270, %c4_271, %c0_272, %c0_273] : memref<1x2x8x2x128xf32, #tpu.memory_space<vmem>>, vector<1x1x1x2x128xf32>
    %445 = vector.shape_cast %444 : vector<1x1x1x2x128xf32> to vector<2x128xf32>
    %446 = vector.shape_cast %418 : vector<2x128xf32> to vector<1x1x1x2x128xf32>
    tpu.vector_store %arg7[%c0_269, %c0_270, %c4_271, %c0_272, %c0_273], %446 {strides = array<i32>} : memref<1x2x8x2x128xf32, #tpu.memory_space<vmem>>, vector<1x1x1x2x128xf32>,
    %c0_274 = arith.constant 0 : index
    %c1_275 = arith.constant 1 : index
    %c3_276 = arith.constant 3 : index
    %c0_277 = arith.constant 0 : index
    %c0_278 = arith.constant 0 : index
    %447 = vector.load %arg7[%c0_274, %c1_275, %c3_276, %c0_277, %c0_278] : memref<1x2x8x2x128xf32, #tpu.memory_space<vmem>>, vector<1x1x1x2x128xf32>
    %448 = vector.shape_cast %447 : vector<1x1x1x2x128xf32> to vector<2x128xf32>
    %449 = vector.shape_cast %443 : vector<2x128xf32> to vector<1x1x1x2x128xf32>
    tpu.vector_store %arg7[%c0_274, %c1_275, %c3_276, %c0_277, %c0_278], %449 {strides = array<i32>} : memref<1x2x8x2x128xf32, #tpu.memory_space<vmem>>, vector<1x1x1x2x128xf32>,
    %cst_279 = arith.constant dense<0.000000e+00> : vector<2x384xf32>
    %450 = tpu.matmul %418, %125, %cst_279 {dimension_numbers = #tpu.dot_dimension_numbers<[1], [0], [0], [1], [0, 0, 1, 1], [], []>} : vector<2x128xf32>, vector<128x384xf32>, vector<2x384xf32> -> vector<2x384xf32>
    %cst_280 = arith.constant dense<0.000000e+00> : vector<2x384xf32>
    %451 = tpu.matmul %443, %127, %cst_280 {dimension_numbers = #tpu.dot_dimension_numbers<[1], [0], [0], [1], [0, 0, 1, 1], [], []>} : vector<2x128xf32>, vector<128x384xf32>, vector<2x384xf32> -> vector<2x384xf32>
    %c0_281 = arith.constant 0 : index
    %c5_282 = arith.constant 5 : index
    %c0_283 = arith.constant 0 : index
    %c0_284 = arith.constant 0 : index
    %452 = vector.load %arg9[%c0_281, %c5_282, %c0_283, %c0_284] : memref<2x8x2x384xf32, #tpu.memory_space<vmem>>, vector<1x1x2x384xf32>
    %453 = vector.shape_cast %452 : vector<1x1x2x384xf32> to vector<2x384xf32>
    %c1_285 = arith.constant 1 : index
    %c2_286 = arith.constant 2 : index
    %c0_287 = arith.constant 0 : index
    %c0_288 = arith.constant 0 : index
    %454 = vector.load %arg9[%c1_285, %c2_286, %c0_287, %c0_288] : memref<2x8x2x384xf32, #tpu.memory_space<vmem>>, vector<1x1x2x384xf32>
    %455 = vector.shape_cast %454 : vector<1x1x2x384xf32> to vector<2x384xf32>
    %456 = vector.extract_strided_slice %453 {offsets = [0, 0], sizes = [2, 128], strides = [1, 1]} : vector<2x384xf32> to vector<2x128xf32>
    %457 = vector.extract_strided_slice %450 {offsets = [0, 0], sizes = [2, 128], strides = [1, 1]} : vector<2x384xf32> to vector<2x128xf32>
    %458 = arith.addf %456, %457 : vector<2x128xf32>
    %459 = arith.negf %458 : vector<2x128xf32>
    %460 = math.exp %459 : vector<2x128xf32>
    %cst_289 = arith.constant 1.000000e+00 : f32
    %461 = vector.broadcast %cst_289 : f32 to vector<2x128xf32>
    %462 = arith.addf %461, %460 : vector<2x128xf32>
    %463 = arith.divf %461, %462 : vector<2x128xf32>
    %464 = vector.extract_strided_slice %453 {offsets = [0, 128], sizes = [2, 128], strides = [1, 1]} : vector<2x384xf32> to vector<2x128xf32>
    %465 = vector.extract_strided_slice %450 {offsets = [0, 128], sizes = [2, 128], strides = [1, 1]} : vector<2x384xf32> to vector<2x128xf32>
    %466 = arith.addf %464, %465 : vector<2x128xf32>
    %467 = arith.negf %466 : vector<2x128xf32>
    %468 = math.exp %467 : vector<2x128xf32>
    %cst_290 = arith.constant 1.000000e+00 : f32
    %469 = vector.broadcast %cst_290 : f32 to vector<2x128xf32>
    %470 = arith.addf %469, %468 : vector<2x128xf32>
    %471 = arith.divf %469, %470 : vector<2x128xf32>
    %472 = vector.extract_strided_slice %453 {offsets = [0, 256], sizes = [2, 128], strides = [1, 1]} : vector<2x384xf32> to vector<2x128xf32>
    %473 = vector.extract_strided_slice %450 {offsets = [0, 256], sizes = [2, 128], strides = [1, 1]} : vector<2x384xf32> to vector<2x128xf32>
    %474 = arith.addf %473, %131 : vector<2x128xf32>
    %475 = arith.mulf %463, %474 : vector<2x128xf32>
    %476 = arith.addf %472, %475 : vector<2x128xf32>
    %477 = math.tanh %476 : vector<2x128xf32>
    %478 = arith.subf %418, %477 : vector<2x128xf32>
    %479 = arith.mulf %471, %478 : vector<2x128xf32>
    %480 = arith.addf %477, %479 : vector<2x128xf32>
    %481 = vector.extract_strided_slice %455 {offsets = [0, 0], sizes = [2, 128], strides = [1, 1]} : vector<2x384xf32> to vector<2x128xf32>
    %482 = vector.extract_strided_slice %451 {offsets = [0, 0], sizes = [2, 128], strides = [1, 1]} : vector<2x384xf32> to vector<2x128xf32>
    %483 = arith.addf %481, %482 : vector<2x128xf32>
    %484 = arith.negf %483 : vector<2x128xf32>
    %485 = math.exp %484 : vector<2x128xf32>
    %cst_291 = arith.constant 1.000000e+00 : f32
    %486 = vector.broadcast %cst_291 : f32 to vector<2x128xf32>
    %487 = arith.addf %486, %485 : vector<2x128xf32>
    %488 = arith.divf %486, %487 : vector<2x128xf32>
    %489 = vector.extract_strided_slice %455 {offsets = [0, 128], sizes = [2, 128], strides = [1, 1]} : vector<2x384xf32> to vector<2x128xf32>
    %490 = vector.extract_strided_slice %451 {offsets = [0, 128], sizes = [2, 128], strides = [1, 1]} : vector<2x384xf32> to vector<2x128xf32>
    %491 = arith.addf %489, %490 : vector<2x128xf32>
    %492 = arith.negf %491 : vector<2x128xf32>
    %493 = math.exp %492 : vector<2x128xf32>
    %cst_292 = arith.constant 1.000000e+00 : f32
    %494 = vector.broadcast %cst_292 : f32 to vector<2x128xf32>
    %495 = arith.addf %494, %493 : vector<2x128xf32>
    %496 = arith.divf %494, %495 : vector<2x128xf32>
    %497 = vector.extract_strided_slice %455 {offsets = [0, 256], sizes = [2, 128], strides = [1, 1]} : vector<2x384xf32> to vector<2x128xf32>
    %498 = vector.extract_strided_slice %451 {offsets = [0, 256], sizes = [2, 128], strides = [1, 1]} : vector<2x384xf32> to vector<2x128xf32>
    %499 = arith.addf %498, %135 : vector<2x128xf32>
    %500 = arith.mulf %488, %499 : vector<2x128xf32>
    %501 = arith.addf %497, %500 : vector<2x128xf32>
    %502 = math.tanh %501 : vector<2x128xf32>
    %503 = arith.subf %443, %502 : vector<2x128xf32>
    %504 = arith.mulf %496, %503 : vector<2x128xf32>
    %505 = arith.addf %502, %504 : vector<2x128xf32>
    %c0_293 = arith.constant 0 : index
    %c0_294 = arith.constant 0 : index
    %c5_295 = arith.constant 5 : index
    %c0_296 = arith.constant 0 : index
    %c0_297 = arith.constant 0 : index
    %506 = vector.load %arg7[%c0_293, %c0_294, %c5_295, %c0_296, %c0_297] : memref<1x2x8x2x128xf32, #tpu.memory_space<vmem>>, vector<1x1x1x2x128xf32>
    %507 = vector.shape_cast %506 : vector<1x1x1x2x128xf32> to vector<2x128xf32>
    %508 = vector.shape_cast %480 : vector<2x128xf32> to vector<1x1x1x2x128xf32>
    tpu.vector_store %arg7[%c0_293, %c0_294, %c5_295, %c0_296, %c0_297], %508 {strides = array<i32>} : memref<1x2x8x2x128xf32, #tpu.memory_space<vmem>>, vector<1x1x1x2x128xf32>,
    %c0_298 = arith.constant 0 : index
    %c1_299 = arith.constant 1 : index
    %c2_300 = arith.constant 2 : index
    %c0_301 = arith.constant 0 : index
    %c0_302 = arith.constant 0 : index
    %509 = vector.load %arg7[%c0_298, %c1_299, %c2_300, %c0_301, %c0_302] : memref<1x2x8x2x128xf32, #tpu.memory_space<vmem>>, vector<1x1x1x2x128xf32>
    %510 = vector.shape_cast %509 : vector<1x1x1x2x128xf32> to vector<2x128xf32>
    %511 = vector.shape_cast %505 : vector<2x128xf32> to vector<1x1x1x2x128xf32>
    tpu.vector_store %arg7[%c0_298, %c1_299, %c2_300, %c0_301, %c0_302], %511 {strides = array<i32>} : memref<1x2x8x2x128xf32, #tpu.memory_space<vmem>>, vector<1x1x1x2x128xf32>,
    %cst_303 = arith.constant dense<0.000000e+00> : vector<2x384xf32>
    %512 = tpu.matmul %480, %125, %cst_303 {dimension_numbers = #tpu.dot_dimension_numbers<[1], [0], [0], [1], [0, 0, 1, 1], [], []>} : vector<2x128xf32>, vector<128x384xf32>, vector<2x384xf32> -> vector<2x384xf32>
    %cst_304 = arith.constant dense<0.000000e+00> : vector<2x384xf32>
    %513 = tpu.matmul %505, %127, %cst_304 {dimension_numbers = #tpu.dot_dimension_numbers<[1], [0], [0], [1], [0, 0, 1, 1], [], []>} : vector<2x128xf32>, vector<128x384xf32>, vector<2x384xf32> -> vector<2x384xf32>
    %c0_305 = arith.constant 0 : index
    %c6_306 = arith.constant 6 : index
    %c0_307 = arith.constant 0 : index
    %c0_308 = arith.constant 0 : index
    %514 = vector.load %arg9[%c0_305, %c6_306, %c0_307, %c0_308] : memref<2x8x2x384xf32, #tpu.memory_space<vmem>>, vector<1x1x2x384xf32>
    %515 = vector.shape_cast %514 : vector<1x1x2x384xf32> to vector<2x384xf32>
    %c1_309 = arith.constant 1 : index
    %c1_310 = arith.constant 1 : index
    %c0_311 = arith.constant 0 : index
    %c0_312 = arith.constant 0 : index
    %516 = vector.load %arg9[%c1_309, %c1_310, %c0_311, %c0_312] : memref<2x8x2x384xf32, #tpu.memory_space<vmem>>, vector<1x1x2x384xf32>
    %517 = vector.shape_cast %516 : vector<1x1x2x384xf32> to vector<2x384xf32>
    %518 = vector.extract_strided_slice %515 {offsets = [0, 0], sizes = [2, 128], strides = [1, 1]} : vector<2x384xf32> to vector<2x128xf32>
    %519 = vector.extract_strided_slice %512 {offsets = [0, 0], sizes = [2, 128], strides = [1, 1]} : vector<2x384xf32> to vector<2x128xf32>
    %520 = arith.addf %518, %519 : vector<2x128xf32>
    %521 = arith.negf %520 : vector<2x128xf32>
    %522 = math.exp %521 : vector<2x128xf32>
    %cst_313 = arith.constant 1.000000e+00 : f32
    %523 = vector.broadcast %cst_313 : f32 to vector<2x128xf32>
    %524 = arith.addf %523, %522 : vector<2x128xf32>
    %525 = arith.divf %523, %524 : vector<2x128xf32>
    %526 = vector.extract_strided_slice %515 {offsets = [0, 128], sizes = [2, 128], strides = [1, 1]} : vector<2x384xf32> to vector<2x128xf32>
    %527 = vector.extract_strided_slice %512 {offsets = [0, 128], sizes = [2, 128], strides = [1, 1]} : vector<2x384xf32> to vector<2x128xf32>
    %528 = arith.addf %526, %527 : vector<2x128xf32>
    %529 = arith.negf %528 : vector<2x128xf32>
    %530 = math.exp %529 : vector<2x128xf32>
    %cst_314 = arith.constant 1.000000e+00 : f32
    %531 = vector.broadcast %cst_314 : f32 to vector<2x128xf32>
    %532 = arith.addf %531, %530 : vector<2x128xf32>
    %533 = arith.divf %531, %532 : vector<2x128xf32>
    %534 = vector.extract_strided_slice %515 {offsets = [0, 256], sizes = [2, 128], strides = [1, 1]} : vector<2x384xf32> to vector<2x128xf32>
    %535 = vector.extract_strided_slice %512 {offsets = [0, 256], sizes = [2, 128], strides = [1, 1]} : vector<2x384xf32> to vector<2x128xf32>
    %536 = arith.addf %535, %131 : vector<2x128xf32>
    %537 = arith.mulf %525, %536 : vector<2x128xf32>
    %538 = arith.addf %534, %537 : vector<2x128xf32>
    %539 = math.tanh %538 : vector<2x128xf32>
    %540 = arith.subf %480, %539 : vector<2x128xf32>
    %541 = arith.mulf %533, %540 : vector<2x128xf32>
    %542 = arith.addf %539, %541 : vector<2x128xf32>
    %543 = vector.extract_strided_slice %517 {offsets = [0, 0], sizes = [2, 128], strides = [1, 1]} : vector<2x384xf32> to vector<2x128xf32>
    %544 = vector.extract_strided_slice %513 {offsets = [0, 0], sizes = [2, 128], strides = [1, 1]} : vector<2x384xf32> to vector<2x128xf32>
    %545 = arith.addf %543, %544 : vector<2x128xf32>
    %546 = arith.negf %545 : vector<2x128xf32>
    %547 = math.exp %546 : vector<2x128xf32>
    %cst_315 = arith.constant 1.000000e+00 : f32
    %548 = vector.broadcast %cst_315 : f32 to vector<2x128xf32>
    %549 = arith.addf %548, %547 : vector<2x128xf32>
    %550 = arith.divf %548, %549 : vector<2x128xf32>
    %551 = vector.extract_strided_slice %517 {offsets = [0, 128], sizes = [2, 128], strides = [1, 1]} : vector<2x384xf32> to vector<2x128xf32>
    %552 = vector.extract_strided_slice %513 {offsets = [0, 128], sizes = [2, 128], strides = [1, 1]} : vector<2x384xf32> to vector<2x128xf32>
    %553 = arith.addf %551, %552 : vector<2x128xf32>
    %554 = arith.negf %553 : vector<2x128xf32>
    %555 = math.exp %554 : vector<2x128xf32>
    %cst_316 = arith.constant 1.000000e+00 : f32
    %556 = vector.broadcast %cst_316 : f32 to vector<2x128xf32>
    %557 = arith.addf %556, %555 : vector<2x128xf32>
    %558 = arith.divf %556, %557 : vector<2x128xf32>
    %559 = vector.extract_strided_slice %517 {offsets = [0, 256], sizes = [2, 128], strides = [1, 1]} : vector<2x384xf32> to vector<2x128xf32>
    %560 = vector.extract_strided_slice %513 {offsets = [0, 256], sizes = [2, 128], strides = [1, 1]} : vector<2x384xf32> to vector<2x128xf32>
    %561 = arith.addf %560, %135 : vector<2x128xf32>
    %562 = arith.mulf %550, %561 : vector<2x128xf32>
    %563 = arith.addf %559, %562 : vector<2x128xf32>
    %564 = math.tanh %563 : vector<2x128xf32>
    %565 = arith.subf %505, %564 : vector<2x128xf32>
    %566 = arith.mulf %558, %565 : vector<2x128xf32>
    %567 = arith.addf %564, %566 : vector<2x128xf32>
    %c0_317 = arith.constant 0 : index
    %c0_318 = arith.constant 0 : index
    %c6_319 = arith.constant 6 : index
    %c0_320 = arith.constant 0 : index
    %c0_321 = arith.constant 0 : index
    %568 = vector.load %arg7[%c0_317, %c0_318, %c6_319, %c0_320, %c0_321] : memref<1x2x8x2x128xf32, #tpu.memory_space<vmem>>, vector<1x1x1x2x128xf32>
    %569 = vector.shape_cast %568 : vector<1x1x1x2x128xf32> to vector<2x128xf32>
    %570 = vector.shape_cast %542 : vector<2x128xf32> to vector<1x1x1x2x128xf32>
    tpu.vector_store %arg7[%c0_317, %c0_318, %c6_319, %c0_320, %c0_321], %570 {strides = array<i32>} : memref<1x2x8x2x128xf32, #tpu.memory_space<vmem>>, vector<1x1x1x2x128xf32>,
    %c0_322 = arith.constant 0 : index
    %c1_323 = arith.constant 1 : index
    %c1_324 = arith.constant 1 : index
    %c0_325 = arith.constant 0 : index
    %c0_326 = arith.constant 0 : index
    %571 = vector.load %arg7[%c0_322, %c1_323, %c1_324, %c0_325, %c0_326] : memref<1x2x8x2x128xf32, #tpu.memory_space<vmem>>, vector<1x1x1x2x128xf32>
    %572 = vector.shape_cast %571 : vector<1x1x1x2x128xf32> to vector<2x128xf32>
    %573 = vector.shape_cast %567 : vector<2x128xf32> to vector<1x1x1x2x128xf32>
    tpu.vector_store %arg7[%c0_322, %c1_323, %c1_324, %c0_325, %c0_326], %573 {strides = array<i32>} : memref<1x2x8x2x128xf32, #tpu.memory_space<vmem>>, vector<1x1x1x2x128xf32>,
    %cst_327 = arith.constant dense<0.000000e+00> : vector<2x384xf32>
    %574 = tpu.matmul %542, %125, %cst_327 {dimension_numbers = #tpu.dot_dimension_numbers<[1], [0], [0], [1], [0, 0, 1, 1], [], []>} : vector<2x128xf32>, vector<128x384xf32>, vector<2x384xf32> -> vector<2x384xf32>
    %cst_328 = arith.constant dense<0.000000e+00> : vector<2x384xf32>
    %575 = tpu.matmul %567, %127, %cst_328 {dimension_numbers = #tpu.dot_dimension_numbers<[1], [0], [0], [1], [0, 0, 1, 1], [], []>} : vector<2x128xf32>, vector<128x384xf32>, vector<2x384xf32> -> vector<2x384xf32>
    %c0_329 = arith.constant 0 : index
    %c7_330 = arith.constant 7 : index
    %c0_331 = arith.constant 0 : index
    %c0_332 = arith.constant 0 : index
    %576 = vector.load %arg9[%c0_329, %c7_330, %c0_331, %c0_332] : memref<2x8x2x384xf32, #tpu.memory_space<vmem>>, vector<1x1x2x384xf32>
    %577 = vector.shape_cast %576 : vector<1x1x2x384xf32> to vector<2x384xf32>
    %c1_333 = arith.constant 1 : index
    %c0_334 = arith.constant 0 : index
    %c0_335 = arith.constant 0 : index
    %c0_336 = arith.constant 0 : index
    %578 = vector.load %arg9[%c1_333, %c0_334, %c0_335, %c0_336] : memref<2x8x2x384xf32, #tpu.memory_space<vmem>>, vector<1x1x2x384xf32>
    %579 = vector.shape_cast %578 : vector<1x1x2x384xf32> to vector<2x384xf32>
    %580 = vector.extract_strided_slice %577 {offsets = [0, 0], sizes = [2, 128], strides = [1, 1]} : vector<2x384xf32> to vector<2x128xf32>
    %581 = vector.extract_strided_slice %574 {offsets = [0, 0], sizes = [2, 128], strides = [1, 1]} : vector<2x384xf32> to vector<2x128xf32>
    %582 = arith.addf %580, %581 : vector<2x128xf32>
    %583 = arith.negf %582 : vector<2x128xf32>
    %584 = math.exp %583 : vector<2x128xf32>
    %cst_337 = arith.constant 1.000000e+00 : f32
    %585 = vector.broadcast %cst_337 : f32 to vector<2x128xf32>
    %586 = arith.addf %585, %584 : vector<2x128xf32>
    %587 = arith.divf %585, %586 : vector<2x128xf32>
    %588 = vector.extract_strided_slice %577 {offsets = [0, 128], sizes = [2, 128], strides = [1, 1]} : vector<2x384xf32> to vector<2x128xf32>
    %589 = vector.extract_strided_slice %574 {offsets = [0, 128], sizes = [2, 128], strides = [1, 1]} : vector<2x384xf32> to vector<2x128xf32>
    %590 = arith.addf %588, %589 : vector<2x128xf32>
    %591 = arith.negf %590 : vector<2x128xf32>
    %592 = math.exp %591 : vector<2x128xf32>
    %cst_338 = arith.constant 1.000000e+00 : f32
    %593 = vector.broadcast %cst_338 : f32 to vector<2x128xf32>
    %594 = arith.addf %593, %592 : vector<2x128xf32>
    %595 = arith.divf %593, %594 : vector<2x128xf32>
    %596 = vector.extract_strided_slice %577 {offsets = [0, 256], sizes = [2, 128], strides = [1, 1]} : vector<2x384xf32> to vector<2x128xf32>
    %597 = vector.extract_strided_slice %574 {offsets = [0, 256], sizes = [2, 128], strides = [1, 1]} : vector<2x384xf32> to vector<2x128xf32>
    %598 = arith.addf %597, %131 : vector<2x128xf32>
    %599 = arith.mulf %587, %598 : vector<2x128xf32>
    %600 = arith.addf %596, %599 : vector<2x128xf32>
    %601 = math.tanh %600 : vector<2x128xf32>
    %602 = arith.subf %542, %601 : vector<2x128xf32>
    %603 = arith.mulf %595, %602 : vector<2x128xf32>
    %604 = arith.addf %601, %603 : vector<2x128xf32>
    %605 = vector.extract_strided_slice %579 {offsets = [0, 0], sizes = [2, 128], strides = [1, 1]} : vector<2x384xf32> to vector<2x128xf32>
    %606 = vector.extract_strided_slice %575 {offsets = [0, 0], sizes = [2, 128], strides = [1, 1]} : vector<2x384xf32> to vector<2x128xf32>
    %607 = arith.addf %605, %606 : vector<2x128xf32>
    %608 = arith.negf %607 : vector<2x128xf32>
    %609 = math.exp %608 : vector<2x128xf32>
    %cst_339 = arith.constant 1.000000e+00 : f32
    %610 = vector.broadcast %cst_339 : f32 to vector<2x128xf32>
    %611 = arith.addf %610, %609 : vector<2x128xf32>
    %612 = arith.divf %610, %611 : vector<2x128xf32>
    %613 = vector.extract_strided_slice %579 {offsets = [0, 128], sizes = [2, 128], strides = [1, 1]} : vector<2x384xf32> to vector<2x128xf32>
    %614 = vector.extract_strided_slice %575 {offsets = [0, 128], sizes = [2, 128], strides = [1, 1]} : vector<2x384xf32> to vector<2x128xf32>
    %615 = arith.addf %613, %614 : vector<2x128xf32>
    %616 = arith.negf %615 : vector<2x128xf32>
    %617 = math.exp %616 : vector<2x128xf32>
    %cst_340 = arith.constant 1.000000e+00 : f32
    %618 = vector.broadcast %cst_340 : f32 to vector<2x128xf32>
    %619 = arith.addf %618, %617 : vector<2x128xf32>
    %620 = arith.divf %618, %619 : vector<2x128xf32>
    %621 = vector.extract_strided_slice %579 {offsets = [0, 256], sizes = [2, 128], strides = [1, 1]} : vector<2x384xf32> to vector<2x128xf32>
    %622 = vector.extract_strided_slice %575 {offsets = [0, 256], sizes = [2, 128], strides = [1, 1]} : vector<2x384xf32> to vector<2x128xf32>
    %623 = arith.addf %622, %135 : vector<2x128xf32>
    %624 = arith.mulf %612, %623 : vector<2x128xf32>
    %625 = arith.addf %621, %624 : vector<2x128xf32>
    %626 = math.tanh %625 : vector<2x128xf32>
    %627 = arith.subf %567, %626 : vector<2x128xf32>
    %628 = arith.mulf %620, %627 : vector<2x128xf32>
    %629 = arith.addf %626, %628 : vector<2x128xf32>
    %c0_341 = arith.constant 0 : index
    %c0_342 = arith.constant 0 : index
    %c7_343 = arith.constant 7 : index
    %c0_344 = arith.constant 0 : index
    %c0_345 = arith.constant 0 : index
    %630 = vector.load %arg7[%c0_341, %c0_342, %c7_343, %c0_344, %c0_345] : memref<1x2x8x2x128xf32, #tpu.memory_space<vmem>>, vector<1x1x1x2x128xf32>
    %631 = vector.shape_cast %630 : vector<1x1x1x2x128xf32> to vector<2x128xf32>
    %632 = vector.shape_cast %604 : vector<2x128xf32> to vector<1x1x1x2x128xf32>
    tpu.vector_store %arg7[%c0_341, %c0_342, %c7_343, %c0_344, %c0_345], %632 {strides = array<i32>} : memref<1x2x8x2x128xf32, #tpu.memory_space<vmem>>, vector<1x1x1x2x128xf32>,
    %c0_346 = arith.constant 0 : index
    %c1_347 = arith.constant 1 : index
    %c0_348 = arith.constant 0 : index
    %c0_349 = arith.constant 0 : index
    %c0_350 = arith.constant 0 : index
    %633 = vector.load %arg7[%c0_346, %c1_347, %c0_348, %c0_349, %c0_350] : memref<1x2x8x2x128xf32, #tpu.memory_space<vmem>>, vector<1x1x1x2x128xf32>
    %634 = vector.shape_cast %633 : vector<1x1x1x2x128xf32> to vector<2x128xf32>
    %635 = vector.shape_cast %629 : vector<2x128xf32> to vector<1x1x1x2x128xf32>
    tpu.vector_store %arg7[%c0_346, %c1_347, %c0_348, %c0_349, %c0_350], %635 {strides = array<i32>} : memref<1x2x8x2x128xf32, #tpu.memory_space<vmem>>, vector<1x1x1x2x128xf32>,
    %c0_351 = arith.constant 0 : index
    %c0_352 = arith.constant 0 : index
    %c0_353 = arith.constant 0 : index
    %c0_354 = arith.constant 0 : index
    %636 = vector.load %arg8[%c0_351, %c0_352, %c0_353, %c0_354] : memref<1x2x2x128xf32, #tpu.memory_space<vmem>>, vector<1x1x2x128xf32>
    %637 = vector.shape_cast %636 : vector<1x1x2x128xf32> to vector<2x128xf32>
    %638 = vector.shape_cast %604 : vector<2x128xf32> to vector<1x1x2x128xf32>
    tpu.vector_store %arg8[%c0_351, %c0_352, %c0_353, %c0_354], %638 {strides = array<i32>} : memref<1x2x2x128xf32, #tpu.memory_space<vmem>>, vector<1x1x2x128xf32>,
    %c0_355 = arith.constant 0 : index
    %c1_356 = arith.constant 1 : index
    %c0_357 = arith.constant 0 : index
    %c0_358 = arith.constant 0 : index
    %639 = vector.load %arg8[%c0_355, %c1_356, %c0_357, %c0_358] : memref<1x2x2x128xf32, #tpu.memory_space<vmem>>, vector<1x1x2x128xf32>
    %640 = vector.shape_cast %639 : vector<1x1x2x128xf32> to vector<2x128xf32>
    %641 = vector.shape_cast %629 : vector<2x128xf32> to vector<1x1x2x128xf32>
    tpu.vector_store %arg8[%c0_355, %c1_356, %c0_357, %c0_358], %641 {strides = array<i32>} : memref<1x2x2x128xf32, #tpu.memory_space<vmem>>, vector<1x1x2x128xf32>,
    return
  }
  func.func @transform_0(%arg0: i32) -> (i32, i32, i32) {
    %c0_i32 = arith.constant 0 : i32
    %c0_i32_0 = arith.constant 0 : i32
    %c0_i32_1 = arith.constant 0 : i32
    %c0_i32_2 = arith.constant 0 : i32
    return %c0_i32, %c0_i32_0, %c0_i32_1 : i32, i32, i32
  }
  func.func @transform_1(%arg0: i32) -> (i32, i32, i32, i32) {
    %c0_i32 = arith.constant 0 : i32
    %c0_i32_0 = arith.constant 0 : i32
    %c0_i32_1 = arith.constant 0 : i32
    %c0_i32_2 = arith.constant 0 : i32
    return %arg0, %c0_i32, %c0_i32_0, %c0_i32_1 : i32, i32, i32, i32
  }
  func.func @transform_2(%arg0: i32) -> (i32, i32, i32, i32) {
    %c0_i32 = arith.constant 0 : i32
    %c0_i32_0 = arith.constant 0 : i32
    %c0_i32_1 = arith.constant 0 : i32
    %c0_i32_2 = arith.constant 0 : i32
    return %arg0, %c0_i32, %c0_i32_0, %c0_i32_1 : i32, i32, i32, i32
  }
  func.func @transform_3(%arg0: i32) -> (i32, i32, i32, i32) {
    %c0_i32 = arith.constant 0 : i32
    %c0_i32_0 = arith.constant 0 : i32
    %c0_i32_1 = arith.constant 0 : i32
    %c0_i32_2 = arith.constant 0 : i32
    return %arg0, %c0_i32, %c0_i32_0, %c0_i32_1 : i32, i32, i32, i32
  }
  func.func @transform_4(%arg0: i32) -> (i32, i32, i32, i32) {
    %c0_i32 = arith.constant 0 : i32
    %c0_i32_0 = arith.constant 0 : i32
    %c0_i32_1 = arith.constant 0 : i32
    %c0_i32_2 = arith.constant 0 : i32
    return %arg0, %c0_i32, %c0_i32_0, %c0_i32_1 : i32, i32, i32, i32
  }
  func.func @transform_5(%arg0: i32) -> (i32, i32, i32, i32) {
    %c0_i32 = arith.constant 0 : i32
    %c0_i32_0 = arith.constant 0 : i32
    %c0_i32_1 = arith.constant 0 : i32
    %c0_i32_2 = arith.constant 0 : i32
    return %arg0, %c0_i32, %c0_i32_0, %c0_i32_1 : i32, i32, i32, i32
  }
  func.func @transform_6(%arg0: i32) -> (i32, i32, i32, i32, i32) {
    %c0_i32 = arith.constant 0 : i32
    %c0_i32_0 = arith.constant 0 : i32
    %c0_i32_1 = arith.constant 0 : i32
    %c0_i32_2 = arith.constant 0 : i32
    %c0_i32_3 = arith.constant 0 : i32
    return %arg0, %c0_i32, %c0_i32_0, %c0_i32_1, %c0_i32_2 : i32, i32, i32, i32, i32
  }
  func.func @transform_7(%arg0: i32) -> (i32, i32, i32, i32) {
    %c0_i32 = arith.constant 0 : i32
    %c0_i32_0 = arith.constant 0 : i32
    %c0_i32_1 = arith.constant 0 : i32
    %c0_i32_2 = arith.constant 0 : i32
    return %arg0, %c0_i32, %c0_i32_0, %c0_i32_1 : i32, i32, i32, i32
  }
}

</mosaic_0001>

<bundles_post_ra>
// kernel: lfads_encoder_forward.1
= control target key start
LH: loop header
LB: loop body
LE: loop exit
PB: predicated region body
PF: predicated region fallthrough
CT: control target
= control target key end

     0   :  { %s8467_s24 = smov 0   ;;  %s9745_s0 = inlined_call_operand.vmem [shape: f32[8,2,16], index: 0, kind: input, shape index: {}]   ;;  %s9746_s1 = inlined_call_operand.vmem [shape: f32[2,2,2,128], index: 1, kind: input, shape index: {}]   ;;  %s9747_s2 = inlined_call_operand.vmem [shape: f32[2,2,16,384], index: 2, kind: input, shape index: {}]   ;;  %s9748_s3 = inlined_call_operand.vmem [shape: f32[2,2,128,384], index: 3, kind: input, shape index: {}]   ;;  %s9749_s4 = inlined_call_operand.vmem [shape: f32[2,2,1,384], index: 4, kind: input, shape index: {}]   ;;  %s9750_s5 = inlined_call_operand.vmem [shape: f32[2,2,1,128], index: 5, kind: input, shape index: {}]   ;;  %s9751_s6 = inlined_call_operand.vmem [shape: f32[2,2,8,2,128], index: 6, kind: output, shape index: {0}]   ;;  %s9752_s7 = inlined_call_operand.vmem [shape: f32[2,2,2,128], index: 7, kind: output, shape index: {1}]  }
   0x1 LB: > { %s6066_s25 = sadd.s32 4294967295, %s8421_s24   ;;  %p6070_p0 = scmp.ge.s32.totalorder %s8421_s24, 1  ;;  %s8421_s24 = sphi %s8467_s24, %s18_s24  }
   0x2   : > { %p278_p1 = scmp.lt.s32.totalorder %s8421_s24, 3 }
   0x4   : > { %p279_p2 = pnand %p6070_p0, %p278_p1 }
   0x6   : > { %282 = sbr.rel (%p279_p2) target bundleno = 2239 (0x8bf), region = 44 }
   0xd   : > { %p333_p3 = scmp.lt.s32.totalorder %s6066_s25, 1  ;;  %v9753_v0 = vmov 0.0   ;;  %v9755_v1 = vmov 0.0|0.0   ;;  %vm8425_vm0 = vmmov 0   ;;  %v389_v11 = vld [vmem:[%s9745_s0] sm:$0x3] }
   0xe   : > { %458 = vmatprep.mubr.f32.mxu0 %v9753_v0  ;;  %7234 = vmatprep.subr.bf16.mxu1 %v9755_v1  ;;  %vm390_vm1 = vcmask 130048   ;;  %v6082_v12 = vld [vmem:[%s9745_s0 + $0x2] sm:$0x3]  ;;  %v6085_v13 = vld [vmem:[%s9745_s0 + $0x4] sm:$0x3] }
   0xf   : > { %s9860_s25 = smov (!%p333_p3, %s6066_s25), 1  ;;  %6562 = vmatprep.mubr.msk.f32.mxu1 %vm8425_vm0, %v9753_v0  ;;  %v6088_v14 = vld [vmem:[%s9745_s0 + $0x6] sm:$0x3]  ;;  %v6091_v15 = vld [vmem:[%s9745_s0 + $0x8] sm:$0x3] }
  0x10   : > { %s8238_s26 = smul.u32 96, %s9860_s25  ;;  %v6094_v16 = vld [vmem:[%s9745_s0 + $0xa] sm:$0x3]  ;;  %v6097_v19 = vld [vmem:[%s9745_s0 + $0xc] sm:$0x3]  ;;  %s6235_s22 = sshll.u32 %s9860_s25, 2 }
  0x11   : > { %v6100_v25 = vld [vmem:[%s9745_s0 + $0xe] sm:$0x3]  ;;  %v1757_v28 = vld [vmem:[%s9745_s0] sm:$0x3]  ;;  %v6112_v29 = vld [vmem:[%s9745_s0 + $0x2] sm:$0x3]  ;;  %s8838_s27 = scalar_lea.vmem %s9746_s1, %s6235_s22  ;;  %s365_s19 = scalar_lea.vmem %s9752_s7, %s6235_s22 }
  0x12   : > { %s8485_s29 = scalar_lea.vmem %s9747_s2, %s8238_s26  ;;  %v6115_v30 = vld [vmem:[%s9745_s0 + $0x4] sm:$0x3]  ;;  %v6118_v31 = vld [vmem:[%s9745_s0 + $0x6] sm:$0x3]  ;;  %v6121_v32 = vld [vmem:[%s9745_s0 + $0x8] sm:$0x3] }
  0x13   : > { %v367_v2 = vld [vmem:[%s8485_s29 + $0x8] sm:$0xff]  ;;  %v370_v3 = vld [vmem:[%s8485_s29 + $0x20] sm:$0xff]  ;;  %v369_v6 = vld [vmem:[%s8485_s29 + $0x18] sm:$0xff]  ;;  %s8239_s12 = smul.u32 768, %s9860_s25  ;;  %s6075_s9 = sshll.u32 %s9860_s25, 1 }
  0x14   : > { %v366_v4 = vld [vmem:[%s8485_s29] sm:$0xff]  ;;  %v8490_v5 = vpack.c.bf16 %v370_v3, %v367_v2  ;;  %v368_v7 = vld [vmem:[%s8485_s29 + $0x10] sm:$0xff]  ;;  %v371_v8 = vld [vmem:[%s8485_s29 + $0x28] sm:$0xff]  ;;  %s8240_s28 = smul.u32 6, %s9860_s25  ;;  %s6236_s13 = sshll.u32 %s9860_s25, 5 }
  0x15   : > { %v8495_v9 = vpack.c.bf16 %v369_v6, %v366_v4  ;;  %v8497_v10 = vpack.c.bf16 %v371_v8, %v368_v7  ;;  %v6104_v17 = vld [vmem:[%s8485_s29 + $0x38] sm:$0xff]  ;;  %v6107_v18 = vld [vmem:[%s8485_s29 + $0x50] sm:$0xff]  ;;  %v6106_v21 = vld [vmem:[%s8485_s29 + $0x48] sm:$0xff]  ;;  %s8673_s17 = scalar_lea.vmem %s9748_s3, %s8239_s12  ;;  %s9146_s12 = scalar_lea.vmem %s9750_s5, %s6075_s9 }
  0x16   : > { %7231 = vmatprep.subr.bf16.mxu0 %v8490_v5  ;;  %v6103_v20 = vld [vmem:[%s8485_s29 + $0x30] sm:$0xff]  ;;  %v8582_v22 = vpack.c.bf16 %v6107_v18, %v6104_v17  ;;  %v6105_v23 = vld [vmem:[%s8485_s29 + $0x40] sm:$0xff]  ;;  %v6108_v24 = vld [vmem:[%s8485_s29 + $0x58] sm:$0xff]  ;;  %s9028_s8 = scalar_lea.vmem %s9749_s4, %s8240_s28  ;;  %s9157_s16 = scalar_lea.vmem %s9751_s6, %s6236_s13 }
  0x17   : > { %7233 = vmatpush1.bf16.msra.mxu0 %v8495_v9  ;;  %7236 = vmatpush3.bf16.msra.mxu1 %v8497_v10  ;;  %v8593_v26 = vpack.c.bf16 %v6106_v21, %v6103_v20  ;;  %v8597_v27 = vpack.c.bf16 %v6108_v24, %v6105_v23  ;;  %v6124_v33 = vld [vmem:[%s9745_s0 + $0xa] sm:$0x3]  ;;  %v3097_v35 = vld [vmem:[%s8673_s17 + $0x20] sm:$0xff]  ;;  %v6127_v36 = vld [vmem:[%s9745_s0 + $0xc] sm:$0x3] }
  0x18   : > { %7238 = vmatprep.subr.bf16.mxu0 %v8490_v5  ;;  %7241 = vmatprep.subr.bf16.mxu1 %v9755_v1  ;;  %v3094_v34 = vld [vmem:[%s8673_s17 + $0x8] sm:$0xff]  ;;  %v3093_v37 = vld [vmem:[%s8673_s17] sm:$0xff]  ;;  %v3096_v38 = vld [vmem:[%s8673_s17 + $0x18] sm:$0xff] }
  0x19   : > { %v3100_v39 = vld [vmem:[%s8673_s17 + $0x38] sm:$0xff]  ;;  %v8697_v40 = vpack.c.bf16 %v3097_v35, %v3094_v34  ;;  %v3103_v41 = vld [vmem:[%s8673_s17 + $0x50] sm:$0xff]  ;;  %v3098_v43 = vld [vmem:[%s8673_s17 + $0x28] sm:$0xff]  ;;  %v8709_v45 = vpack.c.bf16 %v3096_v38, %v3093_v37 }
  0x1a   : > { %6080 = vmatmul.mubr.msk.f32.vlgmr.msra.gmra.mrb[0].mxu0 %vm390_vm1, %v389_v11  ;;  %6563 = vmatmul.mubr.msk.f32.vlgmr.msra.gmra.mrb[0].mxu1 %vm390_vm1, %v389_v11  ;;  %v3095_v42 = vld [vmem:[%s8673_s17 + $0x10] sm:$0xff]  ;;  %v6130_v44 = vld [vmem:[%s9745_s0 + $0xe] sm:$0x3]  ;;  %v8713_v46 = vpack.c.bf16 %v3103_v41, %v3100_v39  ;;  %v3109_v51 = vld [vmem:[%s8673_s17 + $0x80] sm:$0xff] }
  0x1b   : > { %7240 = vmatpush1.bf16.msra.mxu0 %v8495_v9  ;;  %625 = vmatprep.mubr.f32.mxu0 %v9753_v0  ;;  %v3099_v47 = vld [vmem:[%s8673_s17 + $0x30] sm:$0xff]  ;;  %v3102_v48 = vld [vmem:[%s8673_s17 + $0x48] sm:$0xff]  ;;  %v8718_v50 = vpack.c.bf16 %v3098_v43, %v3095_v42  ;;  %v3101_v52 = vld [vmem:[%s8673_s17 + $0x40] sm:$0xff] }
  0x1c   : > { %7243 = vmatpush3.bf16.msra.mxu1 %v8497_v10  ;;  %7245 = vmatprep.subr.bf16.mxu0 %v8490_v5  ;;  %v3106_v49 = vld [vmem:[%s8673_s17 + $0x68] sm:$0xff]  ;;  %v3104_v53 = vld [vmem:[%s8673_s17 + $0x58] sm:$0xff]  ;;  %v8730_v54 = vpack.c.bf16 %v3102_v48, %v3099_v47  ;;  %v3105_v56 = vld [vmem:[%s8673_s17 + $0x60] sm:$0xff] }
  0x1d   : > { %6569 = vmatprep.mubr.msk.f32.mxu1 %vm8425_vm0, %v9753_v0  ;;  %7248 = vmatprep.subr.bf16.mxu1 %v9755_v1  ;;  %v8733_v55 = vpack.c.bf16 %v3109_v51, %v3106_v49  ;;  %v3108_v57 = vld [vmem:[%s8673_s17 + $0x78] sm:$0xff]  ;;  %v8739_v59 = vpack.c.bf16 %v3104_v53, %v3101_v52  ;;  %v3115_v60 = vld [vmem:[%s8673_s17 + $0xb0] sm:$0xff]  ;;  %v3110_v62 = vld [vmem:[%s8673_s17 + $0x88] sm:$0xff] }
  0x1e   : > { %6083 = vmatmul.mubr.msk.f32.vlgmr.msra.gmra.mrb[2].mxu0 %vm390_vm1, %v6082_v12  ;;  %v3112_v58 = vld [vmem:[%s8673_s17 + $0x98] sm:$0xff]  ;;  %v3107_v61 = vld [vmem:[%s8673_s17 + $0x70] sm:$0xff]  ;;  %v8749_v63 = vpack.c.bf16 %v3108_v57, %v3105_v56  ;;  %v3114_v4 = vld [vmem:[%s8673_s17 + $0xa8] sm:$0xff] }
  0x1f   : > { %7247 = vmatpush1.bf16.msra.mxu0 %v8495_v9  ;;  %6570 = vmatmul.mubr.msk.f32.vlgmr.msra.gmra.mrb[2].mxu1 %vm390_vm1, %v6082_v12  ;;  %v8752_v2 = vpack.c.bf16 %v3115_v60, %v3112_v58  ;;  %v3111_v3 = vld [vmem:[%s8673_s17 + $0x90] sm:$0xff]  ;;  %v8758_v6 = vpack.c.bf16 %v3110_v62, %v3107_v61  ;;  %v3121_v7 = vld [vmem:[%s8673_s17 + $0xe0] sm:$0xff]  ;;  %v3122_v18 = vld [vmem:[%s8673_s17 + $0xe8] sm:$0xff] }
  0x20   : > { %793 = vmatprep.mubr.f32.mxu0 %v9753_v0  ;;  %7250 = vmatpush3.bf16.msra.mxu1 %v8497_v10  ;;  %v3113_v8 = vld [vmem:[%s8673_s17 + $0xa0] sm:$0xff]  ;;  %v3119_v17 = vld [vmem:[%s8673_s17 + $0xd0] sm:$0xff]  ;;  %v3130_v23 = vld [vmem:[%s8673_s17 + $0x128] sm:$0xff] }
  0x21   : > { %7252 = vmatprep.subr.bf16.mxu0 %v8490_v5  ;;  %6576 = vmatprep.mubr.msk.f32.mxu1 %vm8425_vm0, %v9753_v0  ;;  %v3117_v12 = vld [vmem:[%s8673_s17 + $0xc0] sm:$0xff]  ;;  %v3123_v21 = vld [vmem:[%s8673_s17 + $0xf0] sm:$0xff]  ;;  %v8790_v24 = vpack.c.bf16 %v3122_v18, %v3119_v17  ;;  %v3138_v41 = vld [vmem:[%s8673_s17 + $0x168] sm:$0xff] }
  0x22   : > { %6086 = vmatmul.mubr.msk.f32.vlgmr.msra.gmra.mrb[4].mxu0 %vm390_vm1, %v6085_v13  ;;  %7255 = vmatprep.subr.bf16.mxu1 %v9755_v1  ;;  %v3139_v34 = vld [vmem:[%s8673_s17 + $0x170] sm:$0xff]  ;;  %v6134_v42 = vld [vmem:[%s8673_s17 + $0x188] sm:$0xff]  ;;  %v3137_v47 = vld [vmem:[%s8673_s17 + $0x160] sm:$0xff] }
  0x23   : > { %7254 = vmatpush1.bf16.msra.mxu0 %v8495_v9  ;;  %6577 = vmatmul.mubr.msk.f32.vlgmr.msra.gmra.mrb[4].mxu1 %vm390_vm1, %v6085_v13  ;;  %v3120_v13 = vld [vmem:[%s8673_s17 + $0xd8] sm:$0xff]  ;;  %9785 = vst [vmem:[#allocation4_spill] sm:$0xff] %v8790_v24  ;;  %v3131_v35 = vld [vmem:[%s8673_s17 + $0x130] sm:$0xff]  ;;  %v6133_v52 = vld [vmem:[%s8673_s17 + $0x180] sm:$0xff] }
  0x24   : > { %961 = vmatprep.mubr.f32.mxu0 %v9753_v0  ;;  %7257 = vmatpush3.bf16.msra.mxu1 %v8497_v10  ;;  %v3135_v39 = vld [vmem:[%s8673_s17 + $0x150] sm:$0xff]  ;;  %v3140_v48 = vld [vmem:[%s8673_s17 + $0x178] sm:$0xff]  ;;  %v6138_v61 = vld [vmem:[%s8673_s17 + $0x1a8] sm:$0xff] }
  0x25   : > { %7259 = vmatprep.subr.bf16.mxu0 %v8490_v5  ;;  %6583 = vmatprep.mubr.msk.f32.mxu1 %vm8425_vm0, %v9753_v0  ;;  %v8830_v49 = vpack.c.bf16 %v3138_v41, %v3135_v39  ;;  %v6136_v53 = vld [vmem:[%s8673_s17 + $0x198] sm:$0xff]  ;;  %v8846_v57 = vpack.c.bf16 %v3140_v48, %v3137_v47  ;;  %v6143_v58 = vld [vmem:[%s8673_s17 + $0x1d0] sm:$0xff]  ;;  %v8854_v62 = vld [vmem:[%s8838_s27] sm:$0x3] }
  0x26   : > { %6089 = vmatmul.mubr.msk.f32.vlgmr.msra.gmra.mrb[6].mxu0 %vm390_vm1, %v6088_v14  ;;  %7262 = vmatprep.subr.bf16.mxu1 %v9755_v1  ;;  %v6140_v56 = vld [vmem:[%s8673_s17 + $0x1b8] sm:$0xff]  ;;  %v6135_v60 = vld [vmem:[%s8673_s17 + $0x190] sm:$0xff]  ;;  %v6145_v18 = vld [vmem:[%s8673_s17 + $0x1e0] sm:$0xff] }
  0x27   : > { %7261 = vmatpush1.bf16.msra.mxu0 %v8495_v9  ;;  %6584 = vmatmul.mubr.msk.f32.vlgmr.msra.gmra.mrb[6].mxu1 %vm390_vm1, %v6088_v14  ;;  %v3124_v14 = vld [vmem:[%s8673_s17 + $0xf8] sm:$0xff]  ;;  %9792 = vst [vmem:[#allocation11_spill] sm:$0xff] %v8830_v49  ;;  %9794 = vst [vmem:[#allocation13_spill] sm:$0xff] %v8846_v57  ;;  %v6161_v39 = vld [vmem:[%s8673_s17 + $0x260] sm:$0xff] }
  0x28   : > { %1129 = vmatprep.mubr.f32.mxu0 %v9753_v0  ;;  %7264 = vmatpush3.bf16.msra.mxu1 %v8497_v10  ;;  %v6153_v41 = vld [vmem:[%s8673_s17 + $0x220] sm:$0xff] }
  0x29   : > { %7266 = vmatprep.subr.bf16.mxu0 %v8490_v5  ;;  %6590 = vmatprep.mubr.msk.f32.mxu1 %vm8425_vm0, %v9753_v0  ;;  %v6157_v48 = vld [vmem:[%s8673_s17 + $0x240] sm:$0xff] }
  0x2a   : > { %6092 = vmatmul.mubr.msk.f32.vlgmr.msra.gmra.mrb[8].mxu0 %vm390_vm1, %v6091_v15  ;;  %7269 = vmatprep.subr.bf16.mxu1 %v9755_v1 }
  0x2b   : > { %7268 = vmatpush1.bf16.msra.mxu0 %v8495_v9  ;;  %6591 = vmatmul.mubr.msk.f32.vlgmr.msra.gmra.mrb[8].mxu1 %vm390_vm1, %v6091_v15 }
  0x2c   : > { %1297 = vmatprep.mubr.f32.mxu0 %v9753_v0  ;;  %7271 = vmatpush3.bf16.msra.mxu1 %v8497_v10 }
  0x2d   : > { %7273 = vmatprep.subr.bf16.mxu0 %v8490_v5  ;;  %6597 = vmatprep.mubr.msk.f32.mxu1 %vm8425_vm0, %v9753_v0 }
  0x2e   : > { %6095 = vmatmul.mubr.msk.f32.vlgmr.msra.gmra.mrb[10].mxu0 %vm390_vm1, %v6094_v16  ;;  %7276 = vmatprep.subr.bf16.mxu1 %v9755_v1 }
  0x2f   : > { %7275 = vmatpush1.bf16.msra.mxu0 %v8495_v9  ;;  %6598 = vmatmul.mubr.msk.f32.vlgmr.msra.gmra.mrb[10].mxu1 %vm390_vm1, %v6094_v16  ;;  %v3127_v16 = vld [vmem:[%s8673_s17 + $0x110] sm:$0xff] }
  0x30   : > { %1465 = vmatprep.mubr.f32.mxu0 %v9753_v0  ;;  %7278 = vmatpush3.bf16.msra.mxu1 %v8497_v10  ;;  %v8784_v20 = vpack.c.bf16 %v3127_v16, %v3124_v14  ;;  %v6144_v14 = vld [vmem:[%s8673_s17 + $0x1d8] sm:$0xff] }
  0x31   : > { %7280 = vmatprep.subr.bf16.mxu0 %v8490_v5  ;;  %6604 = vmatprep.mubr.msk.f32.mxu1 %vm8425_vm0, %v9753_v0  ;;  %v3118_v5 = vld [vmem:[%s8673_s17 + $0xc8] sm:$0xff] }
  0x32   : > { %6098 = vmatmul.mubr.msk.f32.vlgmr.msra.gmra.mrb[12].mxu0 %vm390_vm1, %v6097_v19  ;;  %7283 = vmatprep.subr.bf16.mxu1 %v9755_v1  ;;  %v8768_v11 = vpack.c.bf16 %v3121_v7, %v3118_v5  ;;  %9784 = vst [vmem:[#allocation3_spill] sm:$0xff] %v8784_v20  ;;  %v6139_v5 = vld [vmem:[%s8673_s17 + $0x1b0] sm:$0xff]  ;;  %v6142_v7 = vld [vmem:[%s8673_s17 + $0x1c8] sm:$0xff] }
  0x33   : > { %7282 = vmatpush1.bf16.msra.mxu0 %v8495_v9  ;;  %6605 = vmatmul.mubr.msk.f32.vlgmr.msra.gmra.mrb[12].mxu1 %vm390_vm1, %v6097_v19  ;;  %v3116_v9 = vld [vmem:[%s8673_s17 + $0xb8] sm:$0xff]  ;;  %v8781_v19 = vpack.c.bf16 %v3120_v13, %v3117_v12  ;;  %v6149_v12 = vld [vmem:[%s8673_s17 + $0x200] sm:$0xff]  ;;  %v8873_v16 = vpack.c.bf16 %v6142_v7, %v6139_v5 }
  0x34   : > { %1633 = vmatprep.mubr.f32.mxu0 %v9753_v0  ;;  %7285 = vmatpush3.bf16.msra.mxu1 %v8497_v10  ;;  %v8765_v10 = vpack.c.bf16 %v3114_v4, %v3111_v3  ;;  %v8774_v15 = vpack.c.bf16 %v3116_v9, %v3113_v8  ;;  %v8856_v3 = vpack.c.bf16 %v6136_v53, %v6133_v52  ;;  %v6146_v8 = vld [vmem:[%s8673_s17 + $0x1e8] sm:$0xff]  ;;  %v6141_v13 = vld [vmem:[%s8673_s17 + $0x1c0] sm:$0xff]  ;;  %v6160_v52 = vld [vmem:[%s8673_s17 + $0x258] sm:$0xff] }
  0x35   : > { %7287 = vmatprep.subr.bf16.mxu0 %v8582_v22  ;;  %6611 = vmatprep.mubr.msk.f32.mxu1 %vm8425_vm0, %v9753_v0  ;;  %v8859_v4 = vpack.c.bf16 %v6143_v58, %v6140_v56  ;;  %v8865_v9 = vpack.c.bf16 %v6138_v61, %v6135_v60  ;;  %v8877_v17 = vpack.c.bf16 %v6149_v12, %v6146_v8  ;;  %v6164_v53 = vld [vmem:[%s8673_s17 + $0x278] sm:$0xff]  ;;  %v6167_v58 = vld [vmem:[%s8673_s17 + $0x290] sm:$0xff]  ;;  %v6162_v61 = vld [vmem:[%s8673_s17 + $0x268] sm:$0xff] }
  0x36   : > { %6101 = vmatmul.mubr.msk.f32.vlgmr.msra.gmra.mrb[14].mxu0 %vm390_vm1, %v6100_v25  ;;  %7290 = vmatprep.subr.bf16.mxu1 %v9755_v1  ;;  %v6159_v60 = vld [vmem:[%s8673_s17 + $0x250] sm:$0xff]  ;;  %v8925_v5 = vpack.c.bf16 %v6160_v52, %v6157_v48  ;;  %v8928_v7 = vpack.c.bf16 %v6167_v58, %v6164_v53  ;;  %v6166_v12 = vld [vmem:[%s8673_s17 + $0x288] sm:$0xff] }
  0x37   : > { %7289 = vmatpush1.bf16.msra.mxu0 %v8593_v26  ;;  %6612 = vmatmul.mubr.msk.f32.vlgmr.msra.gmra.mrb[14].mxu1 %vm390_vm1, %v6100_v25  ;;  %v3133_v25 = vld [vmem:[%s8673_s17 + $0x140] sm:$0xff]  ;;  %v6163_v8 = vld [vmem:[%s8673_s17 + $0x270] sm:$0xff]  ;;  %v6178_v58 = vld [vmem:[%s8673_s17 + $0x2e8] sm:$0xff] }
  0x38   : > { %1825 = vmatprep.mubr.f32.mxu0 %v9753_v0  ;;  %7292 = vmatpush3.bf16.msra.mxu1 %v8597_v27  ;;  %v6175_v53 = vld [vmem:[%s8673_s17 + $0x2d0] sm:$0xff] }
  0x39   : > { %7294 = vmatprep.subr.bf16.mxu0 %v8582_v22  ;;  %6618 = vmatprep.mubr.msk.f32.mxu1 %vm8425_vm0, %v9753_v0 }
  0x3a   : > { %6110 = vmatmul.mubr.msk.f32.vlgmr.msra.gmra.mrb[16].mxu0 %vm390_vm1, %v1757_v28  ;;  %7297 = vmatprep.subr.bf16.mxu1 %v9755_v1 }
  0x3b   : > { %7296 = vmatpush1.bf16.msra.mxu0 %v8593_v26  ;;  %6619 = vmatmul.mubr.msk.f32.vlgmr.msra.gmra.mrb[16].mxu1 %vm390_vm1, %v1757_v28 }
  0x3c   : > { %1992 = vmatprep.mubr.f32.mxu0 %v9753_v0  ;;  %7299 = vmatpush3.bf16.msra.mxu1 %v8597_v27 }
  0x3d   : > { %7301 = vmatprep.subr.bf16.mxu0 %v8582_v22  ;;  %6625 = vmatprep.mubr.msk.f32.mxu1 %vm8425_vm0, %v9753_v0 }
  0x3e   : > { %6113 = vmatmul.mubr.msk.f32.vlgmr.msra.gmra.mrb[18].mxu0 %vm390_vm1, %v6112_v29  ;;  %7304 = vmatprep.subr.bf16.mxu1 %v9755_v1 }
  0x3f   : > { %7303 = vmatpush1.bf16.msra.mxu0 %v8593_v26  ;;  %6626 = vmatmul.mubr.msk.f32.vlgmr.msra.gmra.mrb[18].mxu1 %vm390_vm1, %v6112_v29  ;;  %v8800_v29 = vpack.c.bf16 %v3133_v25, %v3130_v23  ;;  %v8883_v23 = vpack.c.bf16 %v6144_v14, %v6141_v13  ;;  %v6155_v25 = vld [vmem:[%s8673_s17 + $0x230] sm:$0xff]  ;;  %v6170_v13 = vld [vmem:[%s8673_s17 + $0x2a8] sm:$0xff]  ;;  %v8934_v14 = vpack.c.bf16 %v6162_v61, %v6159_v60  ;;  %v6177_v61 = vld [vmem:[%s8673_s17 + $0x2e0] sm:$0xff] }
  0x40   : > { %2159 = vmatprep.mubr.f32.mxu0 %v9753_v0  ;;  %7306 = vmatpush3.bf16.msra.mxu1 %v8597_v27 }
  0x41   : > { %7308 = vmatprep.subr.bf16.mxu0 %v8582_v22  ;;  %6632 = vmatprep.mubr.msk.f32.mxu1 %vm8425_vm0, %v9753_v0  ;;  %9787 = vst [vmem:[#allocation6_spill] sm:$0xff] %v8800_v29 }
  0x42   : > { %6116 = vmatmul.mubr.msk.f32.vlgmr.msra.gmra.mrb[20].mxu0 %vm390_vm1, %v6115_v30  ;;  %7311 = vmatprep.subr.bf16.mxu1 %v9755_v1 }
  0x43   : > { %7310 = vmatpush1.bf16.msra.mxu0 %v8593_v26  ;;  %6633 = vmatmul.mubr.msk.f32.vlgmr.msra.gmra.mrb[20].mxu1 %vm390_vm1, %v6115_v30  ;;  %v3129_v30 = vld [vmem:[%s8673_s17 + $0x120] sm:$0xff] }
  0x44   : > { %2326 = vmatprep.mubr.f32.mxu0 %v9753_v0  ;;  %7313 = vmatpush3.bf16.msra.mxu1 %v8597_v27 }
  0x45   : > { %7315 = vmatprep.subr.bf16.mxu0 %v8582_v22  ;;  %6639 = vmatprep.mubr.msk.f32.mxu1 %vm8425_vm0, %v9753_v0 }
  0x46   : > { %6119 = vmatmul.mubr.msk.f32.vlgmr.msra.gmra.mrb[22].mxu0 %vm390_vm1, %v6118_v31  ;;  %7318 = vmatprep.subr.bf16.mxu1 %v9755_v1 }
  0x47   : > { %7317 = vmatpush1.bf16.msra.mxu0 %v8593_v26  ;;  %6640 = vmatmul.mubr.msk.f32.vlgmr.msra.gmra.mrb[22].mxu1 %vm390_vm1, %v6118_v31  ;;  %v3132_v31 = vld [vmem:[%s8673_s17 + $0x138] sm:$0xff] }
  0x48   : > { %2493 = vmatprep.mubr.f32.mxu0 %v9753_v0  ;;  %7320 = vmatpush3.bf16.msra.mxu1 %v8597_v27  ;;  %v8813_v37 = vpack.c.bf16 %v3132_v31, %v3129_v30 }
  0x49   : > { %7322 = vmatprep.subr.bf16.mxu0 %v8582_v22  ;;  %6646 = vmatprep.mubr.msk.f32.mxu1 %vm8425_vm0, %v9753_v0 }
  0x4a   : > { %6122 = vmatmul.mubr.msk.f32.vlgmr.msra.gmra.mrb[24].mxu0 %vm390_vm1, %v6121_v32  ;;  %7325 = vmatprep.subr.bf16.mxu1 %v9755_v1  ;;  %9789 = vst [vmem:[#allocation8_spill] sm:$0xff] %v8813_v37 }
  0x4b   : > { %7324 = vmatpush1.bf16.msra.mxu0 %v8593_v26  ;;  %6647 = vmatmul.mubr.msk.f32.vlgmr.msra.gmra.mrb[24].mxu1 %vm390_vm1, %v6121_v32  ;;  %v3136_v32 = vld [vmem:[%s8673_s17 + $0x158] sm:$0xff] }
  0x4c   : > { %2660 = vmatprep.mubr.f32.mxu0 %v9753_v0  ;;  %7327 = vmatpush3.bf16.msra.mxu1 %v8597_v27  ;;  %v8816_v38 = vpack.c.bf16 %v3139_v34, %v3136_v32  ;;  %v6151_v32 = vld [vmem:[%s8673_s17 + $0x210] sm:$0xff]  ;;  %v6154_v34 = vld [vmem:[%s8673_s17 + $0x228] sm:$0xff] }
  0x4d   : > { %7329 = vmatprep.subr.bf16.mxu0 %v8582_v22  ;;  %6653 = vmatprep.mubr.msk.f32.mxu1 %vm8425_vm0, %v9753_v0 }
  0x4e   : > { %6125 = vmatmul.mubr.msk.f32.vlgmr.msra.gmra.mrb[26].mxu0 %vm390_vm1, %v6124_v33  ;;  %7332 = vmatprep.subr.bf16.mxu1 %v9755_v1  ;;  %9790 = vst [vmem:[#allocation9_spill] sm:$0xff] %v8816_v38 }
  0x4f   : > { %7331 = vmatpush1.bf16.msra.mxu0 %v8593_v26  ;;  %6654 = vmatmul.mubr.msk.f32.vlgmr.msra.gmra.mrb[26].mxu1 %vm390_vm1, %v6124_v33 }
  0x50   : > { %2827 = vmatprep.mubr.f32.mxu0 %v9753_v0  ;;  %7334 = vmatpush3.bf16.msra.mxu1 %v8597_v27 }
  0x51   : > { %7336 = vmatprep.subr.bf16.mxu0 %v8582_v22  ;;  %6660 = vmatprep.mubr.msk.f32.mxu1 %vm8425_vm0, %v9753_v0  ;;  %v3126_v22 = vld [vmem:[%s8673_s17 + $0x108] sm:$0xff] }
  0x52   : > { %6128 = vmatmul.mubr.msk.f32.vlgmr.msra.gmra.mrb[28].mxu0 %vm390_vm1, %v6127_v36  ;;  %7339 = vmatprep.subr.bf16.mxu1 %v9755_v1  ;;  %v8797_v28 = vpack.c.bf16 %v3126_v22, %v3123_v21  ;;  %v6148_v21 = vld [vmem:[%s8673_s17 + $0x1f8] sm:$0xff] }
  0x53   : > { %7338 = vmatpush1.bf16.msra.mxu0 %v8593_v26  ;;  %6661 = vmatmul.mubr.msk.f32.vlgmr.msra.gmra.mrb[28].mxu1 %vm390_vm1, %v6127_v36  ;;  %v3125_v26 = vld [vmem:[%s8673_s17 + $0x100] sm:$0xff]  ;;  %v3134_v36 = vld [vmem:[%s8673_s17 + $0x148] sm:$0xff]  ;;  %v6152_v22 = vld [vmem:[%s8673_s17 + $0x218] sm:$0xff]  ;;  %v8893_v30 = vpack.c.bf16 %v6148_v21, %v6145_v18 }
  0x54   : > { %2994 = vmatprep.mubr.f32.mxu0 %v9753_v0  ;;  %7341 = vmatpush3.bf16.msra.mxu1 %v8597_v27  ;;  %v3128_v27 = vld [vmem:[%s8673_s17 + $0x118] sm:$0xff]  ;;  %9786 = vst [vmem:[#allocation5_spill] sm:$0xff] %v8797_v28  ;;  %v8822_v43 = vpack.c.bf16 %v3134_v36, %v3131_v35  ;;  %v8896_v31 = vpack.c.bf16 %v6155_v25, %v6152_v22  ;;  %v6158_v35 = vld [vmem:[%s8673_s17 + $0x248] sm:$0xff]  ;;  %v6173_v18 = vld [vmem:[%s8673_s17 + $0x2c0] sm:$0xff] }
  0x55   : > { %7343 = vmatprep.subr.bf16.mxu0 %v8697_v40  ;;  %6667 = vmatprep.mubr.msk.f32.mxu1 %vm8425_vm0, %v9753_v0  ;;  %v8806_v33 = vpack.c.bf16 %v3128_v27, %v3125_v26  ;;  %v6147_v26 = vld [vmem:[%s8673_s17 + $0x1f0] sm:$0xff]  ;;  %v6150_v27 = vld [vmem:[%s8673_s17 + $0x208] sm:$0xff]  ;;  %v8912_v47 = vpack.c.bf16 %v6161_v39, %v6158_v35  ;;  %v6165_v21 = vld [vmem:[%s8673_s17 + $0x280] sm:$0xff]  ;;  %v8941_v25 = vpack.c.bf16 %v6166_v12, %v6163_v8 }
  0x56   : > { %6131 = vmatmul.mubr.msk.f32.vlgmr.msra.gmra.mrb[30].mxu0 %vm390_vm1, %v6130_v44  ;;  %7374 = vmatprep.subr.bf16.mxu1 %v9755_v1  ;;  %9791 = vst [vmem:[#allocation10_spill] sm:$0xff] %v8822_v43  ;;  %v8902_v36 = vpack.c.bf16 %v6150_v27, %v6147_v26  ;;  %v6168_v22 = vld [vmem:[%s8673_s17 + $0x298] sm:$0xff]  ;;  %v8944_v26 = vpack.c.bf16 %v6173_v18, %v6170_v13  ;;  %v6169_v27 = vld [vmem:[%s8673_s17 + $0x2a0] sm:$0xff]  ;;  %v6179_v39 = vld [vmem:[%s8673_s17 + $0x2f0] sm:$0xff] }
  0x57   : > { %7345 = vmatpush1.bf16.msra.mxu0 %v8709_v45  ;;  %6668 = vmatmul.mubr.msk.f32.vlgmr.msra.gmra.mrb[30].mxu1 %vm390_vm1, %v6130_v44  ;;  %9788 = vst [vmem:[#allocation7_spill] sm:$0xff] %v8806_v33  ;;  %v6137_v44 = vld [vmem:[%s8673_s17 + $0x1a0] sm:$0xff]  ;;  %v8950_v35 = vpack.c.bf16 %v6168_v22, %v6165_v21  ;;  %v6180_v8 = vld [vmem:[%s8673_s17 + $0x2f8] sm:$0xff]  ;;  %v8971_v12 = vpack.c.bf16 %v6178_v58, %v6175_v53  ;;  %v374_v21 = vlaneseq }
  0x58   : > { %7347 = vmatprep.subr.bf16.mxu0 %v8713_v46  ;;  %7376 = vmatpush3.bf16.msra.mxu1 %v8718_v50  ;;  %v8840_v51 = vpack.c.bf16 %v6137_v44, %v6134_v42  ;;  %v6156_v42 = vld [vmem:[%s8673_s17 + $0x238] sm:$0xff]  ;;  %v8909_v44 = vpack.c.bf16 %v6154_v34, %v6151_v32  ;;  %v8975_v13 = vpack.c.bf16 %v6180_v8, %v6177_v61  ;;  %v8980_v18 = vld [vmem:[%s8838_s27 + $0x2] sm:$0x3] }
  0x59   : > { %7377 = vmatprep.subr.bf16.mxu1 %v9755_v1  ;;  %3272 = vmatprep.mubr.f32.mxu0 %v9753_v0  ;;  %v8918_v56 = vpack.c.bf16 %v6156_v42, %v6153_v41  ;;  %v6172_v32 = vld [vmem:[%s8673_s17 + $0x2b8] sm:$0xff]  ;;  %v6171_v41 = vld [vmem:[%s8673_s17 + $0x2b0] sm:$0xff]  ;;  %v6174_v42 = vld [vmem:[%s8673_s17 + $0x2c8] sm:$0xff]  ;;  %v9023_v22 = vshrl.u32 %v374_v21, 7 }
  0x5a   : > { %6702 = vmatprep.mubr.msk.f32.mxu1 %vm8425_vm0, %v9753_v0  ;;  %9793 = vst [vmem:[#allocation12_spill] sm:$0xff] %v8840_v51  ;;  %v6176_v34 = vld [vmem:[%s8673_s17 + $0x2d8] sm:$0xff]  ;;  %v8957_v48 = vpack.c.bf16 %v6172_v32, %v6169_v27  ;;  %v8965_v60 = vpack.c.bf16 %v6174_v42, %v6171_v41  ;;  %v8426_v27 = vmov 1983009808   ;;  %v372_v41 = vld [vmem:[%s9028_s8] sm:$0x7] }
  0x5b   : > { %7349 = vmatpush1.bf16.msra.mxu0 %v8730_v54  ;;  %v8960_v52 = vpack.c.bf16 %v6179_v39, %v6176_v34  ;;  %v540_v32 = vunpack.c.l.s4 %v8426_v27  ;;  %v9759_v34 = vsub.s32 0, %v9023_v22  ;;  %v9764_v39 = vsub.s32 2, %v9023_v22 }
  0x5c   : > { %7351 = vmatprep.subr.bf16.mxu0 %v8733_v55  ;;  %7379 = vmatpush3.bf16.msra.mxu1 %v8739_v59  ;;  %v9767_v42 = vsub.s32 1, %v9023_v22 }
  0x5d   : > { %7380 = vmatprep.subr.bf16.mxu1 %v9755_v1  ;;  %v541_v53 = vunpack.c.0.s8 %v540_v32  ;;  %v9036_v58 = vrot.slane %v372_v41, %v9759_v34  ;;  %v9040_v61 = vrot.slane %v372_v41, %v9764_v39 }
  0x5e   : > { %v9044_v8 = vrot.slane %v372_v41, %v9767_v42 }
  0x5f   : > { %7353 = vmatpush1.bf16.msra.mxu0 %v8749_v63  ;;  %v9047_v27 = vsub.s32 %v541_v53, %v9023_v22 }
  0x60   : > { %7355 = vmatprep.subr.bf16.mxu0 %v8752_v2  ;;  %7382 = vmatpush3.bf16.msra.mxu1 %v8758_v6 }
  0x61   : > { %7383 = vmatprep.subr.bf16.mxu1 %v9755_v1 }
  0x63   : > { %7357 = vmatpush1.bf16.msra.mxu0 %v8765_v10 }
  0x64   : > { %7359 = vmatprep.subr.bf16.mxu0 %v8768_v11  ;;  %7385 = vmatpush3.bf16.msra.mxu1 %v8774_v15 }
  0x65   : > { %7386 = vmatprep.subr.bf16.mxu1 %v9755_v1 }
  0x67   : > { %7361 = vmatpush1.bf16.msra.mxu0 %v8781_v19 }
  0x68   : > { %7363 = vmatprep.subr.bf16.mxu0 %v8784_v20  ;;  %7388 = vmatpush3.bf16.msra.mxu1 %v8790_v24 }
  0x69   : > { %7389 = vmatprep.subr.bf16.mxu1 %v9755_v1 }
  0x6b   : > { %7365 = vmatpush1.bf16.msra.mxu0 %v8797_v28 }
  0x6c   : > { %7367 = vmatprep.subr.bf16.mxu0 %v8800_v29  ;;  %7391 = vmatpush3.bf16.msra.mxu1 %v8806_v33 }
  0x6d   : > { %7392 = vmatprep.subr.bf16.mxu1 %v9755_v1 }
  0x6f   : > { %7369 = vmatpush1.bf16.msra.mxu0 %v8813_v37 }
  0x70   : > { %7371 = vmatprep.subr.bf16.mxu0 %v8816_v38  ;;  %7394 = vmatpush3.bf16.msra.mxu1 %v8822_v43 }
  0x71   : > { %7395 = vmatprep.subr.bf16.mxu1 %v9755_v1 }
  0x73   : > { %7373 = vmatpush1.bf16.msra.mxu0 %v8830_v49 }
  0x74   : > { %7399 = vmatprep.subr.bf16.mxu0 %v8840_v51  ;;  %7397 = vmatpush3.bf16.msra.mxu1 %v8846_v57 }
  0x75   : > { %7430 = vmatprep.subr.bf16.mxu1 %v9755_v1 }
  0x76   : > { %3273 = vmatmul.mubr.f32.vlgmr.msra.gmra.mrb[32].mxu0 %v8854_v62 }
  0x77   : > { %7401 = vmatpush1.bf16.msra.mxu0 %v8856_v3  ;;  %6703 = vmatmul.mubr.f32.vlgmr.msra.gmra.mrb[32].mxu1 %v8854_v62 }
  0x78   : > { %7403 = vmatprep.subr.bf16.mxu0 %v8859_v4  ;;  %7432 = vmatpush3.bf16.msra.mxu1 %v8865_v9 }
  0x79   : > { %7433 = vmatprep.subr.bf16.mxu1 %v9755_v1  ;;  %3413 = vmatprep.mubr.f32.mxu0 %v9753_v0 }
  0x7a   : > { %6737 = vmatprep.mubr.msk.f32.mxu1 %vm8425_vm0, %v9753_v0 }
  0x7b   : > { %7405 = vmatpush1.bf16.msra.mxu0 %v8873_v16 }
  0x7c   : > { %7407 = vmatprep.subr.bf16.mxu0 %v8877_v17  ;;  %7435 = vmatpush3.bf16.msra.mxu1 %v8883_v23 }
  0x7d   : > { %7436 = vmatprep.subr.bf16.mxu1 %v9755_v1 }
  0x7f   : > { %7409 = vmatpush1.bf16.msra.mxu0 %v8893_v30 }
  0x80   : > { %7411 = vmatprep.subr.bf16.mxu0 %v8896_v31  ;;  %7438 = vmatpush3.bf16.msra.mxu1 %v8902_v36 }
  0x81   : > { %7439 = vmatprep.subr.bf16.mxu1 %v9755_v1 }
  0x83   : > { %7413 = vmatpush1.bf16.msra.mxu0 %v8909_v44 }
  0x84   : > { %7415 = vmatprep.subr.bf16.mxu0 %v8912_v47  ;;  %7441 = vmatpush3.bf16.msra.mxu1 %v8918_v56 }
  0x85   : > { %7442 = vmatprep.subr.bf16.mxu1 %v9755_v1 }
  0x87   : > { %7417 = vmatpush1.bf16.msra.mxu0 %v8925_v5 }
  0x88   : > { %7419 = vmatprep.subr.bf16.mxu0 %v8928_v7  ;;  %7444 = vmatpush3.bf16.msra.mxu1 %v8934_v14 }
  0x89   : > { %7445 = vmatprep.subr.bf16.mxu1 %v9755_v1 }
  0x8b   : > { %7421 = vmatpush1.bf16.msra.mxu0 %v8941_v25 }
  0x8c   : > { %7423 = vmatprep.subr.bf16.mxu0 %v8944_v26  ;;  %7447 = vmatpush3.bf16.msra.mxu1 %v8950_v35 }
  0x8d   : > { %7448 = vmatprep.subr.bf16.mxu1 %v9755_v1 }
  0x8f   : > { %7425 = vmatpush1.bf16.msra.mxu0 %v8957_v48 }
  0x90   : > { %7427 = vmatprep.subr.bf16.mxu0 %v8960_v52  ;;  %7450 = vmatpush3.bf16.msra.mxu1 %v8965_v60 }
  0x91   : > { %7451 = vmatprep.subr.bf16.mxu1 %v9755_v1 }
  0x93   : > { %7429 = vmatpush1.bf16.msra.mxu0 %v8971_v12 }
  0x94   : > { %7453 = vmatpush3.bf16.msra.mxu1 %v8975_v13  ;;  %7455 = vmatprep.subr.bf16.mxu0 %v8697_v40 }
  0x95   : > { %7486 = vmatprep.subr.bf16.mxu1 %v9755_v1 }
  0x96   : > { %3414 = vmatmul.mubr.f32.vlgmr.msra.gmra.mrb[34].mxu0 %v8980_v18 }
  0x97   : > { %6738 = vmatmul.mubr.f32.vlgmr.msra.gmra.mrb[34].mxu1 %v8980_v18  ;;  %7457 = vmatpush1.bf16.msra.mxu0 %v8709_v45 }
  0x98   : > { %7488 = vmatpush3.bf16.msra.mxu1 %v8718_v50  ;;  %7459 = vmatprep.subr.bf16.mxu0 %v8713_v46 }
  0x99   : > { %7489 = vmatprep.subr.bf16.mxu1 %v9755_v1  ;;  %3611 = vmatprep.mubr.f32.mxu0 %v9753_v0 }
  0x9a   : > { %6772 = vmatprep.mubr.msk.f32.mxu1 %vm8425_vm0, %v9753_v0 }
  0x9b   : > { %7461 = vmatpush1.bf16.msra.mxu0 %v8730_v54 }
  0x9c   : > { %7491 = vmatpush3.bf16.msra.mxu1 %v8739_v59  ;;  %7463 = vmatprep.subr.bf16.mxu0 %v8733_v55 }
  0x9d   : > { %7492 = vmatprep.subr.bf16.mxu1 %v9755_v1 }
  0x9f   : > { %7465 = vmatpush1.bf16.msra.mxu0 %v8749_v63 }
  0xa0   : > { %7494 = vmatpush3.bf16.msra.mxu1 %v8758_v6  ;;  %7467 = vmatprep.subr.bf16.mxu0 %v8752_v2 }
  0xa1   : > { %7495 = vmatprep.subr.bf16.mxu1 %v9755_v1 }
  0xa3   : > { %7469 = vmatpush1.bf16.msra.mxu0 %v8765_v10 }
  0xa4   : > { %7497 = vmatpush3.bf16.msra.mxu1 %v8774_v15  ;;  %7471 = vmatprep.subr.bf16.mxu0 %v8768_v11 }
  0xa5   : > { %7498 = vmatprep.subr.bf16.mxu1 %v9755_v1 }
  0xa7   : > { %7473 = vmatpush1.bf16.msra.mxu0 %v8781_v19 }
  0xa8   : > { %7500 = vmatpush3.bf16.msra.mxu1 %v8790_v24  ;;  %7475 = vmatprep.subr.bf16.mxu0 %v8784_v20 }
  0xa9   : > { %7501 = vmatprep.subr.bf16.mxu1 %v9755_v1 }
  0xab   : > { %7477 = vmatpush1.bf16.msra.mxu0 %v8797_v28 }
  0xac   : > { %7503 = vmatpush3.bf16.msra.mxu1 %v8806_v33  ;;  %7479 = vmatprep.subr.bf16.mxu0 %v8800_v29 }
  0xad   : > { %7504 = vmatprep.subr.bf16.mxu1 %v9755_v1 }
  0xaf   : > { %7481 = vmatpush1.bf16.msra.mxu0 %v8813_v37 }
  0xb0   : > { %7506 = vmatpush3.bf16.msra.mxu1 %v8822_v43  ;;  %7483 = vmatprep.subr.bf16.mxu0 %v8816_v38 }
  0xb1   : > { %7507 = vmatprep.subr.bf16.mxu1 %v9755_v1 }
  0xb3   : > { %7485 = vmatpush1.bf16.msra.mxu0 %v8830_v49 }
  0xb4   : > { %7509 = vmatpush3.bf16.msra.mxu1 %v8846_v57  ;;  %7511 = vmatprep.subr.bf16.mxu0 %v8840_v51 }
  0xb5   : > { %7542 = vmatprep.subr.bf16.mxu1 %v9755_v1 }
  0xed   : > { %v460_v21 = vpop.f32.mrb[0].mxu0  ;;  %v531_v0 = vpop.f32.mrb[0].mxu1 }
  0xee   : > { %v461_v1 = vadd.f32 %v460_v21, %v9036_v58  ;;  %v462_v32 = vpop.f32.mrb[1].mxu0  ;;  %v532_v51 = vadd.f32 %v531_v0, %v9040_v61  ;;  %v6564_v34 = vpop.f32.mrb[1].mxu1 }
  0xef   : > { %v463_v57 = vadd.f32 %v462_v32, %v9044_v8 }
  0xf0   : > { %v552_v39 = vrot.slane %v532_v51, %v9047_v27 }
  0xf1   : > { %v538_v49 = vcombine.low %v461_v1, %v463_v57  ;;  %v627_v38 = vpop.f32.mrb[2].mxu0 }
  0xf2   : > { %v628_v41 = vadd.f32 %v627_v38, %v9036_v58  ;;  %v629_v42 = vpop.f32.mrb[3].mxu0  ;;  %v698_v43 = vpop.f32.mrb[2].mxu1 }
  0xf3   : > { %v545_v53 = vrot.slane %v538_v49, %v9047_v27  ;;  %v630_v37 = vadd.f32 %v629_v42, %v9044_v8  ;;  %v699_v21 = vadd.f32 %v698_v43, %v9040_v61  ;;  %v6571_v29 = vpop.f32.mrb[3].mxu1 }
  0xf5   : > { %v553_v33 = vcombine.low %v545_v53, %v552_v39  ;;  %v705_v0 = vcombine.low %v628_v41, %v630_v37  ;;  %v719_v34 = vrot.slane %v699_v21, %v9047_v27  ;;  %v795_v32 = vpop.f32.mrb[4].mxu0 }
  0xf6   : > { %v796_v1 = vadd.f32 %v795_v32, %v9036_v58  ;;  %v797_v51 = vpop.f32.mrb[5].mxu0  ;;  %v866_v57 = vpop.f32.mrb[4].mxu1 }
  0xf7   : > { %555 = vst [vmem:[#allocation2] sm:$0x3f] %v553_v33  ;;  %v712_v38 = vrot.slane %v705_v0, %v9047_v27  ;;  %v798_v28 = vadd.f32 %v797_v51, %v9044_v8  ;;  %v867_v49 = vadd.f32 %v866_v57, %v9040_v61  ;;  %v6578_v42 = vpop.f32.mrb[5].mxu1 }
  0xf9   : > { %v720_v20 = vcombine.low %v712_v38, %v719_v34  ;;  %v873_v43 = vcombine.low %v796_v1, %v798_v28  ;;  %v887_v29 = vrot.slane %v867_v49, %v9047_v27  ;;  %v963_v37 = vpop.f32.mrb[6].mxu0 }
  0xfa   : > { %v964_v39 = vadd.f32 %v963_v37, %v9036_v58  ;;  %v965_v41 = vpop.f32.mrb[7].mxu0  ;;  %v1034_v53 = vpop.f32.mrb[6].mxu1 }
  0xfb   : > { %723 = vst [vmem:[#allocation2 + $0x6] sm:$0x3f] %v720_v20  ;;  %v880_v21 = vrot.slane %v873_v43, %v9047_v27  ;;  %v966_v33 = vadd.f32 %v965_v41, %v9044_v8  ;;  %v1035_v0 = vadd.f32 %v1034_v53, %v9040_v61  ;;  %v6585_v32 = vpop.f32.mrb[7].mxu1 }
  0xfd   : > { %v888_v51 = vcombine.low %v880_v21, %v887_v29  ;;  %v1041_v57 = vcombine.low %v964_v39, %v966_v33  ;;  %v1055_v34 = vrot.slane %v1035_v0, %v9047_v27  ;;  %v1131_v28 = vpop.f32.mrb[8].mxu0 }
  0xfe   : > { %v1132_v1 = vadd.f32 %v1131_v28, %v9036_v58  ;;  %v1133_v38 = vpop.f32.mrb[9].mxu0  ;;  %v1202_v49 = vpop.f32.mrb[8].mxu1 }
  0xff   : > { %891 = vst [vmem:[#allocation2 + $0xc] sm:$0x3f] %v888_v51  ;;  %v1048_v42 = vrot.slane %v1041_v57, %v9047_v27  ;;  %v1134_v20 = vadd.f32 %v1133_v38, %v9044_v8  ;;  %v1203_v43 = vadd.f32 %v1202_v49, %v9040_v61  ;;  %v6592_v37 = vpop.f32.mrb[9].mxu1 }
 0x101   : > { %v1056_v41 = vcombine.low %v1048_v42, %v1055_v34  ;;  %v1209_v53 = vcombine.low %v1132_v1, %v1134_v20  ;;  %v1223_v29 = vrot.slane %v1203_v43, %v9047_v27  ;;  %v1299_v39 = vpop.f32.mrb[10].mxu0 }
 0x102   : > { %v1300_v21 = vadd.f32 %v1299_v39, %v9036_v58  ;;  %v1301_v33 = vpop.f32.mrb[11].mxu0  ;;  %v1370_v0 = vpop.f32.mrb[10].mxu1 }
 0x103   : > { %1059 = vst [vmem:[#allocation2 + $0x12] sm:$0x3f] %v1056_v41  ;;  %v1216_v32 = vrot.slane %v1209_v53, %v9047_v27  ;;  %v1302_v51 = vadd.f32 %v1301_v33, %v9044_v8  ;;  %v1371_v57 = vadd.f32 %v1370_v0, %v9040_v61  ;;  %v6599_v28 = vpop.f32.mrb[11].mxu1  ;;  %v6109_v33 = vld [vmem:[%s9028_s8 + $0x3] sm:$0x7] }
 0x105   : > { %v1224_v38 = vcombine.low %v1216_v32, %v1223_v29  ;;  %v1377_v49 = vcombine.low %v1300_v21, %v1302_v51  ;;  %v1391_v34 = vrot.slane %v1371_v57, %v9047_v27  ;;  %v1467_v1 = vpop.f32.mrb[12].mxu0 }
 0x106   : > { %v1468_v42 = vadd.f32 %v1467_v1, %v9036_v58  ;;  %v1469_v20 = vpop.f32.mrb[13].mxu0  ;;  %v1538_v43 = vpop.f32.mrb[12].mxu1  ;;  %v9795_v1 = vsub.s32 0, %v9023_v22 }
 0x107   : > { %1227 = vst [vmem:[#allocation2 + $0x18] sm:$0x3f] %v1224_v38  ;;  %v1384_v37 = vrot.slane %v1377_v49, %v9047_v27  ;;  %v1470_v41 = vadd.f32 %v1469_v20, %v9044_v8  ;;  %v1539_v53 = vadd.f32 %v1538_v43, %v9040_v61  ;;  %v6606_v39 = vpop.f32.mrb[13].mxu1  ;;  %v9796_v49 = vsub.s32 1, %v9023_v22 }
 0x108   : > { %v9087_v38 = vrot.slane %v6109_v33, %v9795_v1 }
 0x109   : > { %v1392_v0 = vcombine.low %v1384_v37, %v1391_v34  ;;  %v1545_v28 = vcombine.low %v1468_v42, %v1470_v41  ;;  %v1559_v29 = vrot.slane %v1539_v53, %v9047_v27  ;;  %v1635_v21 = vpop.f32.mrb[14].mxu0  ;;  %v9091_v20 = vrot.slane %v6109_v33, %v9796_v49 }
 0x10a   : > { %v1636_v32 = vadd.f32 %v1635_v21, %v9036_v58  ;;  %v1637_v51 = vpop.f32.mrb[15].mxu0  ;;  %v1706_v57 = vpop.f32.mrb[14].mxu1  ;;  %v9797_v58 = vsub.s32 2, %v9023_v22 }
 0x10b   : > { %1395 = vst [vmem:[#allocation2 + $0x1e] sm:$0x3f] %v1392_v0  ;;  %v1552_v43 = vrot.slane %v1545_v28, %v9047_v27  ;;  %v1638_v34 = vadd.f32 %v1637_v51, %v9044_v8  ;;  %v1707_v42 = vadd.f32 %v1706_v57, %v9040_v61  ;;  %v6613_v37 = vpop.f32.mrb[15].mxu1 }
 0x10c   : > { %v9098_v41 = vrot.slane %v6109_v33, %v9797_v58 }
 0x10d   : > { %v1560_v53 = vcombine.low %v1552_v43, %v1559_v29  ;;  %v1713_v39 = vcombine.low %v1636_v32, %v1638_v34  ;;  %v1727_v21 = vrot.slane %v1707_v42, %v9047_v27  ;;  %v1827_v1 = vpop.f32.mrb[16].mxu0 }
 0x10e   : > { %v1828_v49 = vadd.f32 %v1827_v1, %v9087_v38  ;;  %v1829_v24 = vpop.f32.mrb[17].mxu0  ;;  %v1898_v0 = vpop.f32.mrb[16].mxu1 }
 0x10f   : > { %1563 = vst [vmem:[#allocation2 + $0x24] sm:$0x3f] %v1560_v53  ;;  %v1720_v28 = vrot.slane %v1713_v39, %v9047_v27  ;;  %v1830_v8 = vadd.f32 %v1829_v24, %v9091_v20  ;;  %v1899_v61 = vadd.f32 %v1898_v0, %v9098_v41  ;;  %v6620_v51 = vpop.f32.mrb[17].mxu1 }
 0x111   : > { %v1728_v22 = vcombine.low %v1720_v28, %v1727_v21  ;;  %v1905_v33 = vcombine.low %v1828_v49, %v1830_v8  ;;  %v1919_v29 = vrot.slane %v1899_v61, %v9047_v27  ;;  %v1994_v32 = vpop.f32.mrb[18].mxu0 }
 0x112   : > { %v1995_v57 = vadd.f32 %v1994_v32, %v9087_v38  ;;  %v1996_v43 = vpop.f32.mrb[19].mxu0  ;;  %v2065_v34 = vpop.f32.mrb[18].mxu1 }
 0x113   : > { %1731 = vst [vmem:[#allocation2 + $0x2a] sm:$0x3f] %v1728_v22  ;;  %v1912_v42 = vrot.slane %v1905_v33, %v9047_v27  ;;  %v1997_v37 = vadd.f32 %v1996_v43, %v9091_v20  ;;  %v2066_v58 = vadd.f32 %v2065_v34, %v9098_v41  ;;  %v6627_v24 = vpop.f32.mrb[19].mxu1 }
 0x115   : > { %v1920_v53 = vcombine.low %v1912_v42, %v1919_v29  ;;  %v2072_v39 = vcombine.low %v1995_v57, %v1997_v37  ;;  %v2086_v21 = vrot.slane %v2066_v58, %v9047_v27  ;;  %v2161_v1 = vpop.f32.mrb[20].mxu0 }
 0x116   : > { %v2162_v49 = vadd.f32 %v2161_v1, %v9087_v38  ;;  %v2163_v0 = vpop.f32.mrb[21].mxu0  ;;  %v2232_v28 = vpop.f32.mrb[20].mxu1 }
 0x117   : > { %1923 = vst [vmem:[#allocation2 + $0x30] sm:$0x3f] %v1920_v53  ;;  %v2079_v8 = vrot.slane %v2072_v39, %v9047_v27  ;;  %v2164_v61 = vadd.f32 %v2163_v0, %v9091_v20  ;;  %v2233_v51 = vadd.f32 %v2232_v28, %v9098_v41  ;;  %v6634_v22 = vpop.f32.mrb[21].mxu1 }
 0x119   : > { %v2087_v33 = vcombine.low %v2079_v8, %v2086_v21  ;;  %v2239_v32 = vcombine.low %v2162_v49, %v2164_v61  ;;  %v2253_v29 = vrot.slane %v2233_v51, %v9047_v27  ;;  %v2328_v57 = vpop.f32.mrb[22].mxu0 }
 0x11a   : > { %v2329_v43 = vadd.f32 %v2328_v57, %v9087_v38  ;;  %v2330_v34 = vpop.f32.mrb[23].mxu0  ;;  %v2399_v42 = vpop.f32.mrb[22].mxu1 }
 0x11b   : > { %2090 = vst [vmem:[#allocation2 + $0x36] sm:$0x3f] %v2087_v33  ;;  %v2246_v37 = vrot.slane %v2239_v32, %v9047_v27  ;;  %v2331_v58 = vadd.f32 %v2330_v34, %v9091_v20  ;;  %v2400_v24 = vadd.f32 %v2399_v42, %v9098_v41  ;;  %v6641_v53 = vpop.f32.mrb[23].mxu1 }
 0x11d   : > { %v2254_v39 = vcombine.low %v2246_v37, %v2253_v29  ;;  %v2406_v1 = vcombine.low %v2329_v43, %v2331_v58  ;;  %v2420_v21 = vrot.slane %v2400_v24, %v9047_v27  ;;  %v2495_v49 = vpop.f32.mrb[24].mxu0 }
 0x11e   : > { %v2496_v0 = vadd.f32 %v2495_v49, %v9087_v38  ;;  %v2497_v28 = vpop.f32.mrb[25].mxu0  ;;  %v2566_v8 = vpop.f32.mrb[24].mxu1 }
 0x11f   : > { %2257 = vst [vmem:[#allocation2 + $0x3c] sm:$0x3f] %v2254_v39  ;;  %v2413_v61 = vrot.slane %v2406_v1, %v9047_v27  ;;  %v2498_v51 = vadd.f32 %v2497_v28, %v9091_v20  ;;  %v2567_v22 = vadd.f32 %v2566_v8, %v9098_v41  ;;  %v6648_v33 = vpop.f32.mrb[25].mxu1 }
 0x121   : > { %v2421_v32 = vcombine.low %v2413_v61, %v2420_v21  ;;  %v2573_v57 = vcombine.low %v2496_v0, %v2498_v51  ;;  %v2587_v29 = vrot.slane %v2567_v22, %v9047_v27  ;;  %v2662_v43 = vpop.f32.mrb[26].mxu0 }
 0x122   : > { %v2663_v34 = vadd.f32 %v2662_v43, %v9087_v38  ;;  %v2664_v42 = vpop.f32.mrb[27].mxu0  ;;  %v2733_v37 = vpop.f32.mrb[26].mxu1 }
 0x123   : > { %2424 = vst [vmem:[#allocation2 + $0x42] sm:$0x3f] %v2421_v32  ;;  %v2580_v58 = vrot.slane %v2573_v57, %v9047_v27  ;;  %v2665_v24 = vadd.f32 %v2664_v42, %v9091_v20  ;;  %v2734_v53 = vadd.f32 %v2733_v37, %v9098_v41  ;;  %v6655_v39 = vpop.f32.mrb[27].mxu1 }
 0x125   : > { %v2588_v1 = vcombine.low %v2580_v58, %v2587_v29  ;;  %v2740_v49 = vcombine.low %v2663_v34, %v2665_v24  ;;  %v2754_v21 = vrot.slane %v2734_v53, %v9047_v27  ;;  %v2829_v0 = vpop.f32.mrb[28].mxu0 }
 0x126   : > { %v2830_v28 = vadd.f32 %v2829_v0, %v9087_v38  ;;  %v2831_v8 = vpop.f32.mrb[29].mxu0  ;;  %v2900_v61 = vpop.f32.mrb[28].mxu1 }
 0x127   : > { %2591 = vst [vmem:[#allocation2 + $0x48] sm:$0x3f] %v2588_v1  ;;  %v2747_v51 = vrot.slane %v2740_v49, %v9047_v27  ;;  %v2832_v22 = vadd.f32 %v2831_v8, %v9091_v20  ;;  %v2901_v33 = vadd.f32 %v2900_v61, %v9098_v41  ;;  %v6662_v32 = vpop.f32.mrb[29].mxu1  ;;  %v3490_v61 = vld [vmem:[#allocation2] sm:$0x3f] }
 0x129   : > { %v2755_v57 = vcombine.low %v2747_v51, %v2754_v21  ;;  %v2907_v43 = vcombine.low %v2830_v28, %v2832_v22  ;;  %v2921_v29 = vrot.slane %v2901_v33, %v9047_v27  ;;  %v2996_v34 = vpop.f32.mrb[30].mxu0 }
 0x12a   : > { %v2997_v42 = vadd.f32 %v2996_v34, %v9087_v38  ;;  %v2998_v37 = vpop.f32.mrb[31].mxu0  ;;  %v3067_v58 = vpop.f32.mrb[30].mxu1 }
 0x12b   : > { %2758 = vst [vmem:[#allocation2 + $0x4e] sm:$0x3f] %v2755_v57  ;;  %v2914_v24 = vrot.slane %v2907_v43, %v9047_v27  ;;  %v2999_v53 = vadd.f32 %v2998_v37, %v9091_v20  ;;  %v3068_v39 = vadd.f32 %v3067_v58, %v9098_v41  ;;  %v6669_v1 = vpop.f32.mrb[31].mxu1  ;;  %v3500_v41 = vrot.slane %v3490_v61, 2 }
 0x12d   : > { %v2922_v49 = vcombine.low %v2914_v24, %v2921_v29  ;;  %v3074_v0 = vcombine.low %v2997_v42, %v2999_v53  ;;  %v3088_v21 = vrot.slane %v3068_v39, %v9047_v27  ;;  %v3511_v24 = vrot.slane %v3490_v61, 4 }
 0x12f   : > { %2925 = vst [vmem:[#allocation2 + $0x54] sm:$0x3f] %v2922_v49  ;;  %v3081_v28 = vrot.slane %v3074_v0, %v9047_v27  ;;  %v9149_v27 = vld [vmem:[%s9146_s12] ss:$0 sm:$0xff] }
 0x131   : > { %v3089_v8 = vcombine.low %v3081_v28, %v3088_v21 }
 0x133   : > { %3092 = vst [vmem:[#allocation2 + $0x5a] sm:$0x3f] %v3089_v8 }
 0x13a   : > { %v3491_v0 = vld [vmem:[#allocation2 + $0x5a] sm:$0x3f] }
 0x149   : > { %v3274_v38 = vpop.f32.mrb[32].mxu0 }
 0x14a   : > { %v3492_v51 = vadd.f32 %v3490_v61, %v3274_v38  ;;  %v3276_v22 = vpop.f32.mrb[33].mxu0  ;;  %v3345_v33 = vpop.f32.mrb[32].mxu1 }
 0x14b   : > { %v6704_v32 = vpop.f32.mrb[33].mxu1  ;;  %v3502_v57 = vadd.f32 %v3500_v41, %v3276_v22  ;;  %v3509_v42 = vadd.f32 %v9149_v27, %v3345_v33  ;;  %v3526_v22 = vrot.slane %v3491_v0, 2 }
 0x14c   : > { %v6185_v20 = vmul.f32 -1.442695, %v3492_v51 }
 0x14d   : > { %v6186_v43 = vmul.f32 -1.442695, %v3502_v57 }
 0x14e   : > { %8253 = vpow2.f32 %v6185_v20 }
 0x14f   : > { %8255 = vpow2.f32 %v6186_v43 }
 0x158   : > { %v8254_v29 = vpop.eup %8253 }
 0x159   : > { %v3496_v34 = vadd.f32 1.0, %v8254_v29  ;;  %v8256_v37 = vpop.eup %8255 }
 0x15a   : > { %v3506_v39 = vadd.f32 1.0, %v8256_v37  ;;  %v9173_v37 = vld [vmem:[%s9146_s12 + $0x1] ss:$0 sm:$0xff] }
 0x15b   : > { %8257 = vrcp.f32 %v3496_v34 }
 0x165   : > { %v8258_v58 = vpop.eup %8257 }
 0x166   : > { %v3510_v53 = vmul.f32 %v8258_v58, %v3509_v42  ;;  %v9799_v42 = vmov 0.0  }
 0x168   : > { %v3513_v1 = vadd.f32 %v3511_v24, %v3510_v53 }
 0x169   : > { %v3415_v49 = vpop.f32.mrb[34].mxu0 }
 0x16a   : > { %8259 = vtanh.f32 %v3513_v1  ;;  %v3518_v21 = vadd.f32 %v3491_v0, %v3415_v49  ;;  %v3417_v28 = vpop.f32.mrb[35].mxu0  ;;  %v3486_v8 = vpop.f32.mrb[34].mxu1 }
 0x16b   : > { %v6739_v38 = vpop.f32.mrb[35].mxu1  ;;  %8261 = vrcp.f32 %v3506_v39  ;;  %v3528_v32 = vadd.f32 %v3526_v22, %v3417_v28  ;;  %v3535_v58 = vadd.f32 %v9173_v37, %v3486_v8  ;;  %v3537_v39 = vrot.slane %v3491_v0, 4  ;;  %v9801_v22 = vld [vmem:[#allocation3_spill] sm:$0xff] }
 0x16c   : > { %v6187_v51 = vmul.f32 -1.442695, %v3518_v21 }
 0x16d   : > { %v6188_v41 = vmul.f32 -1.442695, %v3528_v32  ;;  %v9802_v32 = vld [vmem:[#allocation5_spill] sm:$0xff] }
 0x16e   : > { %8263 = vpow2.f32 %v6187_v51 }
 0x16f   : > { %8265 = vpow2.f32 %v6188_v41  ;;  %v9806_v41 = vld [vmem:[#allocation10_spill] sm:$0xff] }
 0x174   : > { %v8260_v33 = vpop.eup %8259 }
 0x175   : > { %v3515_v61 = vsub.f32 %v8854_v62, %v8260_v33  ;;  %v8262_v20 = vpop.eup %8261  ;;  %v9798_v62 = vmov 0.0|0.0  }
 0x177   : > { %v3516_v57 = vmul.f32 %v8262_v20, %v3515_v61  ;;  %v9804_v61 = vld [vmem:[#allocation6_spill] sm:$0xff]  ;;  %v9805_v20 = vld [vmem:[#allocation8_spill] sm:$0xff] }
 0x178   : > { %v8264_v43 = vpop.eup %8263 }
 0x179   : > { %v3522_v29 = vadd.f32 1.0, %v8264_v43  ;;  %v9159_v34 = vadd.f32 %v8260_v33, %v3516_v57  ;;  %v8266_v24 = vpop.eup %8265  ;;  %v9803_v33 = vld [vmem:[#allocation7_spill] sm:$0xff]  ;;  %v9807_v57 = vld [vmem:[#allocation9_spill] sm:$0xff] }
 0x17a   : > { %v3532_v49 = vadd.f32 1.0, %v8266_v24  ;;  %v9808_v43 = vld [vmem:[#allocation11_spill] sm:$0xff] }
 0x17b   : > { %8267 = vrcp.f32 %v3522_v29  ;;  %3544 = vst [vmem:[%s9157_s16] sm:$0x3] %v9159_v34  ;;  %3612 = vmatmul.mubr.f32.vlgmr.msra.gmra.mrb[36].mxu0 %v9159_v34  ;;  %6773 = vmatmul.mubr.f32.vlgmr.msra.gmra.mrb[36].mxu1 %v9159_v34  ;;  %v9809_v29 = vld [vmem:[#allocation13_spill] sm:$0xff] }
 0x17c   : > { %7513 = vmatpush1.bf16.msra.mxu0 %v8856_v3  ;;  %7544 = vmatpush3.bf16.msra.mxu1 %v8865_v9 }
 0x17d   : > { %7515 = vmatprep.subr.bf16.mxu0 %v8859_v4  ;;  %7545 = vmatprep.subr.bf16.mxu1 %v9798_v62 }
 0x17e   : > { %3752 = vmatprep.mubr.f32.mxu0 %v9799_v42  ;;  %6807 = vmatprep.mubr.msk.f32.mxu1 %vm8425_vm0, %v9799_v42 }
 0x180   : > { %7517 = vmatpush1.bf16.msra.mxu0 %v8873_v16  ;;  %7547 = vmatpush3.bf16.msra.mxu1 %v8883_v23 }
 0x181   : > { %7519 = vmatprep.subr.bf16.mxu0 %v8877_v17  ;;  %7548 = vmatprep.subr.bf16.mxu1 %v9798_v62 }
 0x184   : > { %7521 = vmatpush1.bf16.msra.mxu0 %v8893_v30  ;;  %7550 = vmatpush3.bf16.msra.mxu1 %v8902_v36 }
 0x185   : > { %v8268_v53 = vpop.eup %8267  ;;  %7523 = vmatprep.subr.bf16.mxu0 %v8896_v31  ;;  %7551 = vmatprep.subr.bf16.mxu1 %v9798_v62 }
 0x186   : > { %v3536_v1 = vmul.f32 %v8268_v53, %v3535_v58  ;;  %v9810_v58 = vld [vmem:[#allocation12_spill] sm:$0xff] }
 0x187   : > { %v3829_v53 = vld [vmem:[#allocation2 + $0x6] sm:$0x3f] }
 0x188   : > { %v3539_v21 = vadd.f32 %v3537_v39, %v3536_v1  ;;  %7525 = vmatpush1.bf16.msra.mxu0 %v8909_v44  ;;  %7553 = vmatpush3.bf16.msra.mxu1 %v8918_v56 }
 0x189   : > { %7527 = vmatprep.subr.bf16.mxu0 %v8912_v47  ;;  %7554 = vmatprep.subr.bf16.mxu1 %v9798_v62 }
 0x18a   : > { %8269 = vtanh.f32 %v3539_v21 }
 0x18b   : > { %8271 = vrcp.f32 %v3532_v49 }
 0x18c   : > { %7529 = vmatpush1.bf16.msra.mxu0 %v8925_v5  ;;  %7556 = vmatpush3.bf16.msra.mxu1 %v8934_v14 }
 0x18d   : > { %7531 = vmatprep.subr.bf16.mxu0 %v8928_v7  ;;  %7557 = vmatprep.subr.bf16.mxu1 %v9798_v62 }
 0x190   : > { %7533 = vmatpush1.bf16.msra.mxu0 %v8941_v25  ;;  %7559 = vmatpush3.bf16.msra.mxu1 %v8950_v35 }
 0x191   : > { %7535 = vmatprep.subr.bf16.mxu0 %v8944_v26  ;;  %7560 = vmatprep.subr.bf16.mxu1 %v9798_v62 }
 0x194   : > { %v8270_v0 = vpop.eup %8269  ;;  %7537 = vmatpush1.bf16.msra.mxu0 %v8957_v48  ;;  %7562 = vmatpush3.bf16.msra.mxu1 %v8965_v60 }
 0x195   : > { %7539 = vmatprep.subr.bf16.mxu0 %v8960_v52  ;;  %7563 = vmatprep.subr.bf16.mxu1 %v9798_v62  ;;  %v3541_v28 = vsub.f32 %v8980_v18, %v8270_v0  ;;  %v8272_v8 = vpop.eup %8271  ;;  %v9800_v18 = vld [vmem:[#allocation4_spill] sm:$0xff] }
 0x197   : > { %v3542_v38 = vmul.f32 %v8272_v8, %v3541_v28  ;;  %v3839_v28 = vrot.slane %v3829_v53, 2 }
 0x198   : > { %7541 = vmatpush1.bf16.msra.mxu0 %v8971_v12  ;;  %7565 = vmatpush3.bf16.msra.mxu1 %v8975_v13 }
 0x199   : > { %v9203_v51 = vadd.f32 %v8270_v0, %v3542_v38  ;;  %7567 = vmatprep.subr.bf16.mxu0 %v8697_v40  ;;  %7598 = vmatprep.subr.bf16.mxu1 %v9798_v62 }
 0x19b   : > { %6189 = vst [vmem:[%s9157_s16 + $0x1e] sm:$0x3] %v9203_v51  ;;  %3753 = vmatmul.mubr.f32.vlgmr.msra.gmra.mrb[38].mxu0 %v9203_v51  ;;  %6808 = vmatmul.mubr.f32.vlgmr.msra.gmra.mrb[38].mxu1 %v9203_v51 }
 0x19c   : > { %7569 = vmatpush1.bf16.msra.mxu0 %v8709_v45  ;;  %7600 = vmatpush3.bf16.msra.mxu1 %v8718_v50 }
 0x19d   : > { %7571 = vmatprep.subr.bf16.mxu0 %v8713_v46  ;;  %7601 = vmatprep.subr.bf16.mxu1 %v9798_v62 }
 0x19e   : > { %3951 = vmatprep.mubr.f32.mxu0 %v9799_v42  ;;  %6842 = vmatprep.mubr.msk.f32.mxu1 %vm8425_vm0, %v9799_v42 }
 0x1a0   : > { %7573 = vmatpush1.bf16.msra.mxu0 %v8730_v54  ;;  %7603 = vmatpush3.bf16.msra.mxu1 %v8739_v59 }
 0x1a1   : > { %7575 = vmatprep.subr.bf16.mxu0 %v8733_v55  ;;  %7604 = vmatprep.subr.bf16.mxu1 %v9798_v62 }
 0x1a4   : > { %7577 = vmatpush1.bf16.msra.mxu0 %v8749_v63  ;;  %7606 = vmatpush3.bf16.msra.mxu1 %v8758_v6 }
 0x1a5   : > { %7579 = vmatprep.subr.bf16.mxu0 %v8752_v2  ;;  %7607 = vmatprep.subr.bf16.mxu1 %v9798_v62 }
 0x1a8   : > { %7581 = vmatpush1.bf16.msra.mxu0 %v8765_v10  ;;  %7609 = vmatpush3.bf16.msra.mxu1 %v8774_v15 }
 0x1a9   : > { %7583 = vmatprep.subr.bf16.mxu0 %v8768_v11  ;;  %7610 = vmatprep.subr.bf16.mxu1 %v9798_v62 }
 0x1ac   : > { %7585 = vmatpush1.bf16.msra.mxu0 %v8781_v19  ;;  %7612 = vmatpush3.bf16.msra.mxu1 %v9800_v18 }
 0x1ad   : > { %7587 = vmatprep.subr.bf16.mxu0 %v9801_v22  ;;  %7613 = vmatprep.subr.bf16.mxu1 %v9798_v62  ;;  %v3830_v22 = vld [vmem:[#allocation2 + $0x54] sm:$0x3f] }
 0x1b0   : > { %7589 = vmatpush1.bf16.msra.mxu0 %v9802_v32  ;;  %7615 = vmatpush3.bf16.msra.mxu1 %v9803_v33 }
 0x1b1   : > { %7591 = vmatprep.subr.bf16.mxu0 %v9804_v61  ;;  %7616 = vmatprep.subr.bf16.mxu1 %v9798_v62 }
 0x1b4   : > { %7593 = vmatpush1.bf16.msra.mxu0 %v9805_v20  ;;  %7618 = vmatpush3.bf16.msra.mxu1 %v9806_v41  ;;  %v3850_v20 = vrot.slane %v3829_v53, 4 }
 0x1b5   : > { %7595 = vmatprep.subr.bf16.mxu0 %v9807_v57  ;;  %7619 = vmatprep.subr.bf16.mxu1 %v9798_v62 }
 0x1b8   : > { %7597 = vmatpush1.bf16.msra.mxu0 %v9808_v43  ;;  %7621 = vmatpush3.bf16.msra.mxu1 %v9809_v29 }
 0x1b9   : > { %7623 = vmatprep.subr.bf16.mxu0 %v9810_v58  ;;  %7654 = vmatprep.subr.bf16.mxu1 %v9798_v62 }
 0x24e   : > { %v3613_v24 = vpop.f32.mrb[36].mxu0  ;;  %v3684_v39 = vpop.f32.mrb[36].mxu1 }
 0x24f   : > { %v3831_v1 = vadd.f32 %v3829_v53, %v3613_v24  ;;  %v3615_v49 = vpop.f32.mrb[37].mxu0  ;;  %v6774_v21 = vpop.f32.mrb[37].mxu1  ;;  %v3848_v58 = vadd.f32 %v9149_v27, %v3684_v39 }
 0x250   : > { %v3841_v8 = vadd.f32 %v3839_v28, %v3615_v49 }
 0x251   : > { %v6190_v0 = vmul.f32 -1.442695, %v3831_v1 }
 0x252   : > { %v6191_v38 = vmul.f32 -1.442695, %v3841_v8 }
 0x253   : > { %8273 = vpow2.f32 %v6190_v0 }
 0x254   : > { %8275 = vpow2.f32 %v6191_v38  ;;  %v3876_v38 = vrot.slane %v3830_v22, 4 }
 0x25d   : > { %v8274_v57 = vpop.eup %8273 }
 0x25e   : > { %v3835_v41 = vadd.f32 1.0, %v8274_v57  ;;  %v8276_v29 = vpop.eup %8275 }
 0x25f   : > { %v3845_v32 = vadd.f32 1.0, %v8276_v29 }
 0x260   : > { %8277 = vrcp.f32 %v3835_v41  ;;  %v3865_v41 = vrot.slane %v3830_v22, 2 }
 0x26a   : > { %v8278_v43 = vpop.eup %8277 }
 0x26b   : > { %v3849_v61 = vmul.f32 %v8278_v43, %v3848_v58 }
 0x26d   : > { %v3852_v33 = vadd.f32 %v3850_v20, %v3849_v61 }
 0x26e   : > { %v3754_v24 = vpop.f32.mrb[38].mxu0  ;;  %v3825_v21 = vpop.f32.mrb[38].mxu1 }
 0x26f   : > { %8279 = vtanh.f32 %v3852_v33  ;;  %v3857_v1 = vadd.f32 %v3830_v22, %v3754_v24  ;;  %v3756_v0 = vpop.f32.mrb[39].mxu0  ;;  %v6809_v49 = vpop.f32.mrb[39].mxu1 }
 0x270   : > { %8281 = vrcp.f32 %v3845_v32  ;;  %v3867_v28 = vadd.f32 %v3865_v41, %v3756_v0  ;;  %v3874_v32 = vadd.f32 %v9173_v37, %v3825_v21 }
 0x271   : > { %v6192_v57 = vmul.f32 -1.442695, %v3857_v1 }
 0x272   : > { %v6193_v43 = vmul.f32 -1.442695, %v3867_v28  ;;  %v9812_v28 = vld [vmem:[#allocation5_spill] sm:$0xff] }
 0x273   : > { %8283 = vpow2.f32 %v6192_v57 }
 0x274   : > { %8285 = vpow2.f32 %v6193_v43  ;;  %v9816_v43 = vld [vmem:[#allocation10_spill] sm:$0xff] }
 0x279   : > { %v8280_v8 = vpop.eup %8279 }
 0x27a   : > { %v3854_v39 = vsub.f32 %v9159_v34, %v8280_v8  ;;  %v8282_v53 = vpop.eup %8281 }
 0x27c   : > { %v3855_v61 = vmul.f32 %v8282_v53, %v3854_v39  ;;  %v9814_v39 = vld [vmem:[#allocation6_spill] sm:$0xff]  ;;  %v9815_v53 = vld [vmem:[#allocation8_spill] sm:$0xff] }
 0x27d   : > { %v8284_v20 = vpop.eup %8283 }
 0x27e   : > { %v3861_v29 = vadd.f32 1.0, %v8284_v20  ;;  %v9248_v58 = vadd.f32 %v8280_v8, %v3855_v61  ;;  %v8286_v34 = vpop.eup %8285  ;;  %v9813_v8 = vld [vmem:[#allocation7_spill] sm:$0xff]  ;;  %v9817_v61 = vld [vmem:[#allocation9_spill] sm:$0xff] }
 0x27f   : > { %v3871_v0 = vadd.f32 1.0, %v8286_v34  ;;  %v9818_v20 = vld [vmem:[#allocation11_spill] sm:$0xff]  ;;  %v9820_v34 = vld [vmem:[#allocation12_spill] sm:$0xff] }
 0x280   : > { %8287 = vrcp.f32 %v3861_v29  ;;  %6194 = vst [vmem:[%s9157_s16 + $0x2] sm:$0x3] %v9248_v58  ;;  %3952 = vmatmul.mubr.f32.vlgmr.msra.gmra.mrb[40].mxu0 %v9248_v58  ;;  %6843 = vmatmul.mubr.f32.vlgmr.msra.gmra.mrb[40].mxu1 %v9248_v58  ;;  %v9819_v29 = vld [vmem:[#allocation13_spill] sm:$0xff] }
 0x281   : > { %7625 = vmatpush1.bf16.msra.mxu0 %v8856_v3  ;;  %7656 = vmatpush3.bf16.msra.mxu1 %v8865_v9 }
 0x282   : > { %7627 = vmatprep.subr.bf16.mxu0 %v8859_v4  ;;  %7657 = vmatprep.subr.bf16.mxu1 %v9798_v62 }
 0x283   : > { %4092 = vmatprep.mubr.f32.mxu0 %v9799_v42  ;;  %6877 = vmatprep.mubr.msk.f32.mxu1 %vm8425_vm0, %v9799_v42 }
 0x285   : > { %7629 = vmatpush1.bf16.msra.mxu0 %v8873_v16  ;;  %7659 = vmatpush3.bf16.msra.mxu1 %v8883_v23 }
 0x286   : > { %7631 = vmatprep.subr.bf16.mxu0 %v8877_v17  ;;  %7660 = vmatprep.subr.bf16.mxu1 %v9798_v62 }
 0x289   : > { %7633 = vmatpush1.bf16.msra.mxu0 %v8893_v30  ;;  %7662 = vmatpush3.bf16.msra.mxu1 %v8902_v36 }
 0x28a   : > { %v8288_v33 = vpop.eup %8287  ;;  %7635 = vmatprep.subr.bf16.mxu0 %v8896_v31  ;;  %7663 = vmatprep.subr.bf16.mxu1 %v9798_v62 }
 0x28b   : > { %v3875_v24 = vmul.f32 %v8288_v33, %v3874_v32  ;;  %v4169_v33 = vld [vmem:[#allocation2 + $0xc] sm:$0x3f] }
 0x28d   : > { %v3878_v1 = vadd.f32 %v3876_v38, %v3875_v24  ;;  %7637 = vmatpush1.bf16.msra.mxu0 %v8909_v44  ;;  %7665 = vmatpush3.bf16.msra.mxu1 %v8918_v56 }
 0x28e   : > { %7639 = vmatprep.subr.bf16.mxu0 %v8912_v47  ;;  %7666 = vmatprep.subr.bf16.mxu1 %v9798_v62 }
 0x28f   : > { %8289 = vtanh.f32 %v3878_v1 }
 0x290   : > { %8291 = vrcp.f32 %v3871_v0 }
 0x291   : > { %7641 = vmatpush1.bf16.msra.mxu0 %v8925_v5  ;;  %7668 = vmatpush3.bf16.msra.mxu1 %v8934_v14 }
 0x292   : > { %7643 = vmatprep.subr.bf16.mxu0 %v8928_v7  ;;  %7669 = vmatprep.subr.bf16.mxu1 %v9798_v62 }
 0x295   : > { %7645 = vmatpush1.bf16.msra.mxu0 %v8941_v25  ;;  %7671 = vmatpush3.bf16.msra.mxu1 %v8950_v35 }
 0x296   : > { %7647 = vmatprep.subr.bf16.mxu0 %v8944_v26  ;;  %7672 = vmatprep.subr.bf16.mxu1 %v9798_v62 }
 0x299   : > { %v8290_v22 = vpop.eup %8289  ;;  %7649 = vmatpush1.bf16.msra.mxu0 %v8957_v48  ;;  %7674 = vmatpush3.bf16.msra.mxu1 %v8965_v60 }
 0x29a   : > { %7651 = vmatprep.subr.bf16.mxu0 %v8960_v52  ;;  %7675 = vmatprep.subr.bf16.mxu1 %v9798_v62  ;;  %v3880_v21 = vsub.f32 %v9203_v51, %v8290_v22  ;;  %v8292_v49 = vpop.eup %8291  ;;  %v9811_v51 = vld [vmem:[#allocation3_spill] sm:$0xff] }
 0x29c   : > { %v3881_v57 = vmul.f32 %v8292_v49, %v3880_v21  ;;  %v4179_v21 = vrot.slane %v4169_v33, 2 }
 0x29d   : > { %7653 = vmatpush1.bf16.msra.mxu0 %v8971_v12  ;;  %7677 = vmatpush3.bf16.msra.mxu1 %v8975_v13 }
 0x29e   : > { %v9289_v41 = vadd.f32 %v8290_v22, %v3881_v57  ;;  %7679 = vmatprep.subr.bf16.mxu0 %v8697_v40  ;;  %7710 = vmatprep.subr.bf16.mxu1 %v9798_v62 }
 0x2a0   : > { %6195 = vst [vmem:[%s9157_s16 + $0x1c] sm:$0x3] %v9289_v41  ;;  %4093 = vmatmul.mubr.f32.vlgmr.msra.gmra.mrb[42].mxu0 %v9289_v41  ;;  %6878 = vmatmul.mubr.f32.vlgmr.msra.gmra.mrb[42].mxu1 %v9289_v41 }
 0x2a1   : > { %7681 = vmatpush1.bf16.msra.mxu0 %v8709_v45  ;;  %7712 = vmatpush3.bf16.msra.mxu1 %v8718_v50 }
 0x2a2   : > { %7683 = vmatprep.subr.bf16.mxu0 %v8713_v46  ;;  %7713 = vmatprep.subr.bf16.mxu1 %v9798_v62 }
 0x2a3   : > { %4291 = vmatprep.mubr.f32.mxu0 %v9799_v42  ;;  %6912 = vmatprep.mubr.msk.f32.mxu1 %vm8425_vm0, %v9799_v42 }
 0x2a5   : > { %7685 = vmatpush1.bf16.msra.mxu0 %v8730_v54  ;;  %7715 = vmatpush3.bf16.msra.mxu1 %v8739_v59 }
 0x2a6   : > { %7687 = vmatprep.subr.bf16.mxu0 %v8733_v55  ;;  %7716 = vmatprep.subr.bf16.mxu1 %v9798_v62 }
 0x2a9   : > { %7689 = vmatpush1.bf16.msra.mxu0 %v8749_v63  ;;  %7718 = vmatpush3.bf16.msra.mxu1 %v8758_v6 }
 0x2aa   : > { %7691 = vmatprep.subr.bf16.mxu0 %v8752_v2  ;;  %7719 = vmatprep.subr.bf16.mxu1 %v9798_v62 }
 0x2ad   : > { %7693 = vmatpush1.bf16.msra.mxu0 %v8765_v10  ;;  %7721 = vmatpush3.bf16.msra.mxu1 %v8774_v15 }
 0x2ae   : > { %7695 = vmatprep.subr.bf16.mxu0 %v8768_v11  ;;  %7722 = vmatprep.subr.bf16.mxu1 %v9798_v62 }
 0x2b1   : > { %7697 = vmatpush1.bf16.msra.mxu0 %v8781_v19  ;;  %7724 = vmatpush3.bf16.msra.mxu1 %v9800_v18 }
 0x2b2   : > { %7699 = vmatprep.subr.bf16.mxu0 %v9811_v51  ;;  %7725 = vmatprep.subr.bf16.mxu1 %v9798_v62  ;;  %v4170_v51 = vld [vmem:[#allocation2 + $0x4e] sm:$0x3f] }
 0x2b5   : > { %7701 = vmatpush1.bf16.msra.mxu0 %v9812_v28  ;;  %7727 = vmatpush3.bf16.msra.mxu1 %v9813_v8 }
 0x2b6   : > { %7703 = vmatprep.subr.bf16.mxu0 %v9814_v39  ;;  %7728 = vmatprep.subr.bf16.mxu1 %v9798_v62 }
 0x2b9   : > { %7705 = vmatpush1.bf16.msra.mxu0 %v9815_v53  ;;  %7730 = vmatpush3.bf16.msra.mxu1 %v9816_v43  ;;  %v4190_v53 = vrot.slane %v4169_v33, 4 }
 0x2ba   : > { %7707 = vmatprep.subr.bf16.mxu0 %v9817_v61  ;;  %7731 = vmatprep.subr.bf16.mxu1 %v9798_v62 }
 0x2bd   : > { %7709 = vmatpush1.bf16.msra.mxu0 %v9818_v20  ;;  %7733 = vmatpush3.bf16.msra.mxu1 %v9819_v29 }
 0x2be   : > { %7735 = vmatprep.subr.bf16.mxu0 %v9820_v34  ;;  %7766 = vmatprep.subr.bf16.mxu1 %v9798_v62 }
 0x353   : > { %v3953_v32 = vpop.f32.mrb[40].mxu0  ;;  %v4024_v38 = vpop.f32.mrb[40].mxu1 }
 0x354   : > { %v4171_v24 = vadd.f32 %v4169_v33, %v3953_v32  ;;  %v3955_v1 = vpop.f32.mrb[41].mxu0  ;;  %v6844_v0 = vpop.f32.mrb[41].mxu1  ;;  %v4188_v34 = vadd.f32 %v9149_v27, %v4024_v38 }
 0x355   : > { %v4181_v49 = vadd.f32 %v4179_v21, %v3955_v1 }
 0x356   : > { %v6196_v22 = vmul.f32 -1.442695, %v4171_v24 }
 0x357   : > { %v6197_v57 = vmul.f32 -1.442695, %v4181_v49 }
 0x358   : > { %8293 = vpow2.f32 %v6196_v22 }
 0x359   : > { %8295 = vpow2.f32 %v6197_v57  ;;  %v4216_v57 = vrot.slane %v4170_v51, 4 }
 0x362   : > { %v8294_v61 = vpop.eup %8293 }
 0x363   : > { %v4175_v43 = vadd.f32 1.0, %v8294_v61  ;;  %v8296_v29 = vpop.eup %8295 }
 0x364   : > { %v4185_v28 = vadd.f32 1.0, %v8296_v29 }
 0x365   : > { %8297 = vrcp.f32 %v4175_v43  ;;  %v4205_v43 = vrot.slane %v4170_v51, 2 }
 0x36f   : > { %v8298_v20 = vpop.eup %8297 }
 0x370   : > { %v4189_v39 = vmul.f32 %v8298_v20, %v4188_v34 }
 0x372   : > { %v4192_v8 = vadd.f32 %v4190_v53, %v4189_v39 }
 0x373   : > { %v4094_v32 = vpop.f32.mrb[42].mxu0  ;;  %v4165_v0 = vpop.f32.mrb[42].mxu1 }
 0x374   : > { %8299 = vtanh.f32 %v4192_v8  ;;  %v4197_v24 = vadd.f32 %v4170_v51, %v4094_v32  ;;  %v4096_v22 = vpop.f32.mrb[43].mxu0  ;;  %v6879_v1 = vpop.f32.mrb[43].mxu1 }
 0x375   : > { %8301 = vrcp.f32 %v4185_v28  ;;  %v4207_v21 = vadd.f32 %v4205_v43, %v4096_v22  ;;  %v4214_v28 = vadd.f32 %v9173_v37, %v4165_v0 }
 0x376   : > { %v6198_v61 = vmul.f32 -1.442695, %v4197_v24 }
 0x377   : > { %v6199_v20 = vmul.f32 -1.442695, %v4207_v21  ;;  %v9822_v21 = vld [vmem:[#allocation5_spill] sm:$0xff] }
 0x378   : > { %8303 = vpow2.f32 %v6198_v61 }
 0x379   : > { %8305 = vpow2.f32 %v6199_v20  ;;  %v9826_v20 = vld [vmem:[#allocation10_spill] sm:$0xff] }
 0x37e   : > { %v8300_v49 = vpop.eup %8299 }
 0x37f   : > { %v4194_v38 = vsub.f32 %v9248_v58, %v8300_v49  ;;  %v8302_v33 = vpop.eup %8301 }
 0x381   : > { %v4195_v39 = vmul.f32 %v8302_v33, %v4194_v38  ;;  %v9824_v38 = vld [vmem:[#allocation6_spill] sm:$0xff]  ;;  %v9825_v33 = vld [vmem:[#allocation8_spill] sm:$0xff] }
 0x382   : > { %v8304_v53 = vpop.eup %8303 }
 0x383   : > { %v4201_v29 = vadd.f32 1.0, %v8304_v53  ;;  %v9334_v34 = vadd.f32 %v8300_v49, %v4195_v39  ;;  %v8306_v58 = vpop.eup %8305  ;;  %v9823_v49 = vld [vmem:[#allocation7_spill] sm:$0xff]  ;;  %v9827_v39 = vld [vmem:[#allocation9_spill] sm:$0xff] }
 0x384   : > { %v4211_v22 = vadd.f32 1.0, %v8306_v58  ;;  %v9828_v53 = vld [vmem:[#allocation11_spill] sm:$0xff]  ;;  %v9830_v58 = vld [vmem:[#allocation12_spill] sm:$0xff] }
 0x385   : > { %8307 = vrcp.f32 %v4201_v29  ;;  %6200 = vst [vmem:[%s9157_s16 + $0x4] sm:$0x3] %v9334_v34  ;;  %4292 = vmatmul.mubr.f32.vlgmr.msra.gmra.mrb[44].mxu0 %v9334_v34  ;;  %6913 = vmatmul.mubr.f32.vlgmr.msra.gmra.mrb[44].mxu1 %v9334_v34  ;;  %v9829_v29 = vld [vmem:[#allocation13_spill] sm:$0xff] }
 0x386   : > { %7737 = vmatpush1.bf16.msra.mxu0 %v8856_v3  ;;  %7768 = vmatpush3.bf16.msra.mxu1 %v8865_v9 }
 0x387   : > { %7739 = vmatprep.subr.bf16.mxu0 %v8859_v4  ;;  %7769 = vmatprep.subr.bf16.mxu1 %v9798_v62 }
 0x388   : > { %4432 = vmatprep.mubr.f32.mxu0 %v9799_v42  ;;  %6947 = vmatprep.mubr.msk.f32.mxu1 %vm8425_vm0, %v9799_v42 }
 0x38a   : > { %7741 = vmatpush1.bf16.msra.mxu0 %v8873_v16  ;;  %7771 = vmatpush3.bf16.msra.mxu1 %v8883_v23 }
 0x38b   : > { %7743 = vmatprep.subr.bf16.mxu0 %v8877_v17  ;;  %7772 = vmatprep.subr.bf16.mxu1 %v9798_v62 }
 0x38e   : > { %7745 = vmatpush1.bf16.msra.mxu0 %v8893_v30  ;;  %7774 = vmatpush3.bf16.msra.mxu1 %v8902_v36 }
 0x38f   : > { %v8308_v8 = vpop.eup %8307  ;;  %7747 = vmatprep.subr.bf16.mxu0 %v8896_v31  ;;  %7775 = vmatprep.subr.bf16.mxu1 %v9798_v62 }
 0x390   : > { %v4215_v32 = vmul.f32 %v8308_v8, %v4214_v28  ;;  %v4509_v8 = vld [vmem:[#allocation2 + $0x12] sm:$0x3f] }
 0x392   : > { %v4218_v24 = vadd.f32 %v4216_v57, %v4215_v32  ;;  %7749 = vmatpush1.bf16.msra.mxu0 %v8909_v44  ;;  %7777 = vmatpush3.bf16.msra.mxu1 %v8918_v56 }
 0x393   : > { %7751 = vmatprep.subr.bf16.mxu0 %v8912_v47  ;;  %7778 = vmatprep.subr.bf16.mxu1 %v9798_v62 }
 0x394   : > { %8309 = vtanh.f32 %v4218_v24 }
 0x395   : > { %8311 = vrcp.f32 %v4211_v22 }
 0x396   : > { %7753 = vmatpush1.bf16.msra.mxu0 %v8925_v5  ;;  %7780 = vmatpush3.bf16.msra.mxu1 %v8934_v14 }
 0x397   : > { %7755 = vmatprep.subr.bf16.mxu0 %v8928_v7  ;;  %7781 = vmatprep.subr.bf16.mxu1 %v9798_v62 }
 0x39a   : > { %7757 = vmatpush1.bf16.msra.mxu0 %v8941_v25  ;;  %7783 = vmatpush3.bf16.msra.mxu1 %v8950_v35 }
 0x39b   : > { %7759 = vmatprep.subr.bf16.mxu0 %v8944_v26  ;;  %7784 = vmatprep.subr.bf16.mxu1 %v9798_v62 }
 0x39e   : > { %v8310_v51 = vpop.eup %8309  ;;  %7761 = vmatpush1.bf16.msra.mxu0 %v8957_v48  ;;  %7786 = vmatpush3.bf16.msra.mxu1 %v8965_v60 }
 0x39f   : > { %7763 = vmatprep.subr.bf16.mxu0 %v8960_v52  ;;  %7787 = vmatprep.subr.bf16.mxu1 %v9798_v62  ;;  %v4220_v0 = vsub.f32 %v9289_v41, %v8310_v51  ;;  %v8312_v1 = vpop.eup %8311  ;;  %v9821_v41 = vld [vmem:[#allocation3_spill] sm:$0xff] }
 0x3a1   : > { %v4221_v61 = vmul.f32 %v8312_v1, %v4220_v0  ;;  %v4519_v0 = vrot.slane %v4509_v8, 2 }
 0x3a2   : > { %7765 = vmatpush1.bf16.msra.mxu0 %v8971_v12  ;;  %7789 = vmatpush3.bf16.msra.mxu1 %v8975_v13 }
 0x3a3   : > { %v9375_v43 = vadd.f32 %v8310_v51, %v4221_v61  ;;  %7791 = vmatprep.subr.bf16.mxu0 %v8697_v40  ;;  %7822 = vmatprep.subr.bf16.mxu1 %v9798_v62 }
 0x3a5   : > { %6201 = vst [vmem:[%s9157_s16 + $0x1a] sm:$0x3] %v9375_v43  ;;  %4433 = vmatmul.mubr.f32.vlgmr.msra.gmra.mrb[46].mxu0 %v9375_v43  ;;  %6948 = vmatmul.mubr.f32.vlgmr.msra.gmra.mrb[46].mxu1 %v9375_v43 }
 0x3a6   : > { %7793 = vmatpush1.bf16.msra.mxu0 %v8709_v45  ;;  %7824 = vmatpush3.bf16.msra.mxu1 %v8718_v50 }
 0x3a7   : > { %7795 = vmatprep.subr.bf16.mxu0 %v8713_v46  ;;  %7825 = vmatprep.subr.bf16.mxu1 %v9798_v62 }
 0x3a8   : > { %4631 = vmatprep.mubr.f32.mxu0 %v9799_v42  ;;  %6982 = vmatprep.mubr.msk.f32.mxu1 %vm8425_vm0, %v9799_v42 }
 0x3aa   : > { %7797 = vmatpush1.bf16.msra.mxu0 %v8730_v54  ;;  %7827 = vmatpush3.bf16.msra.mxu1 %v8739_v59 }
 0x3ab   : > { %7799 = vmatprep.subr.bf16.mxu0 %v8733_v55  ;;  %7828 = vmatprep.subr.bf16.mxu1 %v9798_v62 }
 0x3ae   : > { %7801 = vmatpush1.bf16.msra.mxu0 %v8749_v63  ;;  %7830 = vmatpush3.bf16.msra.mxu1 %v8758_v6 }
 0x3af   : > { %7803 = vmatprep.subr.bf16.mxu0 %v8752_v2  ;;  %7831 = vmatprep.subr.bf16.mxu1 %v9798_v62 }
 0x3b2   : > { %7805 = vmatpush1.bf16.msra.mxu0 %v8765_v10  ;;  %7833 = vmatpush3.bf16.msra.mxu1 %v8774_v15 }
 0x3b3   : > { %7807 = vmatprep.subr.bf16.mxu0 %v8768_v11  ;;  %7834 = vmatprep.subr.bf16.mxu1 %v9798_v62 }
 0x3b6   : > { %7809 = vmatpush1.bf16.msra.mxu0 %v8781_v19  ;;  %7836 = vmatpush3.bf16.msra.mxu1 %v9800_v18 }
 0x3b7   : > { %7811 = vmatprep.subr.bf16.mxu0 %v9821_v41  ;;  %7837 = vmatprep.subr.bf16.mxu1 %v9798_v62  ;;  %v4510_v41 = vld [vmem:[#allocation2 + $0x48] sm:$0x3f] }
 0x3ba   : > { %7813 = vmatpush1.bf16.msra.mxu0 %v9822_v21  ;;  %7839 = vmatpush3.bf16.msra.mxu1 %v9823_v49 }
 0x3bb   : > { %7815 = vmatprep.subr.bf16.mxu0 %v9824_v38  ;;  %7840 = vmatprep.subr.bf16.mxu1 %v9798_v62 }
 0x3be   : > { %7817 = vmatpush1.bf16.msra.mxu0 %v9825_v33  ;;  %7842 = vmatpush3.bf16.msra.mxu1 %v9826_v20  ;;  %v4530_v33 = vrot.slane %v4509_v8, 4 }
 0x3bf   : > { %7819 = vmatprep.subr.bf16.mxu0 %v9827_v39  ;;  %7843 = vmatprep.subr.bf16.mxu1 %v9798_v62 }
 0x3c2   : > { %7821 = vmatpush1.bf16.msra.mxu0 %v9828_v53  ;;  %7845 = vmatpush3.bf16.msra.mxu1 %v9829_v29 }
 0x3c3   : > { %7847 = vmatprep.subr.bf16.mxu0 %v9830_v58  ;;  %7878 = vmatprep.subr.bf16.mxu1 %v9798_v62 }
 0x458   : > { %v4293_v28 = vpop.f32.mrb[44].mxu0  ;;  %v4364_v57 = vpop.f32.mrb[44].mxu1 }
 0x459   : > { %v4511_v32 = vadd.f32 %v4509_v8, %v4293_v28  ;;  %v4295_v24 = vpop.f32.mrb[45].mxu0  ;;  %v6914_v22 = vpop.f32.mrb[45].mxu1  ;;  %v4528_v58 = vadd.f32 %v9149_v27, %v4364_v57  ;;  %v4556_v57 = vrot.slane %v4510_v41, 4 }
 0x45a   : > { %v4521_v1 = vadd.f32 %v4519_v0, %v4295_v24 }
 0x45b   : > { %v6202_v51 = vmul.f32 -1.442695, %v4511_v32 }
 0x45c   : > { %v6203_v61 = vmul.f32 -1.442695, %v4521_v1 }
 0x45d   : > { %8313 = vpow2.f32 %v6202_v51 }
 0x45e   : > { %8315 = vpow2.f32 %v6203_v61 }
 0x467   : > { %v8314_v39 = vpop.eup %8313 }
 0x468   : > { %v4515_v20 = vadd.f32 1.0, %v8314_v39  ;;  %v8316_v29 = vpop.eup %8315 }
 0x469   : > { %v4525_v21 = vadd.f32 1.0, %v8316_v29 }
 0x46a   : > { %8317 = vrcp.f32 %v4515_v20  ;;  %v4545_v20 = vrot.slane %v4510_v41, 2 }
 0x474   : > { %v8318_v53 = vpop.eup %8317 }
 0x475   : > { %v4529_v38 = vmul.f32 %v8318_v53, %v4528_v58 }
 0x477   : > { %v4532_v49 = vadd.f32 %v4530_v33, %v4529_v38 }
 0x478   : > { %v4434_v28 = vpop.f32.mrb[46].mxu0  ;;  %v4505_v22 = vpop.f32.mrb[46].mxu1 }
 0x479   : > { %8319 = vtanh.f32 %v4532_v49  ;;  %v4537_v32 = vadd.f32 %v4510_v41, %v4434_v28  ;;  %v4436_v51 = vpop.f32.mrb[47].mxu0  ;;  %v6949_v24 = vpop.f32.mrb[47].mxu1 }
 0x47a   : > { %8321 = vrcp.f32 %v4525_v21  ;;  %v4547_v0 = vadd.f32 %v4545_v20, %v4436_v51  ;;  %v4554_v21 = vadd.f32 %v9173_v37, %v4505_v22  ;;  %v9833_v20 = vld [vmem:[#allocation7_spill] sm:$0xff] }
 0x47b   : > { %v6204_v39 = vmul.f32 -1.442695, %v4537_v32 }
 0x47c   : > { %v6205_v53 = vmul.f32 -1.442695, %v4547_v0  ;;  %v9834_v0 = vld [vmem:[#allocation6_spill] sm:$0xff] }
 0x47d   : > { %8323 = vpow2.f32 %v6204_v39  ;;  %v9832_v39 = vld [vmem:[#allocation5_spill] sm:$0xff] }
 0x47e   : > { %8325 = vpow2.f32 %v6205_v53  ;;  %v9838_v53 = vld [vmem:[#allocation11_spill] sm:$0xff] }
 0x483   : > { %v8320_v1 = vpop.eup %8319 }
 0x484   : > { %v4534_v27 = vsub.f32 %v9334_v34, %v8320_v1  ;;  %v8322_v8 = vpop.eup %8321 }
 0x486   : > { %v4535_v38 = vmul.f32 %v8322_v8, %v4534_v27  ;;  %v9836_v27 = vld [vmem:[#allocation10_spill] sm:$0xff]  ;;  %v9837_v8 = vld [vmem:[#allocation9_spill] sm:$0xff] }
 0x487   : > { %v8324_v33 = vpop.eup %8323 }
 0x488   : > { %v4541_v29 = vadd.f32 1.0, %v8324_v33  ;;  %v9420_v58 = vadd.f32 %v8320_v1, %v4535_v38  ;;  %v8326_v34 = vpop.eup %8325  ;;  %v9835_v1 = vld [vmem:[#allocation8_spill] sm:$0xff]  ;;  %v9839_v38 = vld [vmem:[#allocation13_spill] sm:$0xff] }
 0x489   : > { %v4551_v32 = vadd.f32 1.0, %v8326_v34  ;;  %v9840_v33 = vld [vmem:[#allocation12_spill] sm:$0xff]  ;;  %v4849_v34 = vld [vmem:[#allocation2 + $0x18] sm:$0x3f] }
 0x48a   : > { %8327 = vrcp.f32 %v4541_v29  ;;  %6206 = vst [vmem:[%s9157_s16 + $0x6] sm:$0x3] %v9420_v58  ;;  %4632 = vmatmul.mubr.f32.vlgmr.msra.gmra.mrb[48].mxu0 %v9420_v58  ;;  %6983 = vmatmul.mubr.f32.vlgmr.msra.gmra.mrb[48].mxu1 %v9420_v58 }
 0x48b   : > { %7849 = vmatpush1.bf16.msra.mxu0 %v8856_v3  ;;  %7880 = vmatpush3.bf16.msra.mxu1 %v8865_v9 }
 0x48c   : > { %7851 = vmatprep.subr.bf16.mxu0 %v8859_v4  ;;  %7881 = vmatprep.subr.bf16.mxu1 %v9798_v62 }
 0x48d   : > { %4772 = vmatprep.mubr.f32.mxu0 %v9799_v42  ;;  %7017 = vmatprep.mubr.msk.f32.mxu1 %vm8425_vm0, %v9799_v42 }
 0x48f   : > { %7853 = vmatpush1.bf16.msra.mxu0 %v8873_v16  ;;  %7883 = vmatpush3.bf16.msra.mxu1 %v8883_v23 }
 0x490   : > { %7855 = vmatprep.subr.bf16.mxu0 %v8877_v17  ;;  %7884 = vmatprep.subr.bf16.mxu1 %v9798_v62 }
 0x493   : > { %7857 = vmatpush1.bf16.msra.mxu0 %v8893_v30  ;;  %7886 = vmatpush3.bf16.msra.mxu1 %v8902_v36 }
 0x494   : > { %v8328_v49 = vpop.eup %8327  ;;  %7859 = vmatprep.subr.bf16.mxu0 %v8896_v31  ;;  %7887 = vmatprep.subr.bf16.mxu1 %v9798_v62 }
 0x495   : > { %v4555_v61 = vmul.f32 %v8328_v49, %v4554_v21 }
 0x497   : > { %v4558_v28 = vadd.f32 %v4556_v57, %v4555_v61  ;;  %7861 = vmatpush1.bf16.msra.mxu0 %v8909_v44  ;;  %7889 = vmatpush3.bf16.msra.mxu1 %v8918_v56 }
 0x498   : > { %7863 = vmatprep.subr.bf16.mxu0 %v8912_v47  ;;  %7890 = vmatprep.subr.bf16.mxu1 %v9798_v62 }
 0x499   : > { %8329 = vtanh.f32 %v4558_v28 }
 0x49a   : > { %8331 = vrcp.f32 %v4551_v32  ;;  %v4859_v32 = vrot.slane %v4849_v34, 2 }
 0x49b   : > { %7865 = vmatpush1.bf16.msra.mxu0 %v8925_v5  ;;  %7892 = vmatpush3.bf16.msra.mxu1 %v8934_v14 }
 0x49c   : > { %7867 = vmatprep.subr.bf16.mxu0 %v8928_v7  ;;  %7893 = vmatprep.subr.bf16.mxu1 %v9798_v62 }
 0x49f   : > { %7869 = vmatpush1.bf16.msra.mxu0 %v8941_v25  ;;  %7895 = vmatpush3.bf16.msra.mxu1 %v8950_v35 }
 0x4a0   : > { %7871 = vmatprep.subr.bf16.mxu0 %v8944_v26  ;;  %7896 = vmatprep.subr.bf16.mxu1 %v9798_v62 }
 0x4a3   : > { %v8330_v37 = vpop.eup %8329  ;;  %7873 = vmatpush1.bf16.msra.mxu0 %v8957_v48  ;;  %7898 = vmatpush3.bf16.msra.mxu1 %v8965_v60 }
 0x4a4   : > { %7875 = vmatprep.subr.bf16.mxu0 %v8960_v52  ;;  %7899 = vmatprep.subr.bf16.mxu1 %v9798_v62  ;;  %v4560_v41 = vsub.f32 %v9375_v43, %v8330_v37  ;;  %v8332_v22 = vpop.eup %8331  ;;  %v9831_v43 = vld [vmem:[#allocation3_spill] sm:$0xff] }
 0x4a6   : > { %v4561_v51 = vmul.f32 %v8332_v22, %v4560_v41 }
 0x4a7   : > { %7877 = vmatpush1.bf16.msra.mxu0 %v8971_v12  ;;  %7901 = vmatpush3.bf16.msra.mxu1 %v8975_v13 }
 0x4a8   : > { %v9461_v24 = vadd.f32 %v8330_v37, %v4561_v51  ;;  %7903 = vmatprep.subr.bf16.mxu0 %v8697_v40  ;;  %7934 = vmatprep.subr.bf16.mxu1 %v9798_v62 }
 0x4aa   : > { %6207 = vst [vmem:[%s9157_s16 + $0x18] sm:$0x3] %v9461_v24  ;;  %4773 = vmatmul.mubr.f32.vlgmr.msra.gmra.mrb[50].mxu0 %v9461_v24  ;;  %7018 = vmatmul.mubr.f32.vlgmr.msra.gmra.mrb[50].mxu1 %v9461_v24 }
 0x4ab   : > { %7905 = vmatpush1.bf16.msra.mxu0 %v8709_v45  ;;  %7936 = vmatpush3.bf16.msra.mxu1 %v8718_v50 }
 0x4ac   : > { %7907 = vmatprep.subr.bf16.mxu0 %v8713_v46  ;;  %7937 = vmatprep.subr.bf16.mxu1 %v9798_v62 }
 0x4ad   : > { %4971 = vmatprep.mubr.f32.mxu0 %v9799_v42  ;;  %7052 = vmatprep.mubr.msk.f32.mxu1 %vm8425_vm0, %v9799_v42 }
 0x4af   : > { %7909 = vmatpush1.bf16.msra.mxu0 %v8730_v54  ;;  %7939 = vmatpush3.bf16.msra.mxu1 %v8739_v59 }
 0x4b0   : > { %7911 = vmatprep.subr.bf16.mxu0 %v8733_v55  ;;  %7940 = vmatprep.subr.bf16.mxu1 %v9798_v62 }
 0x4b3   : > { %7913 = vmatpush1.bf16.msra.mxu0 %v8749_v63  ;;  %7942 = vmatpush3.bf16.msra.mxu1 %v8758_v6 }
 0x4b4   : > { %7915 = vmatprep.subr.bf16.mxu0 %v8752_v2  ;;  %7943 = vmatprep.subr.bf16.mxu1 %v9798_v62 }
 0x4b7   : > { %7917 = vmatpush1.bf16.msra.mxu0 %v8765_v10  ;;  %7945 = vmatpush3.bf16.msra.mxu1 %v8774_v15 }
 0x4b8   : > { %7919 = vmatprep.subr.bf16.mxu0 %v8768_v11  ;;  %7946 = vmatprep.subr.bf16.mxu1 %v9798_v62 }
 0x4bb   : > { %7921 = vmatpush1.bf16.msra.mxu0 %v8781_v19  ;;  %7948 = vmatpush3.bf16.msra.mxu1 %v9800_v18 }
 0x4bc   : > { %7923 = vmatprep.subr.bf16.mxu0 %v9831_v43  ;;  %7949 = vmatprep.subr.bf16.mxu1 %v9798_v62 }
 0x4bf   : > { %7925 = vmatpush1.bf16.msra.mxu0 %v9832_v39  ;;  %7951 = vmatpush3.bf16.msra.mxu1 %v9833_v20 }
 0x4c0   : > { %7927 = vmatprep.subr.bf16.mxu0 %v9834_v0  ;;  %7952 = vmatprep.subr.bf16.mxu1 %v9798_v62 }
 0x4c3   : > { %7929 = vmatpush1.bf16.msra.mxu0 %v9835_v1  ;;  %7954 = vmatpush3.bf16.msra.mxu1 %v9836_v27  ;;  %v4870_v27 = vrot.slane %v4849_v34, 4 }
 0x4c4   : > { %7931 = vmatprep.subr.bf16.mxu0 %v9837_v8  ;;  %7955 = vmatprep.subr.bf16.mxu1 %v9798_v62 }
 0x4c7   : > { %7933 = vmatpush1.bf16.msra.mxu0 %v9838_v53  ;;  %7957 = vmatpush3.bf16.msra.mxu1 %v9839_v38 }
 0x4c8   : > { %7959 = vmatprep.subr.bf16.mxu0 %v9840_v33  ;;  %7990 = vmatprep.subr.bf16.mxu1 %v9798_v62  ;;  %v9505_v33 = vld [vmem:[%s9146_s12] ss:$0 sm:$0xff] }
 0x55d   : > { %v4633_v29 = vpop.f32.mrb[48].mxu0  ;;  %v4704_v21 = vpop.f32.mrb[48].mxu1 }
 0x55e   : > { %v4851_v49 = vadd.f32 %v4849_v34, %v4633_v29  ;;  %v4635_v57 = vpop.f32.mrb[49].mxu0  ;;  %v6984_v61 = vpop.f32.mrb[49].mxu1  ;;  %v4868_v53 = vadd.f32 %v9505_v33, %v4704_v21 }
 0x55f   : > { %v4861_v37 = vadd.f32 %v4859_v32, %v4635_v57 }
 0x560   : > { %v6208_v28 = vmul.f32 -1.442695, %v4851_v49  ;;  %v4850_v49 = vld [vmem:[#allocation2 + $0x42] sm:$0x3f] }
 0x561   : > { %v6209_v41 = vmul.f32 -1.442695, %v4861_v37 }
 0x562   : > { %8333 = vpow2.f32 %v6208_v28 }
 0x563   : > { %8335 = vpow2.f32 %v6209_v41 }
 0x56c   : > { %v8334_v22 = vpop.eup %8333 }
 0x56d   : > { %v4855_v51 = vadd.f32 1.0, %v8334_v22  ;;  %v8336_v38 = vpop.eup %8335  ;;  %v4885_v22 = vrot.slane %v4850_v49, 2 }
 0x56e   : > { %v4865_v0 = vadd.f32 1.0, %v8336_v38 }
 0x56f   : > { %8337 = vrcp.f32 %v4855_v51 }
 0x579   : > { %v8338_v8 = vpop.eup %8337 }
 0x57a   : > { %v4869_v1 = vmul.f32 %v8338_v8, %v4868_v53 }
 0x57c   : > { %v4872_v29 = vadd.f32 %v4870_v27, %v4869_v1 }
 0x57d   : > { %v4774_v61 = vpop.f32.mrb[50].mxu0  ;;  %v4845_v28 = vpop.f32.mrb[50].mxu1 }
 0x57e   : > { %8339 = vtanh.f32 %v4872_v29  ;;  %v4877_v57 = vadd.f32 %v4850_v49, %v4774_v61  ;;  %v4776_v32 = vpop.f32.mrb[51].mxu0  ;;  %v7019_v37 = vpop.f32.mrb[51].mxu1  ;;  %v4896_v61 = vrot.slane %v4850_v49, 4 }
 0x57f   : > { %8341 = vrcp.f32 %v4865_v0  ;;  %v4887_v51 = vadd.f32 %v4885_v22, %v4776_v32 }
 0x580   : > { %v6210_v41 = vmul.f32 -1.442695, %v4877_v57 }
 0x581   : > { %v6211_v8 = vmul.f32 -1.442695, %v4887_v51 }
 0x582   : > { %8343 = vpow2.f32 %v6210_v41 }
 0x583   : > { %8345 = vpow2.f32 %v6211_v8  ;;  %v9844_v8 = vld [vmem:[#allocation10_spill] sm:$0xff] }
 0x588   : > { %v8340_v20 = vpop.eup %8339 }
 0x589   : > { %v4874_v21 = vsub.f32 %v9420_v58, %v8340_v20  ;;  %v8342_v34 = vpop.eup %8341 }
 0x58b   : > { %v4875_v1 = vmul.f32 %v8342_v34, %v4874_v21  ;;  %v9842_v21 = vld [vmem:[#allocation6_spill] sm:$0xff]  ;;  %v9843_v34 = vld [vmem:[#allocation8_spill] sm:$0xff] }
 0x58c   : > { %v8344_v27 = vpop.eup %8343 }
 0x58d   : > { %v4881_v53 = vadd.f32 1.0, %v8344_v27  ;;  %v9509_v38 = vadd.f32 %v8340_v20, %v4875_v1  ;;  %v8346_v58 = vpop.eup %8345  ;;  %v9527_v20 = vld [vmem:[%s9146_s12 + $0x1] ss:$0 sm:$0xff]  ;;  %v9845_v1 = vld [vmem:[#allocation9_spill] sm:$0xff] }
 0x58e   : > { %v4894_v0 = vadd.f32 %v9527_v20, %v4845_v28  ;;  %v4891_v37 = vadd.f32 1.0, %v8346_v58  ;;  %v9846_v27 = vld [vmem:[#allocation11_spill] sm:$0xff]  ;;  %v9848_v58 = vld [vmem:[#allocation12_spill] sm:$0xff] }
 0x58f   : > { %8347 = vrcp.f32 %v4881_v53  ;;  %6212 = vst [vmem:[%s9157_s16 + $0x8] sm:$0x3] %v9509_v38  ;;  %4972 = vmatmul.mubr.f32.vlgmr.msra.gmra.mrb[52].mxu0 %v9509_v38  ;;  %7053 = vmatmul.mubr.f32.vlgmr.msra.gmra.mrb[52].mxu1 %v9509_v38  ;;  %v9847_v53 = vld [vmem:[#allocation13_spill] sm:$0xff] }
 0x590   : > { %7961 = vmatpush1.bf16.msra.mxu0 %v8856_v3  ;;  %7992 = vmatpush3.bf16.msra.mxu1 %v8865_v9 }
 0x591   : > { %7963 = vmatprep.subr.bf16.mxu0 %v8859_v4  ;;  %7993 = vmatprep.subr.bf16.mxu1 %v9798_v62 }
 0x592   : > { %5112 = vmatprep.mubr.f32.mxu0 %v9799_v42  ;;  %7087 = vmatprep.mubr.msk.f32.mxu1 %vm8425_vm0, %v9799_v42 }
 0x594   : > { %7965 = vmatpush1.bf16.msra.mxu0 %v8873_v16  ;;  %7995 = vmatpush3.bf16.msra.mxu1 %v8883_v23 }
 0x595   : > { %7967 = vmatprep.subr.bf16.mxu0 %v8877_v17  ;;  %7996 = vmatprep.subr.bf16.mxu1 %v9798_v62 }
 0x598   : > { %7969 = vmatpush1.bf16.msra.mxu0 %v8893_v30  ;;  %7998 = vmatpush3.bf16.msra.mxu1 %v8902_v36 }
 0x599   : > { %v8348_v29 = vpop.eup %8347  ;;  %7971 = vmatprep.subr.bf16.mxu0 %v8896_v31  ;;  %7999 = vmatprep.subr.bf16.mxu1 %v9798_v62 }
 0x59a   : > { %v4895_v57 = vmul.f32 %v8348_v29, %v4894_v0  ;;  %v5189_v29 = vld [vmem:[#allocation2 + $0x1e] sm:$0x3f] }
 0x59c   : > { %v4898_v32 = vadd.f32 %v4896_v61, %v4895_v57  ;;  %7973 = vmatpush1.bf16.msra.mxu0 %v8909_v44  ;;  %8001 = vmatpush3.bf16.msra.mxu1 %v8918_v56 }
 0x59d   : > { %7975 = vmatprep.subr.bf16.mxu0 %v8912_v47  ;;  %8002 = vmatprep.subr.bf16.mxu1 %v9798_v62 }
 0x59e   : > { %8349 = vtanh.f32 %v4898_v32 }
 0x59f   : > { %8351 = vrcp.f32 %v4891_v37 }
 0x5a0   : > { %7977 = vmatpush1.bf16.msra.mxu0 %v8925_v5  ;;  %8004 = vmatpush3.bf16.msra.mxu1 %v8934_v14 }
 0x5a1   : > { %7979 = vmatprep.subr.bf16.mxu0 %v8928_v7  ;;  %8005 = vmatprep.subr.bf16.mxu1 %v9798_v62 }
 0x5a4   : > { %7981 = vmatpush1.bf16.msra.mxu0 %v8941_v25  ;;  %8007 = vmatpush3.bf16.msra.mxu1 %v8950_v35 }
 0x5a5   : > { %7983 = vmatprep.subr.bf16.mxu0 %v8944_v26  ;;  %8008 = vmatprep.subr.bf16.mxu1 %v9798_v62 }
 0x5a8   : > { %v8350_v49 = vpop.eup %8349  ;;  %7985 = vmatpush1.bf16.msra.mxu0 %v8957_v48  ;;  %8010 = vmatpush3.bf16.msra.mxu1 %v8965_v60 }
 0x5a9   : > { %7987 = vmatprep.subr.bf16.mxu0 %v8960_v52  ;;  %8011 = vmatprep.subr.bf16.mxu1 %v9798_v62  ;;  %v4900_v28 = vsub.f32 %v9461_v24, %v8350_v49  ;;  %v8352_v41 = vpop.eup %8351  ;;  %v9841_v24 = vld [vmem:[#allocation7_spill] sm:$0xff] }
 0x5ab   : > { %v4901_v22 = vmul.f32 %v8352_v41, %v4900_v28  ;;  %v5199_v28 = vrot.slane %v5189_v29, 2 }
 0x5ac   : > { %7989 = vmatpush1.bf16.msra.mxu0 %v8971_v12  ;;  %8013 = vmatpush3.bf16.msra.mxu1 %v8975_v13 }
 0x5ad   : > { %v9553_v51 = vadd.f32 %v8350_v49, %v4901_v22  ;;  %8015 = vmatprep.subr.bf16.mxu0 %v8697_v40  ;;  %8046 = vmatprep.subr.bf16.mxu1 %v9798_v62 }
 0x5af   : > { %6213 = vst [vmem:[%s9157_s16 + $0x16] sm:$0x3] %v9553_v51  ;;  %5113 = vmatmul.mubr.f32.vlgmr.msra.gmra.mrb[54].mxu0 %v9553_v51  ;;  %7088 = vmatmul.mubr.f32.vlgmr.msra.gmra.mrb[54].mxu1 %v9553_v51 }
 0x5b0   : > { %8017 = vmatpush1.bf16.msra.mxu0 %v8709_v45  ;;  %8048 = vmatpush3.bf16.msra.mxu1 %v8718_v50 }
 0x5b1   : > { %8019 = vmatprep.subr.bf16.mxu0 %v8713_v46  ;;  %8049 = vmatprep.subr.bf16.mxu1 %v9798_v62 }
 0x5b2   : > { %5311 = vmatprep.mubr.f32.mxu0 %v9799_v42  ;;  %7122 = vmatprep.mubr.msk.f32.mxu1 %vm8425_vm0, %v9799_v42 }
 0x5b4   : > { %8021 = vmatpush1.bf16.msra.mxu0 %v8730_v54  ;;  %8051 = vmatpush3.bf16.msra.mxu1 %v8739_v59 }
 0x5b5   : > { %8023 = vmatprep.subr.bf16.mxu0 %v8733_v55  ;;  %8052 = vmatprep.subr.bf16.mxu1 %v9798_v62 }
 0x5b8   : > { %8025 = vmatpush1.bf16.msra.mxu0 %v8749_v63  ;;  %8054 = vmatpush3.bf16.msra.mxu1 %v8758_v6 }
 0x5b9   : > { %8027 = vmatprep.subr.bf16.mxu0 %v8752_v2  ;;  %8055 = vmatprep.subr.bf16.mxu1 %v9798_v62 }
 0x5bc   : > { %8029 = vmatpush1.bf16.msra.mxu0 %v8765_v10  ;;  %8057 = vmatpush3.bf16.msra.mxu1 %v8774_v15 }
 0x5bd   : > { %8031 = vmatprep.subr.bf16.mxu0 %v8768_v11  ;;  %8058 = vmatprep.subr.bf16.mxu1 %v9798_v62 }
 0x5c0   : > { %8033 = vmatpush1.bf16.msra.mxu0 %v8781_v19  ;;  %8060 = vmatpush3.bf16.msra.mxu1 %v9800_v18 }
 0x5c1   : > { %8035 = vmatprep.subr.bf16.mxu0 %v9831_v43  ;;  %8061 = vmatprep.subr.bf16.mxu1 %v9798_v62  ;;  %v5190_v43 = vld [vmem:[#allocation2 + $0x3c] sm:$0x3f] }
 0x5c4   : > { %8037 = vmatpush1.bf16.msra.mxu0 %v9832_v39  ;;  %8063 = vmatpush3.bf16.msra.mxu1 %v9841_v24 }
 0x5c5   : > { %8039 = vmatprep.subr.bf16.mxu0 %v9842_v21  ;;  %8064 = vmatprep.subr.bf16.mxu1 %v9798_v62 }
 0x5c8   : > { %8041 = vmatpush1.bf16.msra.mxu0 %v9843_v34  ;;  %8066 = vmatpush3.bf16.msra.mxu1 %v9844_v8  ;;  %v5210_v34 = vrot.slane %v5189_v29, 4 }
 0x5c9   : > { %8043 = vmatprep.subr.bf16.mxu0 %v9845_v1  ;;  %8067 = vmatprep.subr.bf16.mxu1 %v9798_v62 }
 0x5cc   : > { %8045 = vmatpush1.bf16.msra.mxu0 %v9846_v27  ;;  %8069 = vmatpush3.bf16.msra.mxu1 %v9847_v53 }
 0x5cd   : > { %8071 = vmatprep.subr.bf16.mxu0 %v9848_v58  ;;  %8102 = vmatprep.subr.bf16.mxu1 %v9798_v62 }
 0x662   : > { %v4973_v0 = vpop.f32.mrb[52].mxu0  ;;  %v5044_v61 = vpop.f32.mrb[52].mxu1 }
 0x663   : > { %v5191_v57 = vadd.f32 %v5189_v29, %v4973_v0  ;;  %v4975_v32 = vpop.f32.mrb[53].mxu0  ;;  %v7054_v37 = vpop.f32.mrb[53].mxu1  ;;  %v5208_v58 = vadd.f32 %v9505_v33, %v5044_v61 }
 0x664   : > { %v5201_v41 = vadd.f32 %v5199_v28, %v4975_v32 }
 0x665   : > { %v6214_v49 = vmul.f32 -1.442695, %v5191_v57 }
 0x666   : > { %v6215_v22 = vmul.f32 -1.442695, %v5201_v41 }
 0x667   : > { %8353 = vpow2.f32 %v6214_v49 }
 0x668   : > { %8355 = vpow2.f32 %v6215_v22  ;;  %v5236_v22 = vrot.slane %v5190_v43, 4 }
 0x671   : > { %v8354_v1 = vpop.eup %8353 }
 0x672   : > { %v5195_v8 = vadd.f32 1.0, %v8354_v1  ;;  %v8356_v53 = vpop.eup %8355 }
 0x673   : > { %v5205_v39 = vadd.f32 1.0, %v8356_v53 }
 0x674   : > { %8357 = vrcp.f32 %v5195_v8  ;;  %v5225_v8 = vrot.slane %v5190_v43, 2 }
 0x67e   : > { %v8358_v27 = vpop.eup %8357 }
 0x67f   : > { %v5209_v21 = vmul.f32 %v8358_v27, %v5208_v58 }
 0x681   : > { %v5212_v24 = vadd.f32 %v5210_v34, %v5209_v21 }
 0x682   : > { %v5114_v0 = vpop.f32.mrb[54].mxu0  ;;  %v5185_v37 = vpop.f32.mrb[54].mxu1 }
 0x683   : > { %8359 = vtanh.f32 %v5212_v24  ;;  %v5217_v57 = vadd.f32 %v5190_v43, %v5114_v0  ;;  %v5116_v49 = vpop.f32.mrb[55].mxu0  ;;  %v7089_v32 = vpop.f32.mrb[55].mxu1 }
 0x684   : > { %8361 = vrcp.f32 %v5205_v39  ;;  %v5227_v28 = vadd.f32 %v5225_v8, %v5116_v49 }
 0x685   : > { %v6216_v1 = vmul.f32 -1.442695, %v5217_v57 }
 0x686   : > { %v6217_v27 = vmul.f32 -1.442695, %v5227_v28 }
 0x687   : > { %8363 = vpow2.f32 %v6216_v1 }
 0x688   : > { %8365 = vpow2.f32 %v6217_v27 }
 0x68d   : > { %v8360_v41 = vpop.eup %8359 }
 0x68e   : > { %v5214_v61 = vsub.f32 %v9509_v38, %v8360_v41  ;;  %v8362_v29 = vpop.eup %8361  ;;  %v5234_v38 = vadd.f32 %v9527_v20, %v5185_v37 }
 0x690   : > { %v5215_v21 = vmul.f32 %v8362_v29, %v5214_v61 }
 0x691   : > { %v8364_v34 = vpop.eup %8363 }
 0x692   : > { %v5221_v53 = vadd.f32 1.0, %v8364_v34  ;;  %v9598_v58 = vadd.f32 %v8360_v41, %v5215_v21  ;;  %v8366_v39 = vpop.eup %8365 }
 0x693   : > { %v5231_v49 = vadd.f32 1.0, %v8366_v39 }
 0x694   : > { %8367 = vrcp.f32 %v5221_v53  ;;  %6218 = vst [vmem:[%s9157_s16 + $0xa] sm:$0x3] %v9598_v58  ;;  %5312 = vmatmul.mubr.f32.vlgmr.msra.gmra.mrb[56].mxu0 %v9598_v58  ;;  %7123 = vmatmul.mubr.f32.vlgmr.msra.gmra.mrb[56].mxu1 %v9598_v58 }
 0x695   : > { %8073 = vmatpush1.bf16.msra.mxu0 %v8856_v3  ;;  %8104 = vmatpush3.bf16.msra.mxu1 %v8865_v9 }
 0x696   : > { %8075 = vmatprep.subr.bf16.mxu0 %v8859_v4  ;;  %8105 = vmatprep.subr.bf16.mxu1 %v9798_v62 }
 0x697   : > { %5452 = vmatprep.mubr.f32.mxu0 %v9799_v42  ;;  %7157 = vmatprep.mubr.msk.f32.mxu1 %vm8425_vm0, %v9799_v42 }
 0x699   : > { %8077 = vmatpush1.bf16.msra.mxu0 %v8873_v16  ;;  %8107 = vmatpush3.bf16.msra.mxu1 %v8883_v23 }
 0x69a   : > { %8079 = vmatprep.subr.bf16.mxu0 %v8877_v17  ;;  %8108 = vmatprep.subr.bf16.mxu1 %v9798_v62 }
 0x69d   : > { %8081 = vmatpush1.bf16.msra.mxu0 %v8893_v30  ;;  %8110 = vmatpush3.bf16.msra.mxu1 %v8902_v36 }
 0x69e   : > { %v8368_v24 = vpop.eup %8367  ;;  %8083 = vmatprep.subr.bf16.mxu0 %v8896_v31  ;;  %8111 = vmatprep.subr.bf16.mxu1 %v9798_v62 }
 0x69f   : > { %v5235_v0 = vmul.f32 %v8368_v24, %v5234_v38 }
 0x6a1   : > { %v5238_v57 = vadd.f32 %v5236_v22, %v5235_v0  ;;  %8085 = vmatpush1.bf16.msra.mxu0 %v8909_v44  ;;  %8113 = vmatpush3.bf16.msra.mxu1 %v8918_v56 }
 0x6a2   : > { %8087 = vmatprep.subr.bf16.mxu0 %v8912_v47  ;;  %8114 = vmatprep.subr.bf16.mxu1 %v9798_v62 }
 0x6a3   : > { %8369 = vtanh.f32 %v5238_v57 }
 0x6a4   : > { %8371 = vrcp.f32 %v5231_v49  ;;  %v5530_v49 = vld [vmem:[#allocation2 + $0x36] sm:$0x3f] }
 0x6a5   : > { %8089 = vmatpush1.bf16.msra.mxu0 %v8925_v5  ;;  %8116 = vmatpush3.bf16.msra.mxu1 %v8934_v14 }
 0x6a6   : > { %8091 = vmatprep.subr.bf16.mxu0 %v8928_v7  ;;  %8117 = vmatprep.subr.bf16.mxu1 %v9798_v62 }
 0x6a9   : > { %8093 = vmatpush1.bf16.msra.mxu0 %v8941_v25  ;;  %8119 = vmatpush3.bf16.msra.mxu1 %v8950_v35 }
 0x6aa   : > { %8095 = vmatprep.subr.bf16.mxu0 %v8944_v26  ;;  %8120 = vmatprep.subr.bf16.mxu1 %v9798_v62 }
 0x6ad   : > { %v8370_v43 = vpop.eup %8369  ;;  %8097 = vmatpush1.bf16.msra.mxu0 %v8957_v48  ;;  %8122 = vmatpush3.bf16.msra.mxu1 %v8965_v60 }
 0x6ae   : > { %8099 = vmatprep.subr.bf16.mxu0 %v8960_v52  ;;  %8123 = vmatprep.subr.bf16.mxu1 %v9798_v62  ;;  %v5240_v37 = vsub.f32 %v9553_v51, %v8370_v43  ;;  %v8372_v32 = vpop.eup %8371 }
 0x6b0   : > { %v5241_v1 = vmul.f32 %v8372_v32, %v5240_v37 }
 0x6b1   : > { %8101 = vmatpush1.bf16.msra.mxu0 %v8971_v12  ;;  %8125 = vmatpush3.bf16.msra.mxu1 %v8975_v13 }
 0x6b2   : > { %v9639_v8 = vadd.f32 %v8370_v43, %v5241_v1  ;;  %8127 = vmatprep.subr.bf16.mxu0 %v8697_v40  ;;  %8158 = vmatprep.subr.bf16.mxu1 %v9798_v62  ;;  %v9849_v40 = vld [vmem:[#allocation3_spill] sm:$0xff] }
 0x6b4   : > { %6219 = vst [vmem:[%s9157_s16 + $0x14] sm:$0x3] %v9639_v8  ;;  %5453 = vmatmul.mubr.f32.vlgmr.msra.gmra.mrb[58].mxu0 %v9639_v8  ;;  %7158 = vmatmul.mubr.f32.vlgmr.msra.gmra.mrb[58].mxu1 %v9639_v8 }
 0x6b5   : > { %8129 = vmatpush1.bf16.msra.mxu0 %v8709_v45  ;;  %8160 = vmatpush3.bf16.msra.mxu1 %v8718_v50  ;;  %v9850_v45 = vld [vmem:[#allocation5_spill] sm:$0xff]  ;;  %v9852_v50 = vld [vmem:[#allocation6_spill] sm:$0xff] }
 0x6b6   : > { %8131 = vmatprep.subr.bf16.mxu0 %v8713_v46  ;;  %8161 = vmatprep.subr.bf16.mxu1 %v9798_v62  ;;  %v9851_v46 = vld [vmem:[#allocation7_spill] sm:$0xff] }
 0x6b7   : > { %5651 = vmatprep.mubr.f32.mxu0 %v9799_v42  ;;  %7192 = vmatprep.mubr.msk.f32.mxu1 %vm8425_vm0, %v9799_v42 }
 0x6b9   : > { %8133 = vmatpush1.bf16.msra.mxu0 %v8730_v54  ;;  %8163 = vmatpush3.bf16.msra.mxu1 %v8739_v59  ;;  %v9853_v54 = vld [vmem:[#allocation8_spill] sm:$0xff]  ;;  %v9855_v59 = vld [vmem:[#allocation9_spill] sm:$0xff] }
 0x6ba   : > { %8135 = vmatprep.subr.bf16.mxu0 %v8733_v55  ;;  %8164 = vmatprep.subr.bf16.mxu1 %v9798_v62  ;;  %v9854_v55 = vld [vmem:[#allocation10_spill] sm:$0xff] }
 0x6bd   : > { %8137 = vmatpush1.bf16.msra.mxu0 %v8749_v63  ;;  %8166 = vmatpush3.bf16.msra.mxu1 %v8758_v6  ;;  %v9856_v63 = vld [vmem:[#allocation11_spill] sm:$0xff]  ;;  %v9858_v6 = vld [vmem:[#allocation12_spill] sm:$0xff] }
 0x6be   : > { %8139 = vmatprep.subr.bf16.mxu0 %v8752_v2  ;;  %8167 = vmatprep.subr.bf16.mxu1 %v9798_v62  ;;  %v9857_v2 = vld [vmem:[#allocation13_spill] sm:$0xff] }
 0x6c1   : > { %8141 = vmatpush1.bf16.msra.mxu0 %v8765_v10  ;;  %8169 = vmatpush3.bf16.msra.mxu1 %v8774_v15 }
 0x6c2   : > { %8143 = vmatprep.subr.bf16.mxu0 %v8768_v11  ;;  %8170 = vmatprep.subr.bf16.mxu1 %v9798_v62  ;;  %v5529_v11 = vld [vmem:[#allocation2 + $0x24] sm:$0x3f] }
 0x6c3   : > { %v5539_v41 = vrot.slane %v5529_v11, 2  ;;  %v5550_v38 = vrot.slane %v5529_v11, 4 }
 0x6c5   : > { %8145 = vmatpush1.bf16.msra.mxu0 %v8781_v19  ;;  %8172 = vmatpush3.bf16.msra.mxu1 %v9800_v18 }
 0x6c6   : > { %8147 = vmatprep.subr.bf16.mxu0 %v9849_v40  ;;  %8173 = vmatprep.subr.bf16.mxu1 %v9798_v62 }
 0x6c9   : > { %8149 = vmatpush1.bf16.msra.mxu0 %v9850_v45  ;;  %8175 = vmatpush3.bf16.msra.mxu1 %v9851_v46  ;;  %v5565_v45 = vrot.slane %v5530_v49, 2 }
 0x6ca   : > { %8151 = vmatprep.subr.bf16.mxu0 %v9852_v50  ;;  %8176 = vmatprep.subr.bf16.mxu1 %v9798_v62 }
 0x6cd   : > { %8153 = vmatpush1.bf16.msra.mxu0 %v9853_v54  ;;  %8178 = vmatpush3.bf16.msra.mxu1 %v9854_v55 }
 0x6ce   : > { %8155 = vmatprep.subr.bf16.mxu0 %v9855_v59  ;;  %8179 = vmatprep.subr.bf16.mxu1 %v9798_v62 }
 0x6d1   : > { %8157 = vmatpush1.bf16.msra.mxu0 %v9856_v63  ;;  %8181 = vmatpush3.bf16.msra.mxu1 %v9857_v2 }
 0x6d2   : > { %8183 = vmatprep.subr.bf16.mxu0 %v9858_v6  ;;  %8214 = vmatprep.subr.bf16.mxu1 %v9798_v62 }
 0x767   : > { %v5313_v10 = vpop.f32.mrb[56].mxu0  ;;  %v5384_v15 = vpop.f32.mrb[56].mxu1 }
 0x768   : > { %v5531_v19 = vadd.f32 %v5529_v11, %v5313_v10  ;;  %v5315_v18 = vpop.f32.mrb[57].mxu0  ;;  %v7124_v51 = vpop.f32.mrb[57].mxu1  ;;  %v5548_v53 = vadd.f32 %v9505_v33, %v5384_v15 }
 0x769   : > { %v5541_v61 = vadd.f32 %v5539_v41, %v5315_v18 }
 0x76a   : > { %v6220_v28 = vmul.f32 -1.442695, %v5531_v19 }
 0x76b   : > { %v6221_v29 = vmul.f32 -1.442695, %v5541_v61 }
 0x76c   : > { %8373 = vpow2.f32 %v6220_v28  ;;  %v5870_v28 = vld [vmem:[#allocation2 + $0x30] sm:$0x3f] }
 0x76d   : > { %8375 = vpow2.f32 %v6221_v29 }
 0x776   : > { %v8374_v27 = vpop.eup %8373 }
 0x777   : > { %v5535_v21 = vadd.f32 1.0, %v8374_v27  ;;  %v8376_v34 = vpop.eup %8375 }
 0x778   : > { %v5545_v0 = vadd.f32 1.0, %v8376_v34  ;;  %v5905_v34 = vrot.slane %v5870_v28, 2 }
 0x779   : > { %8377 = vrcp.f32 %v5535_v21 }
 0x783   : > { %v8378_v39 = vpop.eup %8377 }
 0x784   : > { %v5549_v24 = vmul.f32 %v8378_v39, %v5548_v53 }
 0x786   : > { %v5552_v22 = vadd.f32 %v5550_v38, %v5549_v24 }
 0x787   : > { %v5454_v57 = vpop.f32.mrb[58].mxu0  ;;  %v5525_v43 = vpop.f32.mrb[58].mxu1 }
 0x788   : > { %8379 = vtanh.f32 %v5552_v22  ;;  %v5557_v37 = vadd.f32 %v5530_v49, %v5454_v57  ;;  %v5456_v32 = vpop.f32.mrb[59].mxu0  ;;  %v7159_v1 = vpop.f32.mrb[59].mxu1 }
 0x789   : > { %8381 = vrcp.f32 %v5545_v0  ;;  %v5567_v46 = vadd.f32 %v5565_v45, %v5456_v32  ;;  %v5916_v1 = vrot.slane %v5870_v28, 4 }
 0x78a   : > { %v6222_v40 = vmul.f32 -1.442695, %v5557_v37 }
 0x78b   : > { %v6223_v59 = vmul.f32 -1.442695, %v5567_v46 }
 0x78c   : > { %8383 = vpow2.f32 %v6222_v40 }
 0x78d   : > { %8385 = vpow2.f32 %v6223_v59 }
 0x792   : > { %v8380_v50 = vpop.eup %8379 }
 0x793   : > { %v5554_v54 = vsub.f32 %v9598_v58, %v8380_v50  ;;  %v8382_v55 = vpop.eup %8381 }
 0x795   : > { %v5555_v63 = vmul.f32 %v8382_v55, %v5554_v54 }
 0x796   : > { %v8384_v2 = vpop.eup %8383 }
 0x797   : > { %v5561_v6 = vadd.f32 1.0, %v8384_v2  ;;  %v9684_v10 = vadd.f32 %v8380_v50, %v5555_v63 }
 0x799   : > { %8387 = vrcp.f32 %v5561_v6  ;;  %6224 = vst [vmem:[%s9157_s16 + $0xc] sm:$0x3] %v9684_v10  ;;  %5652 = vmatmul.mubr.f32.vlgmr.msra.gmra.mrb[60].mxu0 %v9684_v10  ;;  %7193 = vmatmul.mubr.f32.vlgmr.msra.gmra.mrb[60].mxu1 %v9684_v10 }
 0x79a   : > { %8185 = vmatpush1.bf16.msra.mxu0 %v8856_v3  ;;  %8216 = vmatpush3.bf16.msra.mxu1 %v8865_v9  ;;  %v8386_v3 = vpop.eup %8385  ;;  %v5574_v9 = vadd.f32 %v9527_v20, %v5525_v43 }
 0x79b   : > { %8187 = vmatprep.subr.bf16.mxu0 %v8859_v4  ;;  %8217 = vmatprep.subr.bf16.mxu1 %v9798_v62 }
 0x79c   : > { %5792 = vmatprep.mubr.f32.mxu0 %v9799_v42  ;;  %7227 = vmatprep.mubr.msk.f32.mxu1 %vm8425_vm0, %v9799_v42  ;;  %v5576_v42 = vrot.slane %v5530_v49, 4 }
 0x79e   : > { %8189 = vmatpush1.bf16.msra.mxu0 %v8873_v16  ;;  %8219 = vmatpush3.bf16.msra.mxu1 %v8883_v23  ;;  %v5571_v23 = vadd.f32 1.0, %v8386_v3 }
 0x79f   : > { %8191 = vmatprep.subr.bf16.mxu0 %v8877_v17  ;;  %8220 = vmatprep.subr.bf16.mxu1 %v9798_v62 }
 0x7a2   : > { %8193 = vmatpush1.bf16.msra.mxu0 %v8893_v30  ;;  %8222 = vmatpush3.bf16.msra.mxu1 %v8902_v36 }
 0x7a3   : > { %v8388_v4 = vpop.eup %8387  ;;  %8195 = vmatprep.subr.bf16.mxu0 %v8896_v31  ;;  %8223 = vmatprep.subr.bf16.mxu1 %v9798_v62 }
 0x7a4   : > { %v5575_v16 = vmul.f32 %v8388_v4, %v5574_v9 }
 0x7a6   : > { %v5578_v58 = vadd.f32 %v5576_v42, %v5575_v16  ;;  %8197 = vmatpush1.bf16.msra.mxu0 %v8909_v44  ;;  %8225 = vmatpush3.bf16.msra.mxu1 %v8918_v56  ;;  %v5869_v56 = vld [vmem:[#allocation2 + $0x2a] sm:$0x3f] }
 0x7a7   : > { %8199 = vmatprep.subr.bf16.mxu0 %v8912_v47  ;;  %8226 = vmatprep.subr.bf16.mxu1 %v9798_v62  ;;  %v5890_v11 = vrot.slane %v5869_v56, 4 }
 0x7a8   : > { %8389 = vtanh.f32 %v5578_v58 }
 0x7a9   : > { %8391 = vrcp.f32 %v5571_v23 }
 0x7aa   : > { %8201 = vmatpush1.bf16.msra.mxu0 %v8925_v5  ;;  %8228 = vmatpush3.bf16.msra.mxu1 %v8934_v14 }
 0x7ab   : > { %8203 = vmatprep.subr.bf16.mxu0 %v8928_v7  ;;  %8229 = vmatprep.subr.bf16.mxu1 %v9798_v62 }
 0x7ae   : > { %8205 = vmatpush1.bf16.msra.mxu0 %v8941_v25  ;;  %8231 = vmatpush3.bf16.msra.mxu1 %v8950_v35  ;;  %v5879_v35 = vrot.slane %v5869_v56, 2 }
 0x7af   : > { %8207 = vmatprep.subr.bf16.mxu0 %v8944_v26  ;;  %8232 = vmatprep.subr.bf16.mxu1 %v9798_v62 }
 0x7b2   : > { %v8390_v17 = vpop.eup %8389  ;;  %8209 = vmatpush1.bf16.msra.mxu0 %v8957_v48  ;;  %8234 = vmatpush3.bf16.msra.mxu1 %v8965_v60 }
 0x7b3   : > { %8211 = vmatprep.subr.bf16.mxu0 %v8960_v52  ;;  %8235 = vmatprep.subr.bf16.mxu1 %v9798_v62  ;;  %v5580_v30 = vsub.f32 %v9639_v8, %v8390_v17  ;;  %v8392_v31 = vpop.eup %8391 }
 0x7b5   : > { %v5581_v36 = vmul.f32 %v8392_v31, %v5580_v30 }
 0x7b6   : > { %8213 = vmatpush1.bf16.msra.mxu0 %v8971_v12  ;;  %8237 = vmatpush3.bf16.msra.mxu1 %v8975_v13 }
 0x7b7   : > { %v9725_v44 = vadd.f32 %v8390_v17, %v5581_v36 }
 0x7b9   : > { %6225 = vst [vmem:[%s9157_s16 + $0x12] sm:$0x3] %v9725_v44  ;;  %5793 = vmatmul.mubr.f32.vlgmr.msra.gmra.mrb[62].mxu0 %v9725_v44  ;;  %7228 = vmatmul.mubr.f32.vlgmr.msra.gmra.mrb[62].mxu1 %v9725_v44 }
 0x86c   : > { %v5653_v47 = vpop.f32.mrb[60].mxu0  ;;  %v5724_v5 = vpop.f32.mrb[60].mxu1 }
 0x86d   : > { %v5871_v7 = vadd.f32 %v5869_v56, %v5653_v47  ;;  %v5655_v14 = vpop.f32.mrb[61].mxu0  ;;  %v7194_v25 = vpop.f32.mrb[61].mxu1  ;;  %v5888_v62 = vadd.f32 %v9505_v33, %v5724_v5 }
 0x86e   : > { %v5881_v48 = vadd.f32 %v5879_v35, %v5655_v14 }
 0x86f   : > { %v6226_v26 = vmul.f32 -1.442695, %v5871_v7 }
 0x870   : > { %v6227_v52 = vmul.f32 -1.442695, %v5881_v48 }
 0x871   : > { %8393 = vpow2.f32 %v6226_v26 }
 0x872   : > { %8395 = vpow2.f32 %v6227_v52 }
 0x87b   : > { %v8394_v60 = vpop.eup %8393 }
 0x87c   : > { %v5875_v12 = vadd.f32 1.0, %v8394_v60  ;;  %v8396_v13 = vpop.eup %8395 }
 0x87d   : > { %v5885_v18 = vadd.f32 1.0, %v8396_v13 }
 0x87e   : > { %8397 = vrcp.f32 %v5875_v12 }
 0x888   : > { %v8398_v8 = vpop.eup %8397 }
 0x889   : > { %v5889_v15 = vmul.f32 %v8398_v8, %v5888_v62 }
 0x88b   : > { %v5892_v19 = vadd.f32 %v5890_v11, %v5889_v15 }
 0x88c   : > { %v5794_v51 = vpop.f32.mrb[62].mxu0  ;;  %v5865_v41 = vpop.f32.mrb[62].mxu1 }
 0x88d   : > { %8399 = vtanh.f32 %v5892_v19  ;;  %v5897_v61 = vadd.f32 %v5870_v28, %v5794_v51  ;;  %v5796_v29 = vpop.f32.mrb[63].mxu0  ;;  %v7229_v27 = vpop.f32.mrb[63].mxu1  ;;  %v5914_v37 = vadd.f32 %v9527_v20, %v5865_v41 }
 0x88e   : > { %8401 = vrcp.f32 %v5885_v18  ;;  %v5907_v53 = vadd.f32 %v5905_v34, %v5796_v29 }
 0x88f   : > { %v6228_v21 = vmul.f32 -1.442695, %v5897_v61 }
 0x890   : > { %v6229_v24 = vmul.f32 -1.442695, %v5907_v53 }
 0x891   : > { %8403 = vpow2.f32 %v6228_v21 }
 0x892   : > { %8405 = vpow2.f32 %v6229_v24 }
 0x897   : > { %v8400_v33 = vpop.eup %8399 }
 0x898   : > { %v5894_v39 = vsub.f32 %v9684_v10, %v8400_v33  ;;  %v8402_v38 = vpop.eup %8401 }
 0x89a   : > { %v5895_v22 = vmul.f32 %v8402_v38, %v5894_v39 }
 0x89b   : > { %v8404_v0 = vpop.eup %8403 }
 0x89c   : > { %v5896_v57 = vadd.f32 %v8400_v33, %v5895_v22  ;;  %v5901_v49 = vadd.f32 1.0, %v8404_v0  ;;  %v8406_v43 = vpop.eup %8405 }
 0x89d   : > { %v5911_v46 = vadd.f32 1.0, %v8406_v43 }
 0x89e   : > { %6230 = vst [vmem:[%s9157_s16 + $0xe] sm:$0x3] %v5896_v57  ;;  %5927 = vst [vmem:[%s365_s19] sm:$0x3] %v5896_v57  ;;  %8407 = vrcp.f32 %v5901_v49 }
 0x8a8   : > { %v8408_v32 = vpop.eup %8407 }
 0x8a9   : > { %v5915_v40 = vmul.f32 %v8408_v32, %v5914_v37 }
 0x8ab   : > { %v5918_v45 = vadd.f32 %v5916_v1, %v5915_v40 }
 0x8ad   : > { %8409 = vtanh.f32 %v5918_v45 }
 0x8ae   : > { %8411 = vrcp.f32 %v5911_v46 }
 0x8b7   : > { %v8410_v50 = vpop.eup %8409 }
 0x8b8   : > { %v5920_v54 = vsub.f32 %v9725_v44, %v8410_v50  ;;  %v8412_v55 = vpop.eup %8411 }
 0x8ba   : > { %v5921_v59 = vmul.f32 %v8412_v55, %v5920_v54 }
 0x8bc   : > { %v5922_v63 = vadd.f32 %v8410_v50, %v5921_v59 }
 0x8be   : > { %6231 = vst [vmem:[%s9157_s16 + $0x10] sm:$0x3] %v5922_v63  ;;  %6232 = vst [vmem:[%s365_s19 + $0x2] sm:$0x3] %v5922_v63 }
 0x8bf PF: > { %s18_s24 = sadd.s32 1, %s8421_s24  }
 0x8c0   : > { %p15_p4 = scmp.ge.s32.totalorder %s18_s24, 4  }
 0x8c2   :  { %17 = sbr.rel (!%p15_p4) target bundleno = 1 (0x1), region = 141 }

</bundles_post_ra>
